<compile_context>
chip_gen: v7x
topology: tpu7x:2x2x1
jax: 0.10.0
libtpu: 0.0.40
codegen_flags: <defaults>
</compile_context>

<pallas_src>
import jax
import jax.numpy as jnp
from jax.experimental import pallas as pl
from jax.experimental.pallas import tpu as pltpu

IN_FEATURES = 4096
HIDDEN = 512
NUM_CLASSES = 10
N_PAD = 128        # lane-dense padded output width (>= NUM_CLASSES, multiple of 128)
MAX_B_TILE = 128   # batch tile for large batches


def classifier_kernel(x_ref, w1_ref, b1_ref, w2_ref, b2_ref, o_ref):
    """Fused MLP: (x @ W1 + b1) -> ReLU -> (@ W2 + b2), one batch tile per step."""
    # Cast the f32 activation block to bf16 in-kernel (cheap VPU cast) so both
    # matmuls run as bf16 x bf16 on the MXU with f32 accumulation.
    x_bf = x_ref[...].astype(jnp.bfloat16)
    h = jnp.dot(x_bf, w1_ref[...], preferred_element_type=jnp.float32)
    h = jnp.maximum(h + b1_ref[...], 0.0)          # bias + ReLU
    # Dropout(p=0.2) is identity at inference time.
    out = jnp.dot(h.astype(jnp.bfloat16), w2_ref[...],
                  preferred_element_type=jnp.float32)
    o_ref[...] = (out + b2_ref[...]).astype(o_ref.dtype)


def prepare_params(w1, b1, w2, b2):
    """One-time conversion to kernel layout. Call at parameter-load time, NOT
    per forward call (keeps W1 persistently bf16, W2/b2 pre-padded)."""
    w1_bf = w1.astype(jnp.bfloat16)                                   # (4096, 512)
    b1_f = jnp.asarray(b1, jnp.float32).reshape(1, HIDDEN)            # (1, 512)
    w2_pad = jnp.zeros((HIDDEN, N_PAD), jnp.bfloat16).at[:, :NUM_CLASSES].set(
        w2.astype(jnp.bfloat16))                                      # (512, 128) bf16
    b2_pad = jnp.zeros((1, N_PAD), jnp.float32).at[:, :NUM_CLASSES].set(
        jnp.asarray(b2, jnp.float32).reshape(1, NUM_CLASSES))         # (1, 128)
    return w1_bf, b1_f, w2_pad, b2_pad


def classifier_bn_forward(x, w1_bf, b1_f, w2_pad, b2_pad):
    B = x.shape[0]
    assert x.shape[1] == IN_FEATURES

    # Small batches: a single block equal to the full batch dim (always legal).
    # Large batches: 128-row tiles, ragged last tile handled by Pallas masking.
    b_tile = B if B <= MAX_B_TILE else MAX_B_TILE
    n_b = pl.cdiv(B, b_tile)

    out_padded = pl.pallas_call(
        classifier_kernel,
        out_shape=jax.ShapeDtypeStruct((B, N_PAD), jnp.float32),
        grid=(n_b,),
        in_specs=[
            pl.BlockSpec((b_tile, IN_FEATURES), lambda i: (i, 0)),   # x tile (f32)
            pl.BlockSpec((IN_FEATURES, HIDDEN), lambda i: (0, 0)),   # W1 resident (bf16)
            pl.BlockSpec((1, HIDDEN), lambda i: (0, 0)),             # b1 resident
            pl.BlockSpec((HIDDEN, N_PAD), lambda i: (0, 0)),         # W2 resident (bf16)
            pl.BlockSpec((1, N_PAD), lambda i: (0, 0)),              # b2 resident
        ],
        out_specs=pl.BlockSpec((b_tile, N_PAD), lambda i: (i, 0)),
        compiler_params=pltpu.CompilerParams(
            dimension_semantics=("parallel",),
            vmem_limit_bytes=32 * 1024 * 1024,   # headroom for v5e's 16 MiB default
        ),
    )(x, w1_bf, b1_f, w2_pad, b2_pad)

    return out_padded[:, :NUM_CLASSES]


def xavier_uniform(key, fan_in, fan_out, dtype=jnp.float32):
    # nn.init.xavier_uniform_ with gain=1: U(-a, a), a = sqrt(6/(fan_in+fan_out)).
    bound = (6.0 / (fan_in + fan_out)) ** 0.5
    return jax.random.uniform(
        key, (fan_in, fan_out), dtype=dtype, minval=-bound, maxval=bound
    )


if __name__ == "__main__":
    key = jax.random.PRNGKey(0)
    kx, k1, k2 = jax.random.split(key, 3)

    B = 8  # small sublane-aligned batch
    x = jax.random.normal(kx, (B, IN_FEATURES), dtype=jnp.float32)

    # Deterministic parameter init matching the module's __init__.
    w1 = xavier_uniform(k1, IN_FEATURES, HIDDEN)
    b1 = jnp.zeros((1, HIDDEN), dtype=jnp.float32)
    w2 = xavier_uniform(k2, HIDDEN, NUM_CLASSES)
    b2 = jnp.zeros((1, NUM_CLASSES), dtype=jnp.float32)

    # One-time parameter preparation (parameter-load time, not per-call).
    params = prepare_params(w1, b1, w2, b2)
    params = tuple(jax.block_until_ready(p) for p in params)

    out = classifier_bn_forward(x, *params)
    out = jax.block_until_ready(out)

    # Pure-JAX reference (eval-mode dropout == identity), mirroring the kernel's
    # bf16 operand rounding with f32 accumulation.
    x_q = x.astype(jnp.bfloat16).astype(jnp.float32)
    w1_q = w1.astype(jnp.bfloat16).astype(jnp.float32)
    h_ref = jnp.maximum(x_q @ w1_q + b1, 0.0)
    h_q = h_ref.astype(jnp.bfloat16).astype(jnp.float32)
    w2_q = w2.astype(jnp.bfloat16).astype(jnp.float32)
    ref = h_q @ w2_q + b2

    assert out.shape == (B, NUM_CLASSES)
    assert jnp.allclose(out, ref, atol=3e-2, rtol=3e-2)

    print("KERNEL_OK")
</pallas_src>

<mosaic_0001>
module attributes {stable_mosaic.version = 11 : i64} {
  func.func @classifier_kernel(%arg0: i32, %arg1: memref<8x4096xf32, #tpu.memory_space<vmem>>, %arg2: memref<4096x512xbf16, #tpu.memory_space<vmem>>, %arg3: memref<1x512xf32, #tpu.memory_space<vmem>>, %arg4: memref<512x128xbf16, #tpu.memory_space<vmem>>, %arg5: memref<1x128xf32, #tpu.memory_space<vmem>>, %arg6: memref<8x128xf32, #tpu.memory_space<vmem>>) attributes {dimension_semantics = [#tpu.dimension_semantics<parallel>], iteration_bounds = array<i64: 1>, scalar_prefetch = 0 : i64, scratch_operands = 0 : i64, tpu.core_type = #tpu.core_type<tc>, window_params = [{transform_indices = @transform_0, window_bounds = array<i64: 8, 4096>}, {pipeline_mode = #tpu.pipeline_mode<synchronous>, transform_indices = @transform_1, window_bounds = array<i64: 4096, 512>}, {pipeline_mode = #tpu.pipeline_mode<synchronous>, transform_indices = @transform_2, window_bounds = array<i64: 1, 512>}, {pipeline_mode = #tpu.pipeline_mode<synchronous>, transform_indices = @transform_3, window_bounds = array<i64: 512, 128>}, {pipeline_mode = #tpu.pipeline_mode<synchronous>, transform_indices = @transform_4, window_bounds = array<i64: 1, 128>}, {transform_indices = @transform_5, window_bounds = array<i64: 8, 128>}]} {
    %c0 = arith.constant 0 : index
    %c0_0 = arith.constant 0 : index
    %0 = vector.load %arg1[%c0, %c0_0] : memref<8x4096xf32, #tpu.memory_space<vmem>>, vector<8x4096xf32>
    %1 = arith.truncf %0 : vector<8x4096xf32> to vector<8x4096xbf16>
    %c0_1 = arith.constant 0 : index
    %c0_2 = arith.constant 0 : index
    %2 = vector.load %arg2[%c0_1, %c0_2] : memref<4096x512xbf16, #tpu.memory_space<vmem>>, vector<4096x512xbf16>
    %cst = arith.constant dense<0.000000e+00> : vector<8x512xf32>
    %3 = tpu.matmul %1, %2, %cst {dimension_numbers = #tpu.dot_dimension_numbers<[1], [0], [0], [1], [0, 0, 1, 1], [], []>} : vector<8x4096xbf16>, vector<4096x512xbf16>, vector<8x512xf32> -> vector<8x512xf32>
    %c0_3 = arith.constant 0 : index
    %c0_4 = arith.constant 0 : index
    %4 = vector.load %arg3[%c0_3, %c0_4] : memref<1x512xf32, #tpu.memory_space<vmem>>, vector<1x512xf32>
    %5 = vector.broadcast %4 : vector<1x512xf32> to vector<8x512xf32>
    %6 = arith.addf %3, %5 : vector<8x512xf32>
    %cst_5 = arith.constant 0.000000e+00 : f32
    %7 = vector.broadcast %cst_5 : f32 to vector<8x512xf32>
    %8 = arith.maximumf %6, %7 : vector<8x512xf32>
    %9 = arith.truncf %8 : vector<8x512xf32> to vector<8x512xbf16>
    %c0_6 = arith.constant 0 : index
    %c0_7 = arith.constant 0 : index
    %10 = vector.load %arg4[%c0_6, %c0_7] : memref<512x128xbf16, #tpu.memory_space<vmem>>, vector<512x128xbf16>
    %cst_8 = arith.constant dense<0.000000e+00> : vector<8x128xf32>
    %11 = tpu.matmul %9, %10, %cst_8 {dimension_numbers = #tpu.dot_dimension_numbers<[1], [0], [0], [1], [0, 0, 1, 1], [], []>} : vector<8x512xbf16>, vector<512x128xbf16>, vector<8x128xf32> -> vector<8x128xf32>
    %c0_9 = arith.constant 0 : index
    %c0_10 = arith.constant 0 : index
    %12 = vector.load %arg5[%c0_9, %c0_10] : memref<1x128xf32, #tpu.memory_space<vmem>>, vector<1x128xf32>
    %13 = vector.broadcast %12 : vector<1x128xf32> to vector<8x128xf32>
    %14 = arith.addf %11, %13 : vector<8x128xf32>
    %c0_11 = arith.constant 0 : index
    %c0_12 = arith.constant 0 : index
    %15 = vector.load %arg6[%c0_11, %c0_12] : memref<8x128xf32, #tpu.memory_space<vmem>>, vector<8x128xf32>
    tpu.vector_store %arg6[%c0_11, %c0_12], %14 {strides = array<i32>} : memref<8x128xf32, #tpu.memory_space<vmem>>, vector<8x128xf32>,
    return
  }
  func.func @transform_0(%arg0: i32) -> (i32, i32) {
    %c0_i32 = arith.constant 0 : i32
    %c0_i32_0 = arith.constant 0 : i32
    return %arg0, %c0_i32 : i32, i32
  }
  func.func @transform_1(%arg0: i32) -> (i32, i32) {
    %c0_i32 = arith.constant 0 : i32
    %c0_i32_0 = arith.constant 0 : i32
    %c0_i32_1 = arith.constant 0 : i32
    return %c0_i32, %c0_i32_0 : i32, i32
  }
  func.func @transform_2(%arg0: i32) -> (i32, i32) {
    %c0_i32 = arith.constant 0 : i32
    %c0_i32_0 = arith.constant 0 : i32
    %c0_i32_1 = arith.constant 0 : i32
    return %c0_i32, %c0_i32_0 : i32, i32
  }
  func.func @transform_3(%arg0: i32) -> (i32, i32) {
    %c0_i32 = arith.constant 0 : i32
    %c0_i32_0 = arith.constant 0 : i32
    %c0_i32_1 = arith.constant 0 : i32
    return %c0_i32, %c0_i32_0 : i32, i32
  }
  func.func @transform_4(%arg0: i32) -> (i32, i32) {
    %c0_i32 = arith.constant 0 : i32
    %c0_i32_0 = arith.constant 0 : i32
    %c0_i32_1 = arith.constant 0 : i32
    return %c0_i32, %c0_i32_0 : i32, i32
  }
  func.func @transform_5(%arg0: i32) -> (i32, i32) {
    %c0_i32 = arith.constant 0 : i32
    %c0_i32_0 = arith.constant 0 : i32
    return %arg0, %c0_i32 : i32, i32
  }
}

</mosaic_0001>

<bundles_post_ra>
// kernel: tpu_custom_call.1
= control target key start
LH: loop header
LB: loop body
LE: loop exit
PB: predicated region body
PF: predicated region fallthrough
CT: control target
= control target key end

     0   :  { %10 = vsyncpa [#allocation3], 0  ;;  %s11050_s0 = inlined_call_operand.hbm [shape: f32[8,4096], index: 0, kind: input, shape index: {}]   ;;  %s11051_s1 = inlined_call_operand.hbm [shape: bf16[4096,512], index: 1, kind: input, shape index: {}]   ;;  %s11052_s2 = inlined_call_operand.hbm [shape: f32[1,512], index: 2, kind: input, shape index: {}]   ;;  %s11053_s3 = inlined_call_operand.hbm [shape: bf16[512,128], index: 3, kind: input, shape index: {}]   ;;  %s11054_s4 = inlined_call_operand.hbm [shape: f32[1,128], index: 4, kind: input, shape index: {}]   ;;  %s11055_s5 = inlined_call_operand.hbm [shape: f32[8,128], index: 5, kind: output, shape index: {}]  }
   0x1   :  { %11 = vsyncpa [#allocation6], 0 }
   0x2   :  { %12 = vsyncpa [#allocation9], 0 }
   0x3   :  { %13 = vsyncpa [#allocation4], 0  ;;  %s10938_s18 = smov [#allocation5]   ;;  %s10798_s22 = scalar_lea.hbm %s11051_s1, 131072 }
   0x4   :  { %s29_s19 = sshll.u32 %s10938_s18, 4  ;;  %p10799_p0 = scmp.ne.s32.totalorder %s11051_s1, %s10798_s22  ;;  %s30_s19 = int_to_ptr.vmem [resolvable:$true] %s29_s19 }
   0x5   :  { %p10802_p1 = scmp.lt.u32.totalorder %s10798_s22, %s11051_s1 }
   0x7   :  { %p10804_p2 = pnand %p10802_p1, %p10799_p0 }
   0x9   :  { %10807 = shalt.err (!%p10804_p2)
}
   0xa   :  { %s10808_s27 = scalar_lea.vmem %s30_s19, 131072  ;;  %p10813_p4 = scmp.lt.s32.totalorder %s30_s19, %s30_s19 }
   0xb   :  { %p10809_p3 = scmp.ne.s32.totalorder %s30_s19, %s10808_s27  ;;  %p10814_p5 = scmp.lt.s32.totalorder %s10808_s27, %s10808_s27 }
   0xd   :  { %p10815_p6 = por %p10814_p5, %p10813_p4 }
   0xf   :  { %p10816_p7 = pnand %p10815_p6, %p10809_p3 }
  0x11   :  { %10819 = shalt.err (!%p10816_p7)
}
  0x12   :  { %s10939_s28 = smov 256   ;;  %s10940_s29 = smov 16  }
  0x13   :  { %35 = dma.hbm_to_vmem [thread:$0]  %s11051_s1, 131072, %s30_s19, [#allocation6], %s10939_s28, %s10939_s28, %s10940_s29  }
  0x14   :  { %s10941_s7 = smov [#allocation8]   ;;  %s10820_s11 = scalar_lea.hbm %s11053_s3, 4096 }
  0x15   :  { %s51_s8 = sshll.u32 %s10941_s7, 4  ;;  %p10821_p8 = scmp.ne.s32.totalorder %s11053_s3, %s10820_s11  ;;  %s52_s8 = int_to_ptr.vmem [resolvable:$true] %s51_s8 }
  0x16   :  { %p10824_p9 = scmp.lt.u32.totalorder %s10820_s11, %s11053_s3 }
  0x18   :  { %p10826_p10 = pnand %p10824_p9, %p10821_p8 }
  0x1a   :  { %10829 = shalt.err (!%p10826_p10)
}
  0x1b   :  { %s10830_s16 = scalar_lea.vmem %s52_s8, 4096  ;;  %p10835_p12 = scmp.lt.s32.totalorder %s52_s8, %s52_s8 }
  0x1c   :  { %p10831_p11 = scmp.ne.s32.totalorder %s52_s8, %s10830_s16  ;;  %p10836_p13 = scmp.lt.s32.totalorder %s10830_s16, %s10830_s16 }
  0x1e   :  { %p10837_p0 = por %p10836_p13, %p10835_p12 }
  0x20   :  { %p10838_p1 = pnand %p10837_p0, %p10831_p11 }
  0x22   :  { %10841 = shalt.err (!%p10838_p1)
}
  0x23   :  { %s10942_s1 = smov 64   ;;  %s10943_s17 = smov 4  }
  0x24   :  { %57 = dma.hbm_to_vmem [thread:$0]  %s11053_s3, 4096, %s52_s8, [#allocation9], %s10942_s1, %s10942_s1, %s10943_s17  }
  0x25   :  { %s10944_s20 = smov [#allocation2]   ;;  %s10945_s22 = smov [#allocation7]  }
  0x26   :  { %s20_s21 = sshll.u32 %s10944_s20, 4  ;;  %s42_s23 = sshll.u32 %s10945_s22, 4  ;;  %s21_s21 = int_to_ptr.vmem [resolvable:$true] %s20_s21  ;;  %s43_s23 = int_to_ptr.vmem [resolvable:$true] %s42_s23 }
  0x27   :  { %s10842_s26 = scalar_lea.hbm %s11050_s0, 4096 }
  0x28   :  { %p10843_p2 = scmp.ne.s32.totalorder %s11050_s0, %s10842_s26  ;;  %p10846_p3 = scmp.lt.u32.totalorder %s10842_s26, %s11050_s0 }
  0x2a   :  { %p10848_p4 = pnand %p10846_p3, %p10843_p2 }
  0x2c   :  { %10851 = shalt.err (!%p10848_p4)
}
  0x2d   :  { %s10852_s3 = scalar_lea.vmem %s21_s21, 4096  ;;  %p10857_p6 = scmp.lt.s32.totalorder %s21_s21, %s21_s21 }
  0x2e   :  { %p10853_p5 = scmp.ne.s32.totalorder %s21_s21, %s10852_s3  ;;  %p10858_p7 = scmp.lt.s32.totalorder %s10852_s3, %s10852_s3 }
  0x30   :  { %p10859_p8 = por %p10858_p7, %p10857_p6 }
  0x32   :  { %p10860_p9 = pnand %p10859_p8, %p10853_p5 }
  0x34   :  { %10863 = shalt.err (!%p10860_p9)
}
  0x35   :  { %23 = dma.hbm_to_vmem [thread:$0]  %s11050_s0, 4096, %s21_s21, [#allocation3]  }
  0x36   :  { %s10864_s10 = scalar_lea.hbm %s11052_s2, 64 }
  0x37   :  { %p10865_p10 = scmp.ne.s32.totalorder %s11052_s2, %s10864_s10  ;;  %p10868_p11 = scmp.lt.u32.totalorder %s10864_s10, %s11052_s2 }
  0x39   :  { %p10870_p12 = pnand %p10868_p11, %p10865_p10 }
  0x3b   :  { %10873 = shalt.err (!%p10870_p12)
}
  0x3c   :  { %s10874_s15 = scalar_lea.vmem %s43_s23, 64  ;;  %p10879_p0 = scmp.lt.s32.totalorder %s43_s23, %s43_s23 }
  0x3d   :  { %p10875_p13 = scmp.ne.s32.totalorder %s43_s23, %s10874_s15  ;;  %p10880_p1 = scmp.lt.s32.totalorder %s10874_s15, %s10874_s15 }
  0x3f   :  { %p10881_p2 = por %p10880_p1, %p10879_p0 }
  0x41   :  { %p10882_p3 = pnand %p10881_p2, %p10875_p13 }
  0x43   :  { %10885 = shalt.err (!%p10882_p3)
}
  0x44   :  { %45 = dma.hbm_to_vmem [thread:$0]  %s11052_s2, 64, %s43_s23, [#allocation6]  }
  0x45   :  { %s10946_s1 = smov [#allocation10]   ;;  %s10886_s20 = scalar_lea.hbm %s11054_s4, 16 }
  0x46   :  { %s64_s17 = sshll.u32 %s10946_s1, 4  ;;  %p10887_p4 = scmp.ne.s32.totalorder %s11054_s4, %s10886_s20  ;;  %s65_s17 = int_to_ptr.vmem [resolvable:$true] %s64_s17 }
  0x47   :  { %p10890_p5 = scmp.lt.u32.totalorder %s10886_s20, %s11054_s4 }
  0x49   :  { %p10892_p6 = pnand %p10890_p5, %p10887_p4 }
  0x4b   :  { %10895 = shalt.err (!%p10892_p6)
}
  0x4c   :  { %s10896_s26 = scalar_lea.vmem %s65_s17, 16  ;;  %s10900_s2 = scalar_lea.vmem %s65_s17, 32 }
  0x4d   :  { %p10897_p7 = scmp.ne.s32.totalorder %s65_s17, %s10896_s26  ;;  %p10901_p8 = scmp.lt.s32.totalorder %s65_s17, %s65_s17 }
  0x4e   :  { %p10902_p9 = scmp.lt.s32.totalorder %s10900_s2, %s10896_s26 }
  0x50   :  { %p10903_p10 = por %p10902_p9, %p10901_p8 }
  0x52   :  { %p10904_p11 = pnand %p10903_p10, %p10897_p7 }
  0x54   :  { %10907 = shalt.err (!%p10904_p11)
}
  0x55   :  { %67 = dma.hbm_to_vmem [thread:$0]  %s11054_s4, 16, %s65_s17, [#allocation9]  }
  0x56   :  { %10930 = dma.done.wait [#allocation3], 4096  }
  0x57   :  { %10931 = vsyncadd [#allocation3], 4294963200 }
  0x58   :  { %10932 = dma.done.wait [#allocation6], 131136  }
  0x59   :  { %10933 = vsyncadd [#allocation6], 4294836160 }
  0x5a   :  { %10934 = dma.done.wait [#allocation9], 4112  }
  0x5b   :  { %10935 = vsyncadd [#allocation9], 4294963184  ;;  %v9230_v0 = vld [vmem:[#allocation5 + $0x4] ss:$16 sps:$4 sm:$0xff]   ;;  %v9232_v1 = vld [vmem:[#allocation5 + $0xc] ss:$16 sps:$4 sm:$0xff]  }
  0x5c   :  { %6314 = vmatprep.subr.bf16.mxu0 %v9230_v0  ;;  %v9234_v2 = vld [vmem:[#allocation5] ss:$16 sps:$4 sm:$0xff]   ;;  %v9235_v3 = vld [vmem:[#allocation5 + $0x8] ss:$16 sps:$4 sm:$0xff]   ;;  %6970 = vmatprep.subr.bf16.mxu1 %v9232_v1  ;;  %v9236_v4 = vld [vmem:[#allocation5 + $0x24] ss:$16 sps:$4 sm:$0xff]  }
  0x5d   :  { %6315 = vmatpush1.bf16.msra.mxu0 %v9234_v2  ;;  %6971 = vmatpush1.bf16.msra.mxu1 %v9235_v3  ;;  %v9238_v5 = vld [vmem:[#allocation5 + $0x2c] ss:$16 sps:$4 sm:$0xff]   ;;  %v9240_v6 = vld [vmem:[#allocation5 + $0x20] ss:$16 sps:$4 sm:$0xff]   ;;  %v9241_v7 = vld [vmem:[#allocation5 + $0x28] ss:$16 sps:$4 sm:$0xff]  }
  0x5e   :  { %6316 = vmatprep.subr.bf16.mxu0 %v9236_v4  ;;  %6972 = vmatprep.subr.bf16.mxu1 %v9238_v5  ;;  %v9242_v8 = vld [vmem:[#allocation5 + $0x44] ss:$16 sps:$4 sm:$0xff]   ;;  %v9244_v9 = vld [vmem:[#allocation5 + $0x4c] ss:$16 sps:$4 sm:$0xff]   ;;  %v9246_v10 = vld [vmem:[#allocation5 + $0x40] ss:$16 sps:$4 sm:$0xff]  }
  0x5f   :  { %v9247_v11 = vld [vmem:[#allocation5 + $0x48] ss:$16 sps:$4 sm:$0xff]   ;;  %v9248_v12 = vld [vmem:[#allocation5 + $0x64] ss:$16 sps:$4 sm:$0xff]   ;;  %v9250_v13 = vld [vmem:[#allocation5 + $0x6c] ss:$16 sps:$4 sm:$0xff]  }
  0x60   :  { %v9252_v14 = vld [vmem:[#allocation5 + $0x60] ss:$16 sps:$4 sm:$0xff]   ;;  %v9253_v15 = vld [vmem:[#allocation5 + $0x68] ss:$16 sps:$4 sm:$0xff]   ;;  %v9254_v16 = vld [vmem:[#allocation5 + $0x84] ss:$16 sps:$4 sm:$0xff]  }
  0x61   :  { %6317 = vmatpush1.bf16.msra.mxu0 %v9240_v6  ;;  %6973 = vmatpush1.bf16.msra.mxu1 %v9241_v7  ;;  %v9256_v17 = vld [vmem:[#allocation5 + $0x8c] ss:$16 sps:$4 sm:$0xff]   ;;  %v9258_v18 = vld [vmem:[#allocation5 + $0x80] ss:$16 sps:$4 sm:$0xff]   ;;  %v9259_v19 = vld [vmem:[#allocation5 + $0x88] ss:$16 sps:$4 sm:$0xff]  }
  0x62   :  { %6318 = vmatprep.subr.bf16.mxu0 %v9242_v8  ;;  %6974 = vmatprep.subr.bf16.mxu1 %v9244_v9  ;;  %v9260_v20 = vld [vmem:[#allocation5 + $0xa4] ss:$16 sps:$4 sm:$0xff]   ;;  %v9262_v21 = vld [vmem:[#allocation5 + $0xac] ss:$16 sps:$4 sm:$0xff]   ;;  %v9264_v22 = vld [vmem:[#allocation5 + $0xa0] ss:$16 sps:$4 sm:$0xff]  }
  0x63   :  { %v9265_v23 = vld [vmem:[#allocation5 + $0xa8] ss:$16 sps:$4 sm:$0xff]   ;;  %v9266_v24 = vld [vmem:[#allocation5 + $0xc4] ss:$16 sps:$4 sm:$0xff]   ;;  %v9268_v25 = vld [vmem:[#allocation5 + $0xcc] ss:$16 sps:$4 sm:$0xff]  }
  0x64   :  { %v9270_v26 = vld [vmem:[#allocation5 + $0xc0] ss:$16 sps:$4 sm:$0xff]   ;;  %v9271_v27 = vld [vmem:[#allocation5 + $0xc8] ss:$16 sps:$4 sm:$0xff]   ;;  %v9272_v28 = vld [vmem:[#allocation5 + $0xe4] ss:$16 sps:$4 sm:$0xff]  }
  0x65   :  { %6319 = vmatpush1.bf16.msra.mxu0 %v9246_v10  ;;  %6975 = vmatpush1.bf16.msra.mxu1 %v9247_v11  ;;  %v9274_v29 = vld [vmem:[#allocation5 + $0xec] ss:$16 sps:$4 sm:$0xff]   ;;  %v9276_v30 = vld [vmem:[#allocation5 + $0xe0] ss:$16 sps:$4 sm:$0xff]   ;;  %v9277_v31 = vld [vmem:[#allocation5 + $0xe8] ss:$16 sps:$4 sm:$0xff]  }
  0x66   :  { %6320 = vmatprep.subr.bf16.mxu0 %v9248_v12  ;;  %6976 = vmatprep.subr.bf16.mxu1 %v9250_v13  ;;  %v9278_v32 = vld [vmem:[#allocation5 + $0x104] ss:$16 sps:$4 sm:$0xff]   ;;  %v9280_v33 = vld [vmem:[#allocation5 + $0x10c] ss:$16 sps:$4 sm:$0xff]   ;;  %v9282_v34 = vld [vmem:[#allocation5 + $0x100] ss:$16 sps:$4 sm:$0xff]  }
  0x67   :  { %v9283_v35 = vld [vmem:[#allocation5 + $0x108] ss:$16 sps:$4 sm:$0xff]   ;;  %v9284_v36 = vld [vmem:[#allocation5 + $0x124] ss:$16 sps:$4 sm:$0xff]   ;;  %v9286_v37 = vld [vmem:[#allocation5 + $0x12c] ss:$16 sps:$4 sm:$0xff]  }
  0x68   :  { %v9288_v38 = vld [vmem:[#allocation5 + $0x120] ss:$16 sps:$4 sm:$0xff]   ;;  %v9289_v39 = vld [vmem:[#allocation5 + $0x128] ss:$16 sps:$4 sm:$0xff]   ;;  %v9290_v40 = vld [vmem:[#allocation5 + $0x144] ss:$16 sps:$4 sm:$0xff]  }
  0x69   :  { %6321 = vmatpush1.bf16.msra.mxu0 %v9252_v14  ;;  %6977 = vmatpush1.bf16.msra.mxu1 %v9253_v15  ;;  %v9292_v41 = vld [vmem:[#allocation5 + $0x14c] ss:$16 sps:$4 sm:$0xff]   ;;  %v9294_v42 = vld [vmem:[#allocation5 + $0x140] ss:$16 sps:$4 sm:$0xff]   ;;  %v9295_v43 = vld [vmem:[#allocation5 + $0x148] ss:$16 sps:$4 sm:$0xff]  }
  0x6a   :  { %6322 = vmatprep.subr.bf16.mxu0 %v9254_v16  ;;  %6978 = vmatprep.subr.bf16.mxu1 %v9256_v17  ;;  %v9296_v44 = vld [vmem:[#allocation5 + $0x164] ss:$16 sps:$4 sm:$0xff]   ;;  %v9298_v45 = vld [vmem:[#allocation5 + $0x16c] ss:$16 sps:$4 sm:$0xff]   ;;  %v9300_v47 = vld [vmem:[#allocation5 + $0x160] ss:$16 sps:$4 sm:$0xff]  }
  0x6b   :  { %v85_v46 = vld [vmem:[#allocation2 + $0x8] sm:$0xff]  ;;  %v9302_v50 = vld [vmem:[#allocation5 + $0x184] ss:$16 sps:$4 sm:$0xff]   ;;  %v9306_v52 = vld [vmem:[#allocation5 + $0x180] ss:$16 sps:$4 sm:$0xff]   ;;  %s10947_s4 = smov [#allocation11]  }
  0x6c   :  { %v117_v48 = vpack.c.bf16 %v85_v46, %v85_v46  ;;  %v9301_v49 = vld [vmem:[#allocation5 + $0x168] ss:$16 sps:$4 sm:$0xff]   ;;  %v9304_v51 = vld [vmem:[#allocation5 + $0x18c] ss:$16 sps:$4 sm:$0xff]   ;;  %v9308_v54 = vld [vmem:[#allocation5 + $0x1a4] ss:$16 sps:$4 sm:$0xff]  }
  0x6d   :  { %6323 = vmatpush1.bf16.msra.mxu0 %v9258_v18  ;;  %6979 = vmatpush1.bf16.msra.mxu1 %v9259_v19  ;;  %v9307_v53 = vld [vmem:[#allocation5 + $0x188] ss:$16 sps:$4 sm:$0xff]   ;;  %v9310_v55 = vld [vmem:[#allocation5 + $0x1ac] ss:$16 sps:$4 sm:$0xff]   ;;  %v9312_v56 = vld [vmem:[#allocation5 + $0x1a0] ss:$16 sps:$4 sm:$0xff]  }
  0x6e   :  { %6324 = vmatprep.subr.bf16.mxu0 %v9260_v20  ;;  %6980 = vmatprep.subr.bf16.mxu1 %v9262_v21  ;;  %v9313_v57 = vld [vmem:[#allocation5 + $0x1a8] ss:$16 sps:$4 sm:$0xff]   ;;  %v9314_v58 = vld [vmem:[#allocation5 + $0x1c4] ss:$16 sps:$4 sm:$0xff]   ;;  %v9316_v59 = vld [vmem:[#allocation5 + $0x1cc] ss:$16 sps:$4 sm:$0xff]  }
  0x6f   :  { %6346 = vmatprep.mubr.bf16.mxu0 %v117_v48  ;;  %7002 = vmatprep.mubr.bf16.mxu1 %v117_v48  ;;  %v9318_v60 = vld [vmem:[#allocation5 + $0x1c0] ss:$16 sps:$4 sm:$0xff]   ;;  %v9319_v61 = vld [vmem:[#allocation5 + $0x1c8] ss:$16 sps:$4 sm:$0xff]   ;;  %v9320_v62 = vld [vmem:[#allocation5 + $0x1e4] ss:$16 sps:$4 sm:$0xff]  }
  0x70   :  { %v9322_v63 = vld [vmem:[#allocation5 + $0x1ec] ss:$16 sps:$4 sm:$0xff]   ;;  %v9324_v0 = vld [vmem:[#allocation5 + $0x1e0] ss:$16 sps:$4 sm:$0xff]   ;;  %v9325_v1 = vld [vmem:[#allocation5 + $0x1e8] ss:$16 sps:$4 sm:$0xff]  }
  0x71   :  { %6325 = vmatpush1.bf16.msra.mxu0 %v9264_v22  ;;  %6981 = vmatpush1.bf16.msra.mxu1 %v9265_v23  ;;  %v84_v2 = vld [vmem:[#allocation2] sm:$0xff]  ;;  %v9331_v4 = vld [vmem:[#allocation5 + $0x20c] ss:$16 sps:$4 sm:$0xff]   ;;  %v9329_v7 = vld [vmem:[#allocation5 + $0x208] ss:$16 sps:$4 sm:$0xff]   ;;  %s7984_s28 = sshll.u32 %s10947_s4, 4  ;;  %s7985_s28 = int_to_ptr.vmem [resolvable:$true] %s7984_s28 }
  0x72   :  { %6326 = vmatprep.subr.bf16.mxu0 %v9266_v24  ;;  %6982 = vmatprep.subr.bf16.mxu1 %v9268_v25  ;;  %v9328_v3 = vld [vmem:[#allocation5 + $0x204] ss:$16 sps:$4 sm:$0xff]   ;;  %v116_v5 = vpack.c.bf16 %v84_v2, %v84_v2  ;;  %v9326_v6 = vld [vmem:[#allocation5 + $0x200] ss:$16 sps:$4 sm:$0xff]   ;;  %v9337_v9 = vld [vmem:[#allocation5 + $0x22c] ss:$16 sps:$4 sm:$0xff]   ;;  %p10913_p13 = scmp.lt.s32.totalorder %s7985_s28, %s7985_s28 }
  0x73   :  { %v9334_v8 = vld [vmem:[#allocation5 + $0x224] ss:$16 sps:$4 sm:$0xff]   ;;  %v9332_v10 = vld [vmem:[#allocation5 + $0x220] ss:$16 sps:$4 sm:$0xff]   ;;  %v9335_v11 = vld [vmem:[#allocation5 + $0x228] ss:$16 sps:$4 sm:$0xff]  }
  0x74   :  { %v9340_v12 = vld [vmem:[#allocation5 + $0x244] ss:$16 sps:$4 sm:$0xff]   ;;  %v9343_v13 = vld [vmem:[#allocation5 + $0x24c] ss:$16 sps:$4 sm:$0xff]   ;;  %v9338_v14 = vld [vmem:[#allocation5 + $0x240] ss:$16 sps:$4 sm:$0xff]  }
  0x75   :  { %6327 = vmatpush1.bf16.msra.mxu0 %v9270_v26  ;;  %6983 = vmatpush1.bf16.msra.mxu1 %v9271_v27  ;;  %v9341_v15 = vld [vmem:[#allocation5 + $0x248] ss:$16 sps:$4 sm:$0xff]   ;;  %v9346_v16 = vld [vmem:[#allocation5 + $0x264] ss:$16 sps:$4 sm:$0xff]   ;;  %v9349_v17 = vld [vmem:[#allocation5 + $0x26c] ss:$16 sps:$4 sm:$0xff]  }
  0x76   :  { %6328 = vmatprep.subr.bf16.mxu0 %v9272_v28  ;;  %6984 = vmatprep.subr.bf16.mxu1 %v9274_v29  ;;  %v9344_v18 = vld [vmem:[#allocation5 + $0x260] ss:$16 sps:$4 sm:$0xff]   ;;  %v9347_v19 = vld [vmem:[#allocation5 + $0x268] ss:$16 sps:$4 sm:$0xff]   ;;  %v9352_v20 = vld [vmem:[#allocation5 + $0x284] ss:$16 sps:$4 sm:$0xff]  }
  0x77   :  { %v9355_v21 = vld [vmem:[#allocation5 + $0x28c] ss:$16 sps:$4 sm:$0xff]   ;;  %v9350_v22 = vld [vmem:[#allocation5 + $0x280] ss:$16 sps:$4 sm:$0xff]   ;;  %v9353_v23 = vld [vmem:[#allocation5 + $0x288] ss:$16 sps:$4 sm:$0xff]  }
  0x78   :  { %v9358_v24 = vld [vmem:[#allocation5 + $0x2a4] ss:$16 sps:$4 sm:$0xff]   ;;  %v9361_v25 = vld [vmem:[#allocation5 + $0x2ac] ss:$16 sps:$4 sm:$0xff]   ;;  %v9356_v26 = vld [vmem:[#allocation5 + $0x2a0] ss:$16 sps:$4 sm:$0xff]  }
  0x79   :  { %6329 = vmatpush1.bf16.msra.mxu0 %v9276_v30  ;;  %6985 = vmatpush1.bf16.msra.mxu1 %v9277_v31  ;;  %v9359_v27 = vld [vmem:[#allocation5 + $0x2a8] ss:$16 sps:$4 sm:$0xff]   ;;  %v9364_v28 = vld [vmem:[#allocation5 + $0x2c4] ss:$16 sps:$4 sm:$0xff]   ;;  %v9367_v29 = vld [vmem:[#allocation5 + $0x2cc] ss:$16 sps:$4 sm:$0xff]  }
  0x7a   :  { %6330 = vmatprep.subr.bf16.mxu0 %v9278_v32  ;;  %6986 = vmatprep.subr.bf16.mxu1 %v9280_v33  ;;  %v87_v30 = vld [vmem:[#allocation2 + $0x18] sm:$0xff]  ;;  %v9362_v31 = vld [vmem:[#allocation5 + $0x2c0] ss:$16 sps:$4 sm:$0xff]   ;;  %v9388_v46 = vld [vmem:[#allocation5 + $0x344] ss:$16 sps:$4 sm:$0xff]   ;;  %s10908_s29 = scalar_lea.vmem %s7985_s28, 128 }
  0x7b   :  { %v119_v32 = vpack.c.bf16 %v87_v30, %v87_v30  ;;  %v9365_v33 = vld [vmem:[#allocation5 + $0x2c8] ss:$16 sps:$4 sm:$0xff]   ;;  %v9386_v48 = vld [vmem:[#allocation5 + $0x340] ss:$16 sps:$4 sm:$0xff]   ;;  %v9418_v2 = vld [vmem:[#allocation5 + $0x3e4] ss:$16 sps:$4 sm:$0xff]   ;;  %p10909_p12 = scmp.ne.s32.totalorder %s7985_s28, %s10908_s29  ;;  %p10914_p0 = scmp.lt.s32.totalorder %s10908_s29, %s10908_s29 }
  0x7c   :  { %v9454_v30 = vld [vmem:[#allocation5 + $0x4a4] ss:$16 sps:$4 sm:$0xff]  }
  0x7d   :  { %6331 = vmatpush1.bf16.msra.mxu0 %v9282_v34  ;;  %6987 = vmatpush1.bf16.msra.mxu1 %v9283_v35  ;;  %v9370_v34 = vld [vmem:[#allocation5 + $0x2e4] ss:$16 sps:$4 sm:$0xff]   ;;  %v9373_v35 = vld [vmem:[#allocation5 + $0x2ec] ss:$16 sps:$4 sm:$0xff]   ;;  %p10915_p1 = por %p10914_p0, %p10913_p13 }
  0x7e   :  { %6332 = vmatprep.subr.bf16.mxu0 %v9284_v36  ;;  %6988 = vmatprep.subr.bf16.mxu1 %v9286_v37  ;;  %v9368_v36 = vld [vmem:[#allocation5 + $0x2e0] ss:$16 sps:$4 sm:$0xff]   ;;  %v9371_v37 = vld [vmem:[#allocation5 + $0x2e8] ss:$16 sps:$4 sm:$0xff]  }
  0x7f   :  { %p10916_p2 = pnand %p10915_p1, %p10909_p12 }
  0x81   :  { %6333 = vmatpush1.bf16.msra.mxu0 %v9288_v38  ;;  %6989 = vmatpush1.bf16.msra.mxu1 %v9289_v39  ;;  %v9376_v38 = vld [vmem:[#allocation5 + $0x304] ss:$16 sps:$4 sm:$0xff]   ;;  %v9379_v39 = vld [vmem:[#allocation5 + $0x30c] ss:$16 sps:$4 sm:$0xff]  }
  0x82   :  { %6334 = vmatprep.subr.bf16.mxu0 %v9290_v40  ;;  %6990 = vmatprep.subr.bf16.mxu1 %v9292_v41  ;;  %v9374_v40 = vld [vmem:[#allocation5 + $0x300] ss:$16 sps:$4 sm:$0xff]   ;;  %v9377_v41 = vld [vmem:[#allocation5 + $0x308] ss:$16 sps:$4 sm:$0xff]  }
  0x85   :  { %6335 = vmatpush1.bf16.msra.mxu0 %v9294_v42  ;;  %6991 = vmatpush1.bf16.msra.mxu1 %v9295_v43  ;;  %v9382_v42 = vld [vmem:[#allocation5 + $0x324] ss:$16 sps:$4 sm:$0xff]   ;;  %v9385_v43 = vld [vmem:[#allocation5 + $0x32c] ss:$16 sps:$4 sm:$0xff]  }
  0x86   :  { %6336 = vmatprep.subr.bf16.mxu0 %v9296_v44  ;;  %6992 = vmatprep.subr.bf16.mxu1 %v9298_v45  ;;  %v9380_v44 = vld [vmem:[#allocation5 + $0x320] ss:$16 sps:$4 sm:$0xff]   ;;  %v9383_v45 = vld [vmem:[#allocation5 + $0x328] ss:$16 sps:$4 sm:$0xff]  }
  0x89   :  { %6337 = vmatpush1.bf16.msra.mxu0 %v9300_v47  ;;  %6993 = vmatpush1.bf16.msra.mxu1 %v9301_v49  ;;  %v9391_v47 = vld [vmem:[#allocation5 + $0x34c] ss:$16 sps:$4 sm:$0xff]   ;;  %v9389_v49 = vld [vmem:[#allocation5 + $0x348] ss:$16 sps:$4 sm:$0xff]  }
  0x8a   :  { %6338 = vmatprep.subr.bf16.mxu0 %v9302_v50  ;;  %6994 = vmatprep.subr.bf16.mxu1 %v9304_v51  ;;  %v9394_v50 = vld [vmem:[#allocation5 + $0x364] ss:$16 sps:$4 sm:$0xff]   ;;  %v9397_v51 = vld [vmem:[#allocation5 + $0x36c] ss:$16 sps:$4 sm:$0xff]  }
  0x8d   :  { %6339 = vmatpush1.bf16.msra.mxu0 %v9306_v52  ;;  %6995 = vmatpush1.bf16.msra.mxu1 %v9307_v53  ;;  %v9392_v52 = vld [vmem:[#allocation5 + $0x360] ss:$16 sps:$4 sm:$0xff]   ;;  %v9395_v53 = vld [vmem:[#allocation5 + $0x368] ss:$16 sps:$4 sm:$0xff]  }
  0x8e   :  { %6340 = vmatprep.subr.bf16.mxu0 %v9308_v54  ;;  %6996 = vmatprep.subr.bf16.mxu1 %v9310_v55  ;;  %v9400_v54 = vld [vmem:[#allocation5 + $0x384] ss:$16 sps:$4 sm:$0xff]   ;;  %v9403_v55 = vld [vmem:[#allocation5 + $0x38c] ss:$16 sps:$4 sm:$0xff]  }
  0x91   :  { %6341 = vmatpush1.bf16.msra.mxu0 %v9312_v56  ;;  %6997 = vmatpush1.bf16.msra.mxu1 %v9313_v57  ;;  %v9398_v56 = vld [vmem:[#allocation5 + $0x380] ss:$16 sps:$4 sm:$0xff]   ;;  %v9401_v57 = vld [vmem:[#allocation5 + $0x388] ss:$16 sps:$4 sm:$0xff]  }
  0x92   :  { %6342 = vmatprep.subr.bf16.mxu0 %v9314_v58  ;;  %6998 = vmatprep.subr.bf16.mxu1 %v9316_v59  ;;  %v9406_v58 = vld [vmem:[#allocation5 + $0x3a4] ss:$16 sps:$4 sm:$0xff]   ;;  %v9409_v59 = vld [vmem:[#allocation5 + $0x3ac] ss:$16 sps:$4 sm:$0xff]  }
  0x95   :  { %6343 = vmatpush1.bf16.msra.mxu0 %v9318_v60  ;;  %6999 = vmatpush1.bf16.msra.mxu1 %v9319_v61  ;;  %v9404_v60 = vld [vmem:[#allocation5 + $0x3a0] ss:$16 sps:$4 sm:$0xff]   ;;  %v9407_v61 = vld [vmem:[#allocation5 + $0x3a8] ss:$16 sps:$4 sm:$0xff]  }
  0x96   :  { %6344 = vmatprep.subr.bf16.mxu0 %v9320_v62  ;;  %7000 = vmatprep.subr.bf16.mxu1 %v9322_v63  ;;  %v9412_v62 = vld [vmem:[#allocation5 + $0x3c4] ss:$16 sps:$4 sm:$0xff]   ;;  %v9415_v63 = vld [vmem:[#allocation5 + $0x3cc] ss:$16 sps:$4 sm:$0xff]  }
  0x99   :  { %6345 = vmatpush1.bf16.msra.mxu0 %v9324_v0  ;;  %7001 = vmatpush1.bf16.msra.mxu1 %v9325_v1  ;;  %v9410_v0 = vld [vmem:[#allocation5 + $0x3c0] ss:$16 sps:$4 sm:$0xff]   ;;  %v9413_v1 = vld [vmem:[#allocation5 + $0x3c8] ss:$16 sps:$4 sm:$0xff]  }
  0x9a   :  { %6355 = vmatprep.subr.bf16.mxu0 %v9328_v3  ;;  %7011 = vmatprep.subr.bf16.mxu1 %v9331_v4  ;;  %v9421_v3 = vld [vmem:[#allocation5 + $0x3ec] ss:$16 sps:$4 sm:$0xff]   ;;  %v9416_v4 = vld [vmem:[#allocation5 + $0x3e0] ss:$16 sps:$4 sm:$0xff]  }
  0x9c   :  { %6347 = vmatmul.mubr.bf16.vlgmr.msra.gmra.mrb[0].mxu0 %v116_v5  ;;  %7003 = vmatmul.mubr.bf16.vlgmr.msra.gmra.mrb[0].mxu1 %v116_v5  ;;  %v9419_v5 = vld [vmem:[#allocation5 + $0x3e8] ss:$16 sps:$4 sm:$0xff]  }
  0x9d   :  { %6356 = vmatpush1.bf16.msra.mxu0 %v9326_v6  ;;  %7012 = vmatpush1.bf16.msra.mxu1 %v9329_v7  ;;  %v9424_v6 = vld [vmem:[#allocation5 + $0x404] ss:$16 sps:$4 sm:$0xff]  }
  0x9e   :  { %6357 = vmatprep.subr.bf16.mxu0 %v9334_v8  ;;  %7013 = vmatprep.subr.bf16.mxu1 %v9337_v9  ;;  %v86_v7 = vld [vmem:[#allocation2 + $0x10] sm:$0xff]  ;;  %v9427_v8 = vld [vmem:[#allocation5 + $0x40c] ss:$16 sps:$4 sm:$0xff]  }
  0x9f   :  { %6387 = vmatprep.mubr.bf16.mxu0 %v119_v32  ;;  %7043 = vmatprep.mubr.bf16.mxu1 %v119_v32  ;;  %v9422_v9 = vld [vmem:[#allocation5 + $0x400] ss:$16 sps:$4 sm:$0xff]  }
  0xa0   :  { %v9452_v32 = vld [vmem:[#allocation5 + $0x4a0] ss:$16 sps:$4 sm:$0xff]  }
  0xa1   :  { %6358 = vmatpush1.bf16.msra.mxu0 %v9332_v10  ;;  %7014 = vmatpush1.bf16.msra.mxu1 %v9335_v11  ;;  %v9425_v10 = vld [vmem:[#allocation5 + $0x408] ss:$16 sps:$4 sm:$0xff]   ;;  %v118_v11 = vpack.c.bf16 %v86_v7, %v86_v7  ;;  %v9517_v7 = vld [vmem:[#allocation5 + $0x5ec] ss:$16 sps:$4 sm:$0xff]  }
  0xa2   :  { %6359 = vmatprep.subr.bf16.mxu0 %v9340_v12  ;;  %7015 = vmatprep.subr.bf16.mxu1 %v9343_v13  ;;  %v9430_v12 = vld [vmem:[#allocation5 + $0x424] ss:$16 sps:$4 sm:$0xff]   ;;  %v9433_v13 = vld [vmem:[#allocation5 + $0x42c] ss:$16 sps:$4 sm:$0xff]  }
  0xa5   :  { %6360 = vmatpush1.bf16.msra.mxu0 %v9338_v14  ;;  %7016 = vmatpush1.bf16.msra.mxu1 %v9341_v15  ;;  %v89_v14 = vld [vmem:[#allocation2 + $0x28] sm:$0xff] }
  0xa6   :  { %6361 = vmatprep.subr.bf16.mxu0 %v9346_v16  ;;  %7017 = vmatprep.subr.bf16.mxu1 %v9349_v17  ;;  %v121_v15 = vpack.c.bf16 %v89_v14, %v89_v14  ;;  %v9428_v16 = vld [vmem:[#allocation5 + $0x420] ss:$16 sps:$4 sm:$0xff]   ;;  %v9431_v17 = vld [vmem:[#allocation5 + $0x428] ss:$16 sps:$4 sm:$0xff]  }
  0xa7   :  { %v9521_v14 = vld [vmem:[#allocation5 + $0x608] ss:$16 sps:$4 sm:$0xff]  }
  0xa9   :  { %6362 = vmatpush1.bf16.msra.mxu0 %v9344_v18  ;;  %7018 = vmatpush1.bf16.msra.mxu1 %v9347_v19  ;;  %v9436_v18 = vld [vmem:[#allocation5 + $0x444] ss:$16 sps:$4 sm:$0xff]   ;;  %v9439_v19 = vld [vmem:[#allocation5 + $0x44c] ss:$16 sps:$4 sm:$0xff]  }
  0xaa   :  { %6363 = vmatprep.subr.bf16.mxu0 %v9352_v20  ;;  %7019 = vmatprep.subr.bf16.mxu1 %v9355_v21  ;;  %v9434_v20 = vld [vmem:[#allocation5 + $0x440] ss:$16 sps:$4 sm:$0xff]   ;;  %v9437_v21 = vld [vmem:[#allocation5 + $0x448] ss:$16 sps:$4 sm:$0xff]  }
  0xad   :  { %6364 = vmatpush1.bf16.msra.mxu0 %v9350_v22  ;;  %7020 = vmatpush1.bf16.msra.mxu1 %v9353_v23  ;;  %v9442_v22 = vld [vmem:[#allocation5 + $0x464] ss:$16 sps:$4 sm:$0xff]   ;;  %v9445_v23 = vld [vmem:[#allocation5 + $0x46c] ss:$16 sps:$4 sm:$0xff]  }
  0xae   :  { %6365 = vmatprep.subr.bf16.mxu0 %v9358_v24  ;;  %7021 = vmatprep.subr.bf16.mxu1 %v9361_v25  ;;  %v9440_v24 = vld [vmem:[#allocation5 + $0x460] ss:$16 sps:$4 sm:$0xff]   ;;  %v9443_v25 = vld [vmem:[#allocation5 + $0x468] ss:$16 sps:$4 sm:$0xff]  }
  0xb1   :  { %6366 = vmatpush1.bf16.msra.mxu0 %v9356_v26  ;;  %7022 = vmatpush1.bf16.msra.mxu1 %v9359_v27  ;;  %v9448_v26 = vld [vmem:[#allocation5 + $0x484] ss:$16 sps:$4 sm:$0xff]   ;;  %v9451_v27 = vld [vmem:[#allocation5 + $0x48c] ss:$16 sps:$4 sm:$0xff]  }
  0xb2   :  { %6367 = vmatprep.subr.bf16.mxu0 %v9364_v28  ;;  %7023 = vmatprep.subr.bf16.mxu1 %v9367_v29  ;;  %v9446_v28 = vld [vmem:[#allocation5 + $0x480] ss:$16 sps:$4 sm:$0xff]   ;;  %v9449_v29 = vld [vmem:[#allocation5 + $0x488] ss:$16 sps:$4 sm:$0xff]  }
  0xb5   :  { %6368 = vmatpush1.bf16.msra.mxu0 %v9362_v31  ;;  %7024 = vmatpush1.bf16.msra.mxu1 %v9365_v33  ;;  %v9457_v31 = vld [vmem:[#allocation5 + $0x4ac] ss:$16 sps:$4 sm:$0xff]   ;;  %v9455_v33 = vld [vmem:[#allocation5 + $0x4a8] ss:$16 sps:$4 sm:$0xff]  }
  0xb6   :  { %6369 = vmatprep.subr.bf16.mxu0 %v9370_v34  ;;  %7025 = vmatprep.subr.bf16.mxu1 %v9373_v35  ;;  %v9460_v34 = vld [vmem:[#allocation5 + $0x4c4] ss:$16 sps:$4 sm:$0xff]   ;;  %v9463_v35 = vld [vmem:[#allocation5 + $0x4cc] ss:$16 sps:$4 sm:$0xff]  }
  0xb9   :  { %6370 = vmatpush1.bf16.msra.mxu0 %v9368_v36  ;;  %7026 = vmatpush1.bf16.msra.mxu1 %v9371_v37  ;;  %v9458_v36 = vld [vmem:[#allocation5 + $0x4c0] ss:$16 sps:$4 sm:$0xff]   ;;  %v9461_v37 = vld [vmem:[#allocation5 + $0x4c8] ss:$16 sps:$4 sm:$0xff]  }
  0xba   :  { %6371 = vmatprep.subr.bf16.mxu0 %v9376_v38  ;;  %7027 = vmatprep.subr.bf16.mxu1 %v9379_v39  ;;  %v9466_v38 = vld [vmem:[#allocation5 + $0x4e4] ss:$16 sps:$4 sm:$0xff]   ;;  %v9469_v39 = vld [vmem:[#allocation5 + $0x4ec] ss:$16 sps:$4 sm:$0xff]  }
  0xbd   :  { %6372 = vmatpush1.bf16.msra.mxu0 %v9374_v40  ;;  %7028 = vmatpush1.bf16.msra.mxu1 %v9377_v41  ;;  %v9464_v40 = vld [vmem:[#allocation5 + $0x4e0] ss:$16 sps:$4 sm:$0xff]   ;;  %v9467_v41 = vld [vmem:[#allocation5 + $0x4e8] ss:$16 sps:$4 sm:$0xff]  }
  0xbe   :  { %6373 = vmatprep.subr.bf16.mxu0 %v9382_v42  ;;  %7029 = vmatprep.subr.bf16.mxu1 %v9385_v43  ;;  %v9472_v42 = vld [vmem:[#allocation5 + $0x504] ss:$16 sps:$4 sm:$0xff]   ;;  %v9475_v43 = vld [vmem:[#allocation5 + $0x50c] ss:$16 sps:$4 sm:$0xff]  }
  0xc1   :  { %6374 = vmatpush1.bf16.msra.mxu0 %v9380_v44  ;;  %7030 = vmatpush1.bf16.msra.mxu1 %v9383_v45  ;;  %v9470_v44 = vld [vmem:[#allocation5 + $0x500] ss:$16 sps:$4 sm:$0xff]   ;;  %v9473_v45 = vld [vmem:[#allocation5 + $0x508] ss:$16 sps:$4 sm:$0xff]  }
  0xc2   :  { %6375 = vmatprep.subr.bf16.mxu0 %v9388_v46  ;;  %7031 = vmatprep.subr.bf16.mxu1 %v9391_v47  ;;  %v9478_v46 = vld [vmem:[#allocation5 + $0x524] ss:$16 sps:$4 sm:$0xff]   ;;  %v9481_v47 = vld [vmem:[#allocation5 + $0x52c] ss:$16 sps:$4 sm:$0xff]  }
  0xc5   :  { %6376 = vmatpush1.bf16.msra.mxu0 %v9386_v48  ;;  %7032 = vmatpush1.bf16.msra.mxu1 %v9389_v49  ;;  %v9476_v48 = vld [vmem:[#allocation5 + $0x520] ss:$16 sps:$4 sm:$0xff]   ;;  %v9479_v49 = vld [vmem:[#allocation5 + $0x528] ss:$16 sps:$4 sm:$0xff]  }
  0xc6   :  { %6377 = vmatprep.subr.bf16.mxu0 %v9394_v50  ;;  %7033 = vmatprep.subr.bf16.mxu1 %v9397_v51  ;;  %v9484_v50 = vld [vmem:[#allocation5 + $0x544] ss:$16 sps:$4 sm:$0xff]   ;;  %v9487_v51 = vld [vmem:[#allocation5 + $0x54c] ss:$16 sps:$4 sm:$0xff]  }
  0xc9   :  { %6378 = vmatpush1.bf16.msra.mxu0 %v9392_v52  ;;  %7034 = vmatpush1.bf16.msra.mxu1 %v9395_v53  ;;  %v9482_v52 = vld [vmem:[#allocation5 + $0x540] ss:$16 sps:$4 sm:$0xff]   ;;  %v9485_v53 = vld [vmem:[#allocation5 + $0x548] ss:$16 sps:$4 sm:$0xff]  }
  0xca   :  { %6379 = vmatprep.subr.bf16.mxu0 %v9400_v54  ;;  %7035 = vmatprep.subr.bf16.mxu1 %v9403_v55  ;;  %v9490_v54 = vld [vmem:[#allocation5 + $0x564] ss:$16 sps:$4 sm:$0xff]   ;;  %v9493_v55 = vld [vmem:[#allocation5 + $0x56c] ss:$16 sps:$4 sm:$0xff]  }
  0xcd   :  { %6380 = vmatpush1.bf16.msra.mxu0 %v9398_v56  ;;  %7036 = vmatpush1.bf16.msra.mxu1 %v9401_v57  ;;  %v9488_v56 = vld [vmem:[#allocation5 + $0x560] ss:$16 sps:$4 sm:$0xff]   ;;  %v9491_v57 = vld [vmem:[#allocation5 + $0x568] ss:$16 sps:$4 sm:$0xff]  }
  0xce   :  { %6381 = vmatprep.subr.bf16.mxu0 %v9406_v58  ;;  %7037 = vmatprep.subr.bf16.mxu1 %v9409_v59  ;;  %v9496_v58 = vld [vmem:[#allocation5 + $0x584] ss:$16 sps:$4 sm:$0xff]   ;;  %v9499_v59 = vld [vmem:[#allocation5 + $0x58c] ss:$16 sps:$4 sm:$0xff]  }
  0xd1   :  { %6382 = vmatpush1.bf16.msra.mxu0 %v9404_v60  ;;  %7038 = vmatpush1.bf16.msra.mxu1 %v9407_v61  ;;  %v9494_v60 = vld [vmem:[#allocation5 + $0x580] ss:$16 sps:$4 sm:$0xff]   ;;  %v9497_v61 = vld [vmem:[#allocation5 + $0x588] ss:$16 sps:$4 sm:$0xff]  }
  0xd2   :  { %6383 = vmatprep.subr.bf16.mxu0 %v9412_v62  ;;  %7039 = vmatprep.subr.bf16.mxu1 %v9415_v63  ;;  %v9502_v62 = vld [vmem:[#allocation5 + $0x5a4] ss:$16 sps:$4 sm:$0xff]   ;;  %v9505_v63 = vld [vmem:[#allocation5 + $0x5ac] ss:$16 sps:$4 sm:$0xff]  }
  0xd5   :  { %6384 = vmatpush1.bf16.msra.mxu0 %v9410_v0  ;;  %7040 = vmatpush1.bf16.msra.mxu1 %v9413_v1  ;;  %v9500_v0 = vld [vmem:[#allocation5 + $0x5a0] ss:$16 sps:$4 sm:$0xff]   ;;  %v9503_v1 = vld [vmem:[#allocation5 + $0x5a8] ss:$16 sps:$4 sm:$0xff]  }
  0xd6   :  { %6385 = vmatprep.subr.bf16.mxu0 %v9418_v2  ;;  %7041 = vmatprep.subr.bf16.mxu1 %v9421_v3  ;;  %v9508_v2 = vld [vmem:[#allocation5 + $0x5c4] ss:$16 sps:$4 sm:$0xff]   ;;  %v9511_v3 = vld [vmem:[#allocation5 + $0x5cc] ss:$16 sps:$4 sm:$0xff]  }
  0xd9   :  { %6386 = vmatpush1.bf16.msra.mxu0 %v9416_v4  ;;  %7042 = vmatpush1.bf16.msra.mxu1 %v9419_v5  ;;  %v9506_v4 = vld [vmem:[#allocation5 + $0x5c0] ss:$16 sps:$4 sm:$0xff]   ;;  %v9509_v5 = vld [vmem:[#allocation5 + $0x5c8] ss:$16 sps:$4 sm:$0xff]  }
  0xda   :  { %6396 = vmatprep.subr.bf16.mxu0 %v9424_v6  ;;  %7052 = vmatprep.subr.bf16.mxu1 %v9427_v8  ;;  %v9514_v6 = vld [vmem:[#allocation5 + $0x5e4] ss:$16 sps:$4 sm:$0xff]   ;;  %v9512_v8 = vld [vmem:[#allocation5 + $0x5e0] ss:$16 sps:$4 sm:$0xff]  }
  0xdc   :  { %6388 = vmatmul.mubr.bf16.vlgmr.msra.gmra.mrb[0].mxu0 %v118_v11  ;;  %7044 = vmatmul.mubr.bf16.vlgmr.msra.gmra.mrb[0].mxu1 %v118_v11  ;;  %v88_v11 = vld [vmem:[#allocation2 + $0x20] sm:$0xff] }
  0xdd   :  { %6397 = vmatpush1.bf16.msra.mxu0 %v9422_v9  ;;  %7053 = vmatpush1.bf16.msra.mxu1 %v9425_v10  ;;  %v9515_v9 = vld [vmem:[#allocation5 + $0x5e8] ss:$16 sps:$4 sm:$0xff]   ;;  %v9520_v10 = vld [vmem:[#allocation5 + $0x604] ss:$16 sps:$4 sm:$0xff]  }
  0xde   :  { %6398 = vmatprep.subr.bf16.mxu0 %v9430_v12  ;;  %7054 = vmatprep.subr.bf16.mxu1 %v9433_v13  ;;  %v9523_v12 = vld [vmem:[#allocation5 + $0x60c] ss:$16 sps:$4 sm:$0xff]   ;;  %v9518_v13 = vld [vmem:[#allocation5 + $0x600] ss:$16 sps:$4 sm:$0xff]  }
  0xdf   :  { %6428 = vmatprep.mubr.bf16.mxu0 %v121_v15  ;;  %7084 = vmatprep.mubr.bf16.mxu1 %v121_v15  ;;  %v120_v15 = vpack.c.bf16 %v88_v11, %v88_v11  ;;  %v9613_v11 = vld [vmem:[#allocation5 + $0x7ec] ss:$16 sps:$4 sm:$0xff]  }
  0xe1   :  { %6399 = vmatpush1.bf16.msra.mxu0 %v9428_v16  ;;  %7055 = vmatpush1.bf16.msra.mxu1 %v9431_v17  ;;  %v91_v16 = vld [vmem:[#allocation2 + $0x38] sm:$0xff]  ;;  %v9526_v17 = vld [vmem:[#allocation5 + $0x624] ss:$16 sps:$4 sm:$0xff]  }
  0xe2   :  { %6400 = vmatprep.subr.bf16.mxu0 %v9436_v18  ;;  %7056 = vmatprep.subr.bf16.mxu1 %v9439_v19  ;;  %v9529_v18 = vld [vmem:[#allocation5 + $0x62c] ss:$16 sps:$4 sm:$0xff]   ;;  %v123_v19 = vpack.c.bf16 %v91_v16, %v91_v16 }
  0xe3   :  { %v9619_v16 = vld [vmem:[#allocation5 + $0x80c] ss:$16 sps:$4 sm:$0xff]  }
  0xe5   :  { %6401 = vmatpush1.bf16.msra.mxu0 %v9434_v20  ;;  %7057 = vmatpush1.bf16.msra.mxu1 %v9437_v21  ;;  %v9524_v20 = vld [vmem:[#allocation5 + $0x620] ss:$16 sps:$4 sm:$0xff]   ;;  %v9527_v21 = vld [vmem:[#allocation5 + $0x628] ss:$16 sps:$4 sm:$0xff]  }
  0xe6   :  { %6402 = vmatprep.subr.bf16.mxu0 %v9442_v22  ;;  %7058 = vmatprep.subr.bf16.mxu1 %v9445_v23  ;;  %v9532_v22 = vld [vmem:[#allocation5 + $0x644] ss:$16 sps:$4 sm:$0xff]   ;;  %v9535_v23 = vld [vmem:[#allocation5 + $0x64c] ss:$16 sps:$4 sm:$0xff]  }
  0xe9   :  { %6403 = vmatpush1.bf16.msra.mxu0 %v9440_v24  ;;  %7059 = vmatpush1.bf16.msra.mxu1 %v9443_v25  ;;  %v9530_v24 = vld [vmem:[#allocation5 + $0x640] ss:$16 sps:$4 sm:$0xff]   ;;  %v9533_v25 = vld [vmem:[#allocation5 + $0x648] ss:$16 sps:$4 sm:$0xff]  }
  0xea   :  { %6404 = vmatprep.subr.bf16.mxu0 %v9448_v26  ;;  %7060 = vmatprep.subr.bf16.mxu1 %v9451_v27  ;;  %v9538_v26 = vld [vmem:[#allocation5 + $0x664] ss:$16 sps:$4 sm:$0xff]   ;;  %v9541_v27 = vld [vmem:[#allocation5 + $0x66c] ss:$16 sps:$4 sm:$0xff]  }
  0xed   :  { %6405 = vmatpush1.bf16.msra.mxu0 %v9446_v28  ;;  %7061 = vmatpush1.bf16.msra.mxu1 %v9449_v29  ;;  %v9536_v28 = vld [vmem:[#allocation5 + $0x660] ss:$16 sps:$4 sm:$0xff]   ;;  %v9539_v29 = vld [vmem:[#allocation5 + $0x668] ss:$16 sps:$4 sm:$0xff]  }
  0xee   :  { %6406 = vmatprep.subr.bf16.mxu0 %v9454_v30  ;;  %7062 = vmatprep.subr.bf16.mxu1 %v9457_v31  ;;  %v9544_v30 = vld [vmem:[#allocation5 + $0x684] ss:$16 sps:$4 sm:$0xff]   ;;  %v9547_v31 = vld [vmem:[#allocation5 + $0x68c] ss:$16 sps:$4 sm:$0xff]  }
  0xf1   :  { %6407 = vmatpush1.bf16.msra.mxu0 %v9452_v32  ;;  %7063 = vmatpush1.bf16.msra.mxu1 %v9455_v33  ;;  %v9542_v32 = vld [vmem:[#allocation5 + $0x680] ss:$16 sps:$4 sm:$0xff]   ;;  %v9545_v33 = vld [vmem:[#allocation5 + $0x688] ss:$16 sps:$4 sm:$0xff]  }
  0xf2   :  { %6408 = vmatprep.subr.bf16.mxu0 %v9460_v34  ;;  %7064 = vmatprep.subr.bf16.mxu1 %v9463_v35  ;;  %v9550_v34 = vld [vmem:[#allocation5 + $0x6a4] ss:$16 sps:$4 sm:$0xff]   ;;  %v9553_v35 = vld [vmem:[#allocation5 + $0x6ac] ss:$16 sps:$4 sm:$0xff]  }
  0xf5   :  { %6409 = vmatpush1.bf16.msra.mxu0 %v9458_v36  ;;  %7065 = vmatpush1.bf16.msra.mxu1 %v9461_v37  ;;  %v9548_v36 = vld [vmem:[#allocation5 + $0x6a0] ss:$16 sps:$4 sm:$0xff]   ;;  %v9551_v37 = vld [vmem:[#allocation5 + $0x6a8] ss:$16 sps:$4 sm:$0xff]  }
  0xf6   :  { %6410 = vmatprep.subr.bf16.mxu0 %v9466_v38  ;;  %7066 = vmatprep.subr.bf16.mxu1 %v9469_v39  ;;  %v9556_v38 = vld [vmem:[#allocation5 + $0x6c4] ss:$16 sps:$4 sm:$0xff]   ;;  %v9559_v39 = vld [vmem:[#allocation5 + $0x6cc] ss:$16 sps:$4 sm:$0xff]  }
  0xf9   :  { %6411 = vmatpush1.bf16.msra.mxu0 %v9464_v40  ;;  %7067 = vmatpush1.bf16.msra.mxu1 %v9467_v41  ;;  %v9554_v40 = vld [vmem:[#allocation5 + $0x6c0] ss:$16 sps:$4 sm:$0xff]   ;;  %v9557_v41 = vld [vmem:[#allocation5 + $0x6c8] ss:$16 sps:$4 sm:$0xff]  }
  0xfa   :  { %6412 = vmatprep.subr.bf16.mxu0 %v9472_v42  ;;  %7068 = vmatprep.subr.bf16.mxu1 %v9475_v43  ;;  %v9562_v42 = vld [vmem:[#allocation5 + $0x6e4] ss:$16 sps:$4 sm:$0xff]   ;;  %v9565_v43 = vld [vmem:[#allocation5 + $0x6ec] ss:$16 sps:$4 sm:$0xff]  }
  0xfd   :  { %6413 = vmatpush1.bf16.msra.mxu0 %v9470_v44  ;;  %7069 = vmatpush1.bf16.msra.mxu1 %v9473_v45  ;;  %v9560_v44 = vld [vmem:[#allocation5 + $0x6e0] ss:$16 sps:$4 sm:$0xff]   ;;  %v9563_v45 = vld [vmem:[#allocation5 + $0x6e8] ss:$16 sps:$4 sm:$0xff]  }
  0xfe   :  { %6414 = vmatprep.subr.bf16.mxu0 %v9478_v46  ;;  %7070 = vmatprep.subr.bf16.mxu1 %v9481_v47  ;;  %v9568_v46 = vld [vmem:[#allocation5 + $0x704] ss:$16 sps:$4 sm:$0xff]   ;;  %v9571_v47 = vld [vmem:[#allocation5 + $0x70c] ss:$16 sps:$4 sm:$0xff]  }
 0x101   :  { %6415 = vmatpush1.bf16.msra.mxu0 %v9476_v48  ;;  %7071 = vmatpush1.bf16.msra.mxu1 %v9479_v49  ;;  %v9566_v48 = vld [vmem:[#allocation5 + $0x700] ss:$16 sps:$4 sm:$0xff]   ;;  %v9569_v49 = vld [vmem:[#allocation5 + $0x708] ss:$16 sps:$4 sm:$0xff]  }
 0x102   :  { %6416 = vmatprep.subr.bf16.mxu0 %v9484_v50  ;;  %7072 = vmatprep.subr.bf16.mxu1 %v9487_v51  ;;  %v9574_v50 = vld [vmem:[#allocation5 + $0x724] ss:$16 sps:$4 sm:$0xff]   ;;  %v9577_v51 = vld [vmem:[#allocation5 + $0x72c] ss:$16 sps:$4 sm:$0xff]  }
 0x105   :  { %6417 = vmatpush1.bf16.msra.mxu0 %v9482_v52  ;;  %7073 = vmatpush1.bf16.msra.mxu1 %v9485_v53  ;;  %v9572_v52 = vld [vmem:[#allocation5 + $0x720] ss:$16 sps:$4 sm:$0xff]   ;;  %v9575_v53 = vld [vmem:[#allocation5 + $0x728] ss:$16 sps:$4 sm:$0xff]  }
 0x106   :  { %6418 = vmatprep.subr.bf16.mxu0 %v9490_v54  ;;  %7074 = vmatprep.subr.bf16.mxu1 %v9493_v55  ;;  %v9580_v54 = vld [vmem:[#allocation5 + $0x744] ss:$16 sps:$4 sm:$0xff]   ;;  %v9583_v55 = vld [vmem:[#allocation5 + $0x74c] ss:$16 sps:$4 sm:$0xff]  }
 0x109   :  { %6419 = vmatpush1.bf16.msra.mxu0 %v9488_v56  ;;  %7075 = vmatpush1.bf16.msra.mxu1 %v9491_v57  ;;  %v9578_v56 = vld [vmem:[#allocation5 + $0x740] ss:$16 sps:$4 sm:$0xff]   ;;  %v9581_v57 = vld [vmem:[#allocation5 + $0x748] ss:$16 sps:$4 sm:$0xff]  }
 0x10a   :  { %6420 = vmatprep.subr.bf16.mxu0 %v9496_v58  ;;  %7076 = vmatprep.subr.bf16.mxu1 %v9499_v59  ;;  %v9586_v58 = vld [vmem:[#allocation5 + $0x764] ss:$16 sps:$4 sm:$0xff]   ;;  %v9589_v59 = vld [vmem:[#allocation5 + $0x76c] ss:$16 sps:$4 sm:$0xff]  }
 0x10d   :  { %6421 = vmatpush1.bf16.msra.mxu0 %v9494_v60  ;;  %7077 = vmatpush1.bf16.msra.mxu1 %v9497_v61  ;;  %v9584_v60 = vld [vmem:[#allocation5 + $0x760] ss:$16 sps:$4 sm:$0xff]   ;;  %v9587_v61 = vld [vmem:[#allocation5 + $0x768] ss:$16 sps:$4 sm:$0xff]  }
 0x10e   :  { %6422 = vmatprep.subr.bf16.mxu0 %v9502_v62  ;;  %7078 = vmatprep.subr.bf16.mxu1 %v9505_v63  ;;  %v9592_v62 = vld [vmem:[#allocation5 + $0x784] ss:$16 sps:$4 sm:$0xff]   ;;  %v9595_v63 = vld [vmem:[#allocation5 + $0x78c] ss:$16 sps:$4 sm:$0xff]  }
 0x111   :  { %6423 = vmatpush1.bf16.msra.mxu0 %v9500_v0  ;;  %7079 = vmatpush1.bf16.msra.mxu1 %v9503_v1  ;;  %v9590_v0 = vld [vmem:[#allocation5 + $0x780] ss:$16 sps:$4 sm:$0xff]   ;;  %v9593_v1 = vld [vmem:[#allocation5 + $0x788] ss:$16 sps:$4 sm:$0xff]  }
 0x112   :  { %6424 = vmatprep.subr.bf16.mxu0 %v9508_v2  ;;  %7080 = vmatprep.subr.bf16.mxu1 %v9511_v3  ;;  %v9598_v2 = vld [vmem:[#allocation5 + $0x7a4] ss:$16 sps:$4 sm:$0xff]   ;;  %v9601_v3 = vld [vmem:[#allocation5 + $0x7ac] ss:$16 sps:$4 sm:$0xff]  }
 0x115   :  { %6425 = vmatpush1.bf16.msra.mxu0 %v9506_v4  ;;  %7081 = vmatpush1.bf16.msra.mxu1 %v9509_v5  ;;  %v9596_v4 = vld [vmem:[#allocation5 + $0x7a0] ss:$16 sps:$4 sm:$0xff]   ;;  %v9599_v5 = vld [vmem:[#allocation5 + $0x7a8] ss:$16 sps:$4 sm:$0xff]  }
 0x116   :  { %6426 = vmatprep.subr.bf16.mxu0 %v9514_v6  ;;  %7082 = vmatprep.subr.bf16.mxu1 %v9517_v7  ;;  %v9604_v6 = vld [vmem:[#allocation5 + $0x7c4] ss:$16 sps:$4 sm:$0xff]   ;;  %v9607_v7 = vld [vmem:[#allocation5 + $0x7cc] ss:$16 sps:$4 sm:$0xff]  }
 0x119   :  { %6427 = vmatpush1.bf16.msra.mxu0 %v9512_v8  ;;  %7083 = vmatpush1.bf16.msra.mxu1 %v9515_v9  ;;  %v9602_v8 = vld [vmem:[#allocation5 + $0x7c0] ss:$16 sps:$4 sm:$0xff]   ;;  %v9605_v9 = vld [vmem:[#allocation5 + $0x7c8] ss:$16 sps:$4 sm:$0xff]  }
 0x11a   :  { %6437 = vmatprep.subr.bf16.mxu0 %v9520_v10  ;;  %7093 = vmatprep.subr.bf16.mxu1 %v9523_v12  ;;  %v9610_v10 = vld [vmem:[#allocation5 + $0x7e4] ss:$16 sps:$4 sm:$0xff]   ;;  %v9608_v12 = vld [vmem:[#allocation5 + $0x7e0] ss:$16 sps:$4 sm:$0xff]  }
 0x11c   :  { %6429 = vmatmul.mubr.bf16.vlgmr.msra.gmra.mrb[0].mxu0 %v120_v15  ;;  %7085 = vmatmul.mubr.bf16.vlgmr.msra.gmra.mrb[0].mxu1 %v120_v15  ;;  %v9616_v15 = vld [vmem:[#allocation5 + $0x804] ss:$16 sps:$4 sm:$0xff]  }
 0x11d   :  { %6438 = vmatpush1.bf16.msra.mxu0 %v9518_v13  ;;  %7094 = vmatpush1.bf16.msra.mxu1 %v9521_v14  ;;  %v9611_v13 = vld [vmem:[#allocation5 + $0x7e8] ss:$16 sps:$4 sm:$0xff]   ;;  %v90_v14 = vld [vmem:[#allocation2 + $0x30] sm:$0xff] }
 0x11e   :  { %6439 = vmatprep.subr.bf16.mxu0 %v9526_v17  ;;  %7095 = vmatprep.subr.bf16.mxu1 %v9529_v18  ;;  %v122_v17 = vpack.c.bf16 %v90_v14, %v90_v14  ;;  %v93_v18 = vld [vmem:[#allocation2 + $0x48] sm:$0xff]  ;;  %v9706_v14 = vld [vmem:[#allocation5 + $0x9e4] ss:$16 sps:$4 sm:$0xff]  }
 0x11f   :  { %6469 = vmatprep.mubr.bf16.mxu0 %v123_v19  ;;  %7125 = vmatprep.mubr.bf16.mxu1 %v123_v19  ;;  %v9614_v19 = vld [vmem:[#allocation5 + $0x800] ss:$16 sps:$4 sm:$0xff]  }
 0x121   :  { %6440 = vmatpush1.bf16.msra.mxu0 %v9524_v20  ;;  %7096 = vmatpush1.bf16.msra.mxu1 %v9527_v21  ;;  %v9617_v20 = vld [vmem:[#allocation5 + $0x808] ss:$16 sps:$4 sm:$0xff]   ;;  %v9622_v21 = vld [vmem:[#allocation5 + $0x824] ss:$16 sps:$4 sm:$0xff]  }
 0x122   :  { %6441 = vmatprep.subr.bf16.mxu0 %v9532_v22  ;;  %7097 = vmatprep.subr.bf16.mxu1 %v9535_v23  ;;  %v9625_v22 = vld [vmem:[#allocation5 + $0x82c] ss:$16 sps:$4 sm:$0xff]   ;;  %v125_v23 = vpack.c.bf16 %v93_v18, %v93_v18  ;;  %v9712_v18 = vld [vmem:[#allocation5 + $0xa04] ss:$16 sps:$4 sm:$0xff]  }
 0x125   :  { %6442 = vmatpush1.bf16.msra.mxu0 %v9530_v24  ;;  %7098 = vmatpush1.bf16.msra.mxu1 %v9533_v25  ;;  %v9620_v24 = vld [vmem:[#allocation5 + $0x820] ss:$16 sps:$4 sm:$0xff]   ;;  %v9623_v25 = vld [vmem:[#allocation5 + $0x828] ss:$16 sps:$4 sm:$0xff]  }
 0x126   :  { %6443 = vmatprep.subr.bf16.mxu0 %v9538_v26  ;;  %7099 = vmatprep.subr.bf16.mxu1 %v9541_v27  ;;  %v9628_v26 = vld [vmem:[#allocation5 + $0x844] ss:$16 sps:$4 sm:$0xff]   ;;  %v9631_v27 = vld [vmem:[#allocation5 + $0x84c] ss:$16 sps:$4 sm:$0xff]  }
 0x129   :  { %6444 = vmatpush1.bf16.msra.mxu0 %v9536_v28  ;;  %7100 = vmatpush1.bf16.msra.mxu1 %v9539_v29  ;;  %v9626_v28 = vld [vmem:[#allocation5 + $0x840] ss:$16 sps:$4 sm:$0xff]   ;;  %v9629_v29 = vld [vmem:[#allocation5 + $0x848] ss:$16 sps:$4 sm:$0xff]  }
 0x12a   :  { %6445 = vmatprep.subr.bf16.mxu0 %v9544_v30  ;;  %7101 = vmatprep.subr.bf16.mxu1 %v9547_v31  ;;  %v9634_v30 = vld [vmem:[#allocation5 + $0x864] ss:$16 sps:$4 sm:$0xff]   ;;  %v9637_v31 = vld [vmem:[#allocation5 + $0x86c] ss:$16 sps:$4 sm:$0xff]  }
 0x12d   :  { %6446 = vmatpush1.bf16.msra.mxu0 %v9542_v32  ;;  %7102 = vmatpush1.bf16.msra.mxu1 %v9545_v33  ;;  %v9632_v32 = vld [vmem:[#allocation5 + $0x860] ss:$16 sps:$4 sm:$0xff]   ;;  %v9635_v33 = vld [vmem:[#allocation5 + $0x868] ss:$16 sps:$4 sm:$0xff]  }
 0x12e   :  { %6447 = vmatprep.subr.bf16.mxu0 %v9550_v34  ;;  %7103 = vmatprep.subr.bf16.mxu1 %v9553_v35  ;;  %v9640_v34 = vld [vmem:[#allocation5 + $0x884] ss:$16 sps:$4 sm:$0xff]   ;;  %v9643_v35 = vld [vmem:[#allocation5 + $0x88c] ss:$16 sps:$4 sm:$0xff]  }
 0x131   :  { %6448 = vmatpush1.bf16.msra.mxu0 %v9548_v36  ;;  %7104 = vmatpush1.bf16.msra.mxu1 %v9551_v37  ;;  %v9638_v36 = vld [vmem:[#allocation5 + $0x880] ss:$16 sps:$4 sm:$0xff]   ;;  %v9641_v37 = vld [vmem:[#allocation5 + $0x888] ss:$16 sps:$4 sm:$0xff]  }
 0x132   :  { %6449 = vmatprep.subr.bf16.mxu0 %v9556_v38  ;;  %7105 = vmatprep.subr.bf16.mxu1 %v9559_v39  ;;  %v9646_v38 = vld [vmem:[#allocation5 + $0x8a4] ss:$16 sps:$4 sm:$0xff]   ;;  %v9649_v39 = vld [vmem:[#allocation5 + $0x8ac] ss:$16 sps:$4 sm:$0xff]  }
 0x135   :  { %6450 = vmatpush1.bf16.msra.mxu0 %v9554_v40  ;;  %7106 = vmatpush1.bf16.msra.mxu1 %v9557_v41  ;;  %v9644_v40 = vld [vmem:[#allocation5 + $0x8a0] ss:$16 sps:$4 sm:$0xff]   ;;  %v9647_v41 = vld [vmem:[#allocation5 + $0x8a8] ss:$16 sps:$4 sm:$0xff]  }
 0x136   :  { %6451 = vmatprep.subr.bf16.mxu0 %v9562_v42  ;;  %7107 = vmatprep.subr.bf16.mxu1 %v9565_v43  ;;  %v9652_v42 = vld [vmem:[#allocation5 + $0x8c4] ss:$16 sps:$4 sm:$0xff]   ;;  %v9655_v43 = vld [vmem:[#allocation5 + $0x8cc] ss:$16 sps:$4 sm:$0xff]  }
 0x139   :  { %6452 = vmatpush1.bf16.msra.mxu0 %v9560_v44  ;;  %7108 = vmatpush1.bf16.msra.mxu1 %v9563_v45  ;;  %v9650_v44 = vld [vmem:[#allocation5 + $0x8c0] ss:$16 sps:$4 sm:$0xff]   ;;  %v9653_v45 = vld [vmem:[#allocation5 + $0x8c8] ss:$16 sps:$4 sm:$0xff]  }
 0x13a   :  { %6453 = vmatprep.subr.bf16.mxu0 %v9568_v46  ;;  %7109 = vmatprep.subr.bf16.mxu1 %v9571_v47  ;;  %v9658_v46 = vld [vmem:[#allocation5 + $0x8e4] ss:$16 sps:$4 sm:$0xff]   ;;  %v9661_v47 = vld [vmem:[#allocation5 + $0x8ec] ss:$16 sps:$4 sm:$0xff]  }
 0x13d   :  { %6454 = vmatpush1.bf16.msra.mxu0 %v9566_v48  ;;  %7110 = vmatpush1.bf16.msra.mxu1 %v9569_v49  ;;  %v9656_v48 = vld [vmem:[#allocation5 + $0x8e0] ss:$16 sps:$4 sm:$0xff]   ;;  %v9659_v49 = vld [vmem:[#allocation5 + $0x8e8] ss:$16 sps:$4 sm:$0xff]  }
 0x13e   :  { %6455 = vmatprep.subr.bf16.mxu0 %v9574_v50  ;;  %7111 = vmatprep.subr.bf16.mxu1 %v9577_v51  ;;  %v9664_v50 = vld [vmem:[#allocation5 + $0x904] ss:$16 sps:$4 sm:$0xff]   ;;  %v9667_v51 = vld [vmem:[#allocation5 + $0x90c] ss:$16 sps:$4 sm:$0xff]  }
 0x141   :  { %6456 = vmatpush1.bf16.msra.mxu0 %v9572_v52  ;;  %7112 = vmatpush1.bf16.msra.mxu1 %v9575_v53  ;;  %v9662_v52 = vld [vmem:[#allocation5 + $0x900] ss:$16 sps:$4 sm:$0xff]   ;;  %v9665_v53 = vld [vmem:[#allocation5 + $0x908] ss:$16 sps:$4 sm:$0xff]  }
 0x142   :  { %6457 = vmatprep.subr.bf16.mxu0 %v9580_v54  ;;  %7113 = vmatprep.subr.bf16.mxu1 %v9583_v55  ;;  %v9670_v54 = vld [vmem:[#allocation5 + $0x924] ss:$16 sps:$4 sm:$0xff]   ;;  %v9673_v55 = vld [vmem:[#allocation5 + $0x92c] ss:$16 sps:$4 sm:$0xff]  }
 0x145   :  { %6458 = vmatpush1.bf16.msra.mxu0 %v9578_v56  ;;  %7114 = vmatpush1.bf16.msra.mxu1 %v9581_v57  ;;  %v9668_v56 = vld [vmem:[#allocation5 + $0x920] ss:$16 sps:$4 sm:$0xff]   ;;  %v9671_v57 = vld [vmem:[#allocation5 + $0x928] ss:$16 sps:$4 sm:$0xff]  }
 0x146   :  { %6459 = vmatprep.subr.bf16.mxu0 %v9586_v58  ;;  %7115 = vmatprep.subr.bf16.mxu1 %v9589_v59  ;;  %v9676_v58 = vld [vmem:[#allocation5 + $0x944] ss:$16 sps:$4 sm:$0xff]   ;;  %v9679_v59 = vld [vmem:[#allocation5 + $0x94c] ss:$16 sps:$4 sm:$0xff]  }
 0x149   :  { %6460 = vmatpush1.bf16.msra.mxu0 %v9584_v60  ;;  %7116 = vmatpush1.bf16.msra.mxu1 %v9587_v61  ;;  %v9674_v60 = vld [vmem:[#allocation5 + $0x940] ss:$16 sps:$4 sm:$0xff]   ;;  %v9677_v61 = vld [vmem:[#allocation5 + $0x948] ss:$16 sps:$4 sm:$0xff]  }
 0x14a   :  { %6461 = vmatprep.subr.bf16.mxu0 %v9592_v62  ;;  %7117 = vmatprep.subr.bf16.mxu1 %v9595_v63  ;;  %v9682_v62 = vld [vmem:[#allocation5 + $0x964] ss:$16 sps:$4 sm:$0xff]   ;;  %v9685_v63 = vld [vmem:[#allocation5 + $0x96c] ss:$16 sps:$4 sm:$0xff]  }
 0x14d   :  { %6462 = vmatpush1.bf16.msra.mxu0 %v9590_v0  ;;  %7118 = vmatpush1.bf16.msra.mxu1 %v9593_v1  ;;  %v9680_v0 = vld [vmem:[#allocation5 + $0x960] ss:$16 sps:$4 sm:$0xff]   ;;  %v9683_v1 = vld [vmem:[#allocation5 + $0x968] ss:$16 sps:$4 sm:$0xff]  }
 0x14e   :  { %6463 = vmatprep.subr.bf16.mxu0 %v9598_v2  ;;  %7119 = vmatprep.subr.bf16.mxu1 %v9601_v3  ;;  %v9688_v2 = vld [vmem:[#allocation5 + $0x984] ss:$16 sps:$4 sm:$0xff]   ;;  %v9691_v3 = vld [vmem:[#allocation5 + $0x98c] ss:$16 sps:$4 sm:$0xff]  }
 0x151   :  { %6464 = vmatpush1.bf16.msra.mxu0 %v9596_v4  ;;  %7120 = vmatpush1.bf16.msra.mxu1 %v9599_v5  ;;  %v9686_v4 = vld [vmem:[#allocation5 + $0x980] ss:$16 sps:$4 sm:$0xff]   ;;  %v9689_v5 = vld [vmem:[#allocation5 + $0x988] ss:$16 sps:$4 sm:$0xff]  }
 0x152   :  { %6465 = vmatprep.subr.bf16.mxu0 %v9604_v6  ;;  %7121 = vmatprep.subr.bf16.mxu1 %v9607_v7  ;;  %v9694_v6 = vld [vmem:[#allocation5 + $0x9a4] ss:$16 sps:$4 sm:$0xff]   ;;  %v9697_v7 = vld [vmem:[#allocation5 + $0x9ac] ss:$16 sps:$4 sm:$0xff]  }
 0x155   :  { %6466 = vmatpush1.bf16.msra.mxu0 %v9602_v8  ;;  %7122 = vmatpush1.bf16.msra.mxu1 %v9605_v9  ;;  %v9692_v8 = vld [vmem:[#allocation5 + $0x9a0] ss:$16 sps:$4 sm:$0xff]   ;;  %v9695_v9 = vld [vmem:[#allocation5 + $0x9a8] ss:$16 sps:$4 sm:$0xff]  }
 0x156   :  { %6467 = vmatprep.subr.bf16.mxu0 %v9610_v10  ;;  %7123 = vmatprep.subr.bf16.mxu1 %v9613_v11  ;;  %v9700_v10 = vld [vmem:[#allocation5 + $0x9c4] ss:$16 sps:$4 sm:$0xff]   ;;  %v9703_v11 = vld [vmem:[#allocation5 + $0x9cc] ss:$16 sps:$4 sm:$0xff]  }
 0x159   :  { %6468 = vmatpush1.bf16.msra.mxu0 %v9608_v12  ;;  %7124 = vmatpush1.bf16.msra.mxu1 %v9611_v13  ;;  %v9698_v12 = vld [vmem:[#allocation5 + $0x9c0] ss:$16 sps:$4 sm:$0xff]   ;;  %v9701_v13 = vld [vmem:[#allocation5 + $0x9c8] ss:$16 sps:$4 sm:$0xff]  }
 0x15a   :  { %6478 = vmatprep.subr.bf16.mxu0 %v9616_v15  ;;  %7134 = vmatprep.subr.bf16.mxu1 %v9619_v16  ;;  %v9709_v15 = vld [vmem:[#allocation5 + $0x9ec] ss:$16 sps:$4 sm:$0xff]   ;;  %v9704_v16 = vld [vmem:[#allocation5 + $0x9e0] ss:$16 sps:$4 sm:$0xff]  }
 0x15c   :  { %6470 = vmatmul.mubr.bf16.vlgmr.msra.gmra.mrb[0].mxu0 %v122_v17  ;;  %7126 = vmatmul.mubr.bf16.vlgmr.msra.gmra.mrb[0].mxu1 %v122_v17  ;;  %v9707_v17 = vld [vmem:[#allocation5 + $0x9e8] ss:$16 sps:$4 sm:$0xff]  }
 0x15d   :  { %6479 = vmatpush1.bf16.msra.mxu0 %v9614_v19  ;;  %7135 = vmatpush1.bf16.msra.mxu1 %v9617_v20  ;;  %v92_v19 = vld [vmem:[#allocation2 + $0x40] sm:$0xff]  ;;  %v9715_v20 = vld [vmem:[#allocation5 + $0xa0c] ss:$16 sps:$4 sm:$0xff]  }
 0x15e   :  { %6480 = vmatprep.subr.bf16.mxu0 %v9622_v21  ;;  %7136 = vmatprep.subr.bf16.mxu1 %v9625_v22  ;;  %v95_v21 = vld [vmem:[#allocation2 + $0x58] sm:$0xff]  ;;  %v124_v22 = vpack.c.bf16 %v92_v19, %v92_v19 }
 0x15f   :  { %6510 = vmatprep.mubr.bf16.mxu0 %v125_v23  ;;  %7166 = vmatprep.mubr.bf16.mxu1 %v125_v23  ;;  %v9710_v23 = vld [vmem:[#allocation5 + $0xa00] ss:$16 sps:$4 sm:$0xff]   ;;  %v9805_v19 = vld [vmem:[#allocation5 + $0xbec] ss:$16 sps:$4 sm:$0xff]  }
 0x161   :  { %6481 = vmatpush1.bf16.msra.mxu0 %v9620_v24  ;;  %7137 = vmatpush1.bf16.msra.mxu1 %v9623_v25  ;;  %v9713_v24 = vld [vmem:[#allocation5 + $0xa08] ss:$16 sps:$4 sm:$0xff]   ;;  %v9718_v25 = vld [vmem:[#allocation5 + $0xa24] ss:$16 sps:$4 sm:$0xff]  }
 0x162   :  { %6482 = vmatprep.subr.bf16.mxu0 %v9628_v26  ;;  %7138 = vmatprep.subr.bf16.mxu1 %v9631_v27  ;;  %v9721_v26 = vld [vmem:[#allocation5 + $0xa2c] ss:$16 sps:$4 sm:$0xff]   ;;  %v127_v27 = vpack.c.bf16 %v95_v21, %v95_v21  ;;  %v9803_v21 = vld [vmem:[#allocation5 + $0xbe8] ss:$16 sps:$4 sm:$0xff]  }
 0x165   :  { %6483 = vmatpush1.bf16.msra.mxu0 %v9626_v28  ;;  %7139 = vmatpush1.bf16.msra.mxu1 %v9629_v29  ;;  %v9716_v28 = vld [vmem:[#allocation5 + $0xa20] ss:$16 sps:$4 sm:$0xff]   ;;  %v9719_v29 = vld [vmem:[#allocation5 + $0xa28] ss:$16 sps:$4 sm:$0xff]  }
 0x166   :  { %6484 = vmatprep.subr.bf16.mxu0 %v9634_v30  ;;  %7140 = vmatprep.subr.bf16.mxu1 %v9637_v31  ;;  %v9724_v30 = vld [vmem:[#allocation5 + $0xa44] ss:$16 sps:$4 sm:$0xff]   ;;  %v9727_v31 = vld [vmem:[#allocation5 + $0xa4c] ss:$16 sps:$4 sm:$0xff]  }
 0x169   :  { %6485 = vmatpush1.bf16.msra.mxu0 %v9632_v32  ;;  %7141 = vmatpush1.bf16.msra.mxu1 %v9635_v33  ;;  %v9722_v32 = vld [vmem:[#allocation5 + $0xa40] ss:$16 sps:$4 sm:$0xff]   ;;  %v9725_v33 = vld [vmem:[#allocation5 + $0xa48] ss:$16 sps:$4 sm:$0xff]  }
 0x16a   :  { %6486 = vmatprep.subr.bf16.mxu0 %v9640_v34  ;;  %7142 = vmatprep.subr.bf16.mxu1 %v9643_v35  ;;  %v9730_v34 = vld [vmem:[#allocation5 + $0xa64] ss:$16 sps:$4 sm:$0xff]   ;;  %v9733_v35 = vld [vmem:[#allocation5 + $0xa6c] ss:$16 sps:$4 sm:$0xff]  }
 0x16d   :  { %6487 = vmatpush1.bf16.msra.mxu0 %v9638_v36  ;;  %7143 = vmatpush1.bf16.msra.mxu1 %v9641_v37  ;;  %v9728_v36 = vld [vmem:[#allocation5 + $0xa60] ss:$16 sps:$4 sm:$0xff]   ;;  %v9731_v37 = vld [vmem:[#allocation5 + $0xa68] ss:$16 sps:$4 sm:$0xff]  }
 0x16e   :  { %6488 = vmatprep.subr.bf16.mxu0 %v9646_v38  ;;  %7144 = vmatprep.subr.bf16.mxu1 %v9649_v39  ;;  %v9736_v38 = vld [vmem:[#allocation5 + $0xa84] ss:$16 sps:$4 sm:$0xff]   ;;  %v9739_v39 = vld [vmem:[#allocation5 + $0xa8c] ss:$16 sps:$4 sm:$0xff]  }
 0x171   :  { %6489 = vmatpush1.bf16.msra.mxu0 %v9644_v40  ;;  %7145 = vmatpush1.bf16.msra.mxu1 %v9647_v41  ;;  %v9734_v40 = vld [vmem:[#allocation5 + $0xa80] ss:$16 sps:$4 sm:$0xff]   ;;  %v9737_v41 = vld [vmem:[#allocation5 + $0xa88] ss:$16 sps:$4 sm:$0xff]  }
 0x172   :  { %6490 = vmatprep.subr.bf16.mxu0 %v9652_v42  ;;  %7146 = vmatprep.subr.bf16.mxu1 %v9655_v43  ;;  %v9742_v42 = vld [vmem:[#allocation5 + $0xaa4] ss:$16 sps:$4 sm:$0xff]   ;;  %v9745_v43 = vld [vmem:[#allocation5 + $0xaac] ss:$16 sps:$4 sm:$0xff]  }
 0x175   :  { %6491 = vmatpush1.bf16.msra.mxu0 %v9650_v44  ;;  %7147 = vmatpush1.bf16.msra.mxu1 %v9653_v45  ;;  %v9740_v44 = vld [vmem:[#allocation5 + $0xaa0] ss:$16 sps:$4 sm:$0xff]   ;;  %v9743_v45 = vld [vmem:[#allocation5 + $0xaa8] ss:$16 sps:$4 sm:$0xff]  }
 0x176   :  { %6492 = vmatprep.subr.bf16.mxu0 %v9658_v46  ;;  %7148 = vmatprep.subr.bf16.mxu1 %v9661_v47  ;;  %v9748_v46 = vld [vmem:[#allocation5 + $0xac4] ss:$16 sps:$4 sm:$0xff]   ;;  %v9751_v47 = vld [vmem:[#allocation5 + $0xacc] ss:$16 sps:$4 sm:$0xff]  }
 0x179   :  { %6493 = vmatpush1.bf16.msra.mxu0 %v9656_v48  ;;  %7149 = vmatpush1.bf16.msra.mxu1 %v9659_v49  ;;  %v9746_v48 = vld [vmem:[#allocation5 + $0xac0] ss:$16 sps:$4 sm:$0xff]   ;;  %v9749_v49 = vld [vmem:[#allocation5 + $0xac8] ss:$16 sps:$4 sm:$0xff]  }
 0x17a   :  { %6494 = vmatprep.subr.bf16.mxu0 %v9664_v50  ;;  %7150 = vmatprep.subr.bf16.mxu1 %v9667_v51  ;;  %v9754_v50 = vld [vmem:[#allocation5 + $0xae4] ss:$16 sps:$4 sm:$0xff]   ;;  %v9757_v51 = vld [vmem:[#allocation5 + $0xaec] ss:$16 sps:$4 sm:$0xff]  }
 0x17d   :  { %6495 = vmatpush1.bf16.msra.mxu0 %v9662_v52  ;;  %7151 = vmatpush1.bf16.msra.mxu1 %v9665_v53  ;;  %v9752_v52 = vld [vmem:[#allocation5 + $0xae0] ss:$16 sps:$4 sm:$0xff]   ;;  %v9755_v53 = vld [vmem:[#allocation5 + $0xae8] ss:$16 sps:$4 sm:$0xff]  }
 0x17e   :  { %6496 = vmatprep.subr.bf16.mxu0 %v9670_v54  ;;  %7152 = vmatprep.subr.bf16.mxu1 %v9673_v55  ;;  %v9760_v54 = vld [vmem:[#allocation5 + $0xb04] ss:$16 sps:$4 sm:$0xff]   ;;  %v9763_v55 = vld [vmem:[#allocation5 + $0xb0c] ss:$16 sps:$4 sm:$0xff]  }
 0x181   :  { %6497 = vmatpush1.bf16.msra.mxu0 %v9668_v56  ;;  %7153 = vmatpush1.bf16.msra.mxu1 %v9671_v57  ;;  %v9758_v56 = vld [vmem:[#allocation5 + $0xb00] ss:$16 sps:$4 sm:$0xff]   ;;  %v9761_v57 = vld [vmem:[#allocation5 + $0xb08] ss:$16 sps:$4 sm:$0xff]  }
 0x182   :  { %6498 = vmatprep.subr.bf16.mxu0 %v9676_v58  ;;  %7154 = vmatprep.subr.bf16.mxu1 %v9679_v59  ;;  %v9766_v58 = vld [vmem:[#allocation5 + $0xb24] ss:$16 sps:$4 sm:$0xff]   ;;  %v9769_v59 = vld [vmem:[#allocation5 + $0xb2c] ss:$16 sps:$4 sm:$0xff]  }
 0x185   :  { %6499 = vmatpush1.bf16.msra.mxu0 %v9674_v60  ;;  %7155 = vmatpush1.bf16.msra.mxu1 %v9677_v61  ;;  %v9764_v60 = vld [vmem:[#allocation5 + $0xb20] ss:$16 sps:$4 sm:$0xff]   ;;  %v9767_v61 = vld [vmem:[#allocation5 + $0xb28] ss:$16 sps:$4 sm:$0xff]  }
 0x186   :  { %6500 = vmatprep.subr.bf16.mxu0 %v9682_v62  ;;  %7156 = vmatprep.subr.bf16.mxu1 %v9685_v63  ;;  %v9772_v62 = vld [vmem:[#allocation5 + $0xb44] ss:$16 sps:$4 sm:$0xff]   ;;  %v9775_v63 = vld [vmem:[#allocation5 + $0xb4c] ss:$16 sps:$4 sm:$0xff]  }
 0x189   :  { %6501 = vmatpush1.bf16.msra.mxu0 %v9680_v0  ;;  %7157 = vmatpush1.bf16.msra.mxu1 %v9683_v1  ;;  %v9770_v0 = vld [vmem:[#allocation5 + $0xb40] ss:$16 sps:$4 sm:$0xff]   ;;  %v9773_v1 = vld [vmem:[#allocation5 + $0xb48] ss:$16 sps:$4 sm:$0xff]  }
 0x18a   :  { %6502 = vmatprep.subr.bf16.mxu0 %v9688_v2  ;;  %7158 = vmatprep.subr.bf16.mxu1 %v9691_v3  ;;  %v9778_v2 = vld [vmem:[#allocation5 + $0xb64] ss:$16 sps:$4 sm:$0xff]   ;;  %v9781_v3 = vld [vmem:[#allocation5 + $0xb6c] ss:$16 sps:$4 sm:$0xff]  }
 0x18d   :  { %6503 = vmatpush1.bf16.msra.mxu0 %v9686_v4  ;;  %7159 = vmatpush1.bf16.msra.mxu1 %v9689_v5  ;;  %v9776_v4 = vld [vmem:[#allocation5 + $0xb60] ss:$16 sps:$4 sm:$0xff]   ;;  %v9779_v5 = vld [vmem:[#allocation5 + $0xb68] ss:$16 sps:$4 sm:$0xff]  }
 0x18e   :  { %6504 = vmatprep.subr.bf16.mxu0 %v9694_v6  ;;  %7160 = vmatprep.subr.bf16.mxu1 %v9697_v7  ;;  %v9784_v6 = vld [vmem:[#allocation5 + $0xb84] ss:$16 sps:$4 sm:$0xff]   ;;  %v9787_v7 = vld [vmem:[#allocation5 + $0xb8c] ss:$16 sps:$4 sm:$0xff]  }
 0x191   :  { %6505 = vmatpush1.bf16.msra.mxu0 %v9692_v8  ;;  %7161 = vmatpush1.bf16.msra.mxu1 %v9695_v9  ;;  %v9782_v8 = vld [vmem:[#allocation5 + $0xb80] ss:$16 sps:$4 sm:$0xff]   ;;  %v9785_v9 = vld [vmem:[#allocation5 + $0xb88] ss:$16 sps:$4 sm:$0xff]  }
 0x192   :  { %6506 = vmatprep.subr.bf16.mxu0 %v9700_v10  ;;  %7162 = vmatprep.subr.bf16.mxu1 %v9703_v11  ;;  %v9790_v10 = vld [vmem:[#allocation5 + $0xba4] ss:$16 sps:$4 sm:$0xff]   ;;  %v9793_v11 = vld [vmem:[#allocation5 + $0xbac] ss:$16 sps:$4 sm:$0xff]  }
 0x195   :  { %6507 = vmatpush1.bf16.msra.mxu0 %v9698_v12  ;;  %7163 = vmatpush1.bf16.msra.mxu1 %v9701_v13  ;;  %v9788_v12 = vld [vmem:[#allocation5 + $0xba0] ss:$16 sps:$4 sm:$0xff]   ;;  %v9791_v13 = vld [vmem:[#allocation5 + $0xba8] ss:$16 sps:$4 sm:$0xff]  }
 0x196   :  { %6508 = vmatprep.subr.bf16.mxu0 %v9706_v14  ;;  %7164 = vmatprep.subr.bf16.mxu1 %v9709_v15  ;;  %v9796_v14 = vld [vmem:[#allocation5 + $0xbc4] ss:$16 sps:$4 sm:$0xff]   ;;  %v9799_v15 = vld [vmem:[#allocation5 + $0xbcc] ss:$16 sps:$4 sm:$0xff]  }
 0x199   :  { %6509 = vmatpush1.bf16.msra.mxu0 %v9704_v16  ;;  %7165 = vmatpush1.bf16.msra.mxu1 %v9707_v17  ;;  %v9794_v16 = vld [vmem:[#allocation5 + $0xbc0] ss:$16 sps:$4 sm:$0xff]   ;;  %v9797_v17 = vld [vmem:[#allocation5 + $0xbc8] ss:$16 sps:$4 sm:$0xff]  }
 0x19a   :  { %6519 = vmatprep.subr.bf16.mxu0 %v9712_v18  ;;  %7175 = vmatprep.subr.bf16.mxu1 %v9715_v20  ;;  %v9802_v18 = vld [vmem:[#allocation5 + $0xbe4] ss:$16 sps:$4 sm:$0xff]   ;;  %v9800_v20 = vld [vmem:[#allocation5 + $0xbe0] ss:$16 sps:$4 sm:$0xff]  }
 0x19c   :  { %6511 = vmatmul.mubr.bf16.vlgmr.msra.gmra.mrb[0].mxu0 %v124_v22  ;;  %7167 = vmatmul.mubr.bf16.vlgmr.msra.gmra.mrb[0].mxu1 %v124_v22  ;;  %v9808_v22 = vld [vmem:[#allocation5 + $0xc04] ss:$16 sps:$4 sm:$0xff]  }
 0x19d   :  { %6520 = vmatpush1.bf16.msra.mxu0 %v9710_v23  ;;  %7176 = vmatpush1.bf16.msra.mxu1 %v9713_v24  ;;  %v94_v23 = vld [vmem:[#allocation2 + $0x50] sm:$0xff]  ;;  %v9811_v24 = vld [vmem:[#allocation5 + $0xc0c] ss:$16 sps:$4 sm:$0xff]  }
 0x19e   :  { %6521 = vmatprep.subr.bf16.mxu0 %v9718_v25  ;;  %7177 = vmatprep.subr.bf16.mxu1 %v9721_v26  ;;  %v97_v25 = vld [vmem:[#allocation2 + $0x68] sm:$0xff]  ;;  %v126_v26 = vpack.c.bf16 %v94_v23, %v94_v23 }
 0x19f   :  { %6551 = vmatprep.mubr.bf16.mxu0 %v127_v27  ;;  %7207 = vmatprep.mubr.bf16.mxu1 %v127_v27  ;;  %v9806_v27 = vld [vmem:[#allocation5 + $0xc00] ss:$16 sps:$4 sm:$0xff]   ;;  %v9901_v23 = vld [vmem:[#allocation5 + $0xdec] ss:$16 sps:$4 sm:$0xff]  }
 0x1a1   :  { %6522 = vmatpush1.bf16.msra.mxu0 %v9716_v28  ;;  %7178 = vmatpush1.bf16.msra.mxu1 %v9719_v29  ;;  %v9809_v28 = vld [vmem:[#allocation5 + $0xc08] ss:$16 sps:$4 sm:$0xff]   ;;  %v9814_v29 = vld [vmem:[#allocation5 + $0xc24] ss:$16 sps:$4 sm:$0xff]  }
 0x1a2   :  { %6523 = vmatprep.subr.bf16.mxu0 %v9724_v30  ;;  %7179 = vmatprep.subr.bf16.mxu1 %v9727_v31  ;;  %v9817_v30 = vld [vmem:[#allocation5 + $0xc2c] ss:$16 sps:$4 sm:$0xff]   ;;  %v129_v31 = vpack.c.bf16 %v97_v25, %v97_v25  ;;  %v9899_v25 = vld [vmem:[#allocation5 + $0xde8] ss:$16 sps:$4 sm:$0xff]  }
 0x1a5   :  { %6524 = vmatpush1.bf16.msra.mxu0 %v9722_v32  ;;  %7180 = vmatpush1.bf16.msra.mxu1 %v9725_v33  ;;  %v9812_v32 = vld [vmem:[#allocation5 + $0xc20] ss:$16 sps:$4 sm:$0xff]   ;;  %v9815_v33 = vld [vmem:[#allocation5 + $0xc28] ss:$16 sps:$4 sm:$0xff]  }
 0x1a6   :  { %6525 = vmatprep.subr.bf16.mxu0 %v9730_v34  ;;  %7181 = vmatprep.subr.bf16.mxu1 %v9733_v35  ;;  %v9820_v34 = vld [vmem:[#allocation5 + $0xc44] ss:$16 sps:$4 sm:$0xff]   ;;  %v9823_v35 = vld [vmem:[#allocation5 + $0xc4c] ss:$16 sps:$4 sm:$0xff]  }
 0x1a9   :  { %6526 = vmatpush1.bf16.msra.mxu0 %v9728_v36  ;;  %7182 = vmatpush1.bf16.msra.mxu1 %v9731_v37  ;;  %v9818_v36 = vld [vmem:[#allocation5 + $0xc40] ss:$16 sps:$4 sm:$0xff]   ;;  %v9821_v37 = vld [vmem:[#allocation5 + $0xc48] ss:$16 sps:$4 sm:$0xff]  }
 0x1aa   :  { %6527 = vmatprep.subr.bf16.mxu0 %v9736_v38  ;;  %7183 = vmatprep.subr.bf16.mxu1 %v9739_v39  ;;  %v9826_v38 = vld [vmem:[#allocation5 + $0xc64] ss:$16 sps:$4 sm:$0xff]   ;;  %v9829_v39 = vld [vmem:[#allocation5 + $0xc6c] ss:$16 sps:$4 sm:$0xff]  }
 0x1ad   :  { %6528 = vmatpush1.bf16.msra.mxu0 %v9734_v40  ;;  %7184 = vmatpush1.bf16.msra.mxu1 %v9737_v41  ;;  %v9824_v40 = vld [vmem:[#allocation5 + $0xc60] ss:$16 sps:$4 sm:$0xff]   ;;  %v9827_v41 = vld [vmem:[#allocation5 + $0xc68] ss:$16 sps:$4 sm:$0xff]  }
 0x1ae   :  { %6529 = vmatprep.subr.bf16.mxu0 %v9742_v42  ;;  %7185 = vmatprep.subr.bf16.mxu1 %v9745_v43  ;;  %v9832_v42 = vld [vmem:[#allocation5 + $0xc84] ss:$16 sps:$4 sm:$0xff]   ;;  %v9835_v43 = vld [vmem:[#allocation5 + $0xc8c] ss:$16 sps:$4 sm:$0xff]  }
 0x1b1   :  { %6530 = vmatpush1.bf16.msra.mxu0 %v9740_v44  ;;  %7186 = vmatpush1.bf16.msra.mxu1 %v9743_v45  ;;  %v9830_v44 = vld [vmem:[#allocation5 + $0xc80] ss:$16 sps:$4 sm:$0xff]   ;;  %v9833_v45 = vld [vmem:[#allocation5 + $0xc88] ss:$16 sps:$4 sm:$0xff]  }
 0x1b2   :  { %6531 = vmatprep.subr.bf16.mxu0 %v9748_v46  ;;  %7187 = vmatprep.subr.bf16.mxu1 %v9751_v47  ;;  %v9838_v46 = vld [vmem:[#allocation5 + $0xca4] ss:$16 sps:$4 sm:$0xff]   ;;  %v9841_v47 = vld [vmem:[#allocation5 + $0xcac] ss:$16 sps:$4 sm:$0xff]  }
 0x1b5   :  { %6532 = vmatpush1.bf16.msra.mxu0 %v9746_v48  ;;  %7188 = vmatpush1.bf16.msra.mxu1 %v9749_v49  ;;  %v9836_v48 = vld [vmem:[#allocation5 + $0xca0] ss:$16 sps:$4 sm:$0xff]   ;;  %v9839_v49 = vld [vmem:[#allocation5 + $0xca8] ss:$16 sps:$4 sm:$0xff]  }
 0x1b6   :  { %6533 = vmatprep.subr.bf16.mxu0 %v9754_v50  ;;  %7189 = vmatprep.subr.bf16.mxu1 %v9757_v51  ;;  %v9844_v50 = vld [vmem:[#allocation5 + $0xcc4] ss:$16 sps:$4 sm:$0xff]   ;;  %v9847_v51 = vld [vmem:[#allocation5 + $0xccc] ss:$16 sps:$4 sm:$0xff]  }
 0x1b9   :  { %6534 = vmatpush1.bf16.msra.mxu0 %v9752_v52  ;;  %7190 = vmatpush1.bf16.msra.mxu1 %v9755_v53  ;;  %v9842_v52 = vld [vmem:[#allocation5 + $0xcc0] ss:$16 sps:$4 sm:$0xff]   ;;  %v9845_v53 = vld [vmem:[#allocation5 + $0xcc8] ss:$16 sps:$4 sm:$0xff]  }
 0x1ba   :  { %6535 = vmatprep.subr.bf16.mxu0 %v9760_v54  ;;  %7191 = vmatprep.subr.bf16.mxu1 %v9763_v55  ;;  %v9850_v54 = vld [vmem:[#allocation5 + $0xce4] ss:$16 sps:$4 sm:$0xff]   ;;  %v9853_v55 = vld [vmem:[#allocation5 + $0xcec] ss:$16 sps:$4 sm:$0xff]  }
 0x1bd   :  { %6536 = vmatpush1.bf16.msra.mxu0 %v9758_v56  ;;  %7192 = vmatpush1.bf16.msra.mxu1 %v9761_v57  ;;  %v9848_v56 = vld [vmem:[#allocation5 + $0xce0] ss:$16 sps:$4 sm:$0xff]   ;;  %v9851_v57 = vld [vmem:[#allocation5 + $0xce8] ss:$16 sps:$4 sm:$0xff]  }
 0x1be   :  { %6537 = vmatprep.subr.bf16.mxu0 %v9766_v58  ;;  %7193 = vmatprep.subr.bf16.mxu1 %v9769_v59  ;;  %v9856_v58 = vld [vmem:[#allocation5 + $0xd04] ss:$16 sps:$4 sm:$0xff]   ;;  %v9859_v59 = vld [vmem:[#allocation5 + $0xd0c] ss:$16 sps:$4 sm:$0xff]  }
 0x1c1   :  { %6538 = vmatpush1.bf16.msra.mxu0 %v9764_v60  ;;  %7194 = vmatpush1.bf16.msra.mxu1 %v9767_v61  ;;  %v9854_v60 = vld [vmem:[#allocation5 + $0xd00] ss:$16 sps:$4 sm:$0xff]   ;;  %v9857_v61 = vld [vmem:[#allocation5 + $0xd08] ss:$16 sps:$4 sm:$0xff]  }
 0x1c2   :  { %6539 = vmatprep.subr.bf16.mxu0 %v9772_v62  ;;  %7195 = vmatprep.subr.bf16.mxu1 %v9775_v63  ;;  %v9862_v62 = vld [vmem:[#allocation5 + $0xd24] ss:$16 sps:$4 sm:$0xff]   ;;  %v9865_v63 = vld [vmem:[#allocation5 + $0xd2c] ss:$16 sps:$4 sm:$0xff]  }
 0x1c5   :  { %6540 = vmatpush1.bf16.msra.mxu0 %v9770_v0  ;;  %7196 = vmatpush1.bf16.msra.mxu1 %v9773_v1  ;;  %v9860_v0 = vld [vmem:[#allocation5 + $0xd20] ss:$16 sps:$4 sm:$0xff]   ;;  %v9863_v1 = vld [vmem:[#allocation5 + $0xd28] ss:$16 sps:$4 sm:$0xff]  }
 0x1c6   :  { %6541 = vmatprep.subr.bf16.mxu0 %v9778_v2  ;;  %7197 = vmatprep.subr.bf16.mxu1 %v9781_v3  ;;  %v9868_v2 = vld [vmem:[#allocation5 + $0xd44] ss:$16 sps:$4 sm:$0xff]   ;;  %v9871_v3 = vld [vmem:[#allocation5 + $0xd4c] ss:$16 sps:$4 sm:$0xff]  }
 0x1c9   :  { %6542 = vmatpush1.bf16.msra.mxu0 %v9776_v4  ;;  %7198 = vmatpush1.bf16.msra.mxu1 %v9779_v5  ;;  %v9866_v4 = vld [vmem:[#allocation5 + $0xd40] ss:$16 sps:$4 sm:$0xff]   ;;  %v9869_v5 = vld [vmem:[#allocation5 + $0xd48] ss:$16 sps:$4 sm:$0xff]  }
 0x1ca   :  { %6543 = vmatprep.subr.bf16.mxu0 %v9784_v6  ;;  %7199 = vmatprep.subr.bf16.mxu1 %v9787_v7  ;;  %v9874_v6 = vld [vmem:[#allocation5 + $0xd64] ss:$16 sps:$4 sm:$0xff]   ;;  %v9877_v7 = vld [vmem:[#allocation5 + $0xd6c] ss:$16 sps:$4 sm:$0xff]  }
 0x1cd   :  { %6544 = vmatpush1.bf16.msra.mxu0 %v9782_v8  ;;  %7200 = vmatpush1.bf16.msra.mxu1 %v9785_v9  ;;  %v9872_v8 = vld [vmem:[#allocation5 + $0xd60] ss:$16 sps:$4 sm:$0xff]   ;;  %v9875_v9 = vld [vmem:[#allocation5 + $0xd68] ss:$16 sps:$4 sm:$0xff]  }
 0x1ce   :  { %6545 = vmatprep.subr.bf16.mxu0 %v9790_v10  ;;  %7201 = vmatprep.subr.bf16.mxu1 %v9793_v11  ;;  %v9880_v10 = vld [vmem:[#allocation5 + $0xd84] ss:$16 sps:$4 sm:$0xff]   ;;  %v9883_v11 = vld [vmem:[#allocation5 + $0xd8c] ss:$16 sps:$4 sm:$0xff]  }
 0x1d1   :  { %6546 = vmatpush1.bf16.msra.mxu0 %v9788_v12  ;;  %7202 = vmatpush1.bf16.msra.mxu1 %v9791_v13  ;;  %v9878_v12 = vld [vmem:[#allocation5 + $0xd80] ss:$16 sps:$4 sm:$0xff]   ;;  %v9881_v13 = vld [vmem:[#allocation5 + $0xd88] ss:$16 sps:$4 sm:$0xff]  }
 0x1d2   :  { %6547 = vmatprep.subr.bf16.mxu0 %v9796_v14  ;;  %7203 = vmatprep.subr.bf16.mxu1 %v9799_v15  ;;  %v9886_v14 = vld [vmem:[#allocation5 + $0xda4] ss:$16 sps:$4 sm:$0xff]   ;;  %v9889_v15 = vld [vmem:[#allocation5 + $0xdac] ss:$16 sps:$4 sm:$0xff]  }
 0x1d5   :  { %6548 = vmatpush1.bf16.msra.mxu0 %v9794_v16  ;;  %7204 = vmatpush1.bf16.msra.mxu1 %v9797_v17  ;;  %v9884_v16 = vld [vmem:[#allocation5 + $0xda0] ss:$16 sps:$4 sm:$0xff]   ;;  %v9887_v17 = vld [vmem:[#allocation5 + $0xda8] ss:$16 sps:$4 sm:$0xff]  }
 0x1d6   :  { %6549 = vmatprep.subr.bf16.mxu0 %v9802_v18  ;;  %7205 = vmatprep.subr.bf16.mxu1 %v9805_v19  ;;  %v9892_v18 = vld [vmem:[#allocation5 + $0xdc4] ss:$16 sps:$4 sm:$0xff]   ;;  %v9895_v19 = vld [vmem:[#allocation5 + $0xdcc] ss:$16 sps:$4 sm:$0xff]  }
 0x1d9   :  { %6550 = vmatpush1.bf16.msra.mxu0 %v9800_v20  ;;  %7206 = vmatpush1.bf16.msra.mxu1 %v9803_v21  ;;  %v9890_v20 = vld [vmem:[#allocation5 + $0xdc0] ss:$16 sps:$4 sm:$0xff]   ;;  %v9893_v21 = vld [vmem:[#allocation5 + $0xdc8] ss:$16 sps:$4 sm:$0xff]  }
 0x1da   :  { %6560 = vmatprep.subr.bf16.mxu0 %v9808_v22  ;;  %7216 = vmatprep.subr.bf16.mxu1 %v9811_v24  ;;  %v9898_v22 = vld [vmem:[#allocation5 + $0xde4] ss:$16 sps:$4 sm:$0xff]   ;;  %v9896_v24 = vld [vmem:[#allocation5 + $0xde0] ss:$16 sps:$4 sm:$0xff]  }
 0x1dc   :  { %6552 = vmatmul.mubr.bf16.vlgmr.msra.gmra.mrb[0].mxu0 %v126_v26  ;;  %7208 = vmatmul.mubr.bf16.vlgmr.msra.gmra.mrb[0].mxu1 %v126_v26  ;;  %v9904_v26 = vld [vmem:[#allocation5 + $0xe04] ss:$16 sps:$4 sm:$0xff]  }
 0x1dd   :  { %6561 = vmatpush1.bf16.msra.mxu0 %v9806_v27  ;;  %7217 = vmatpush1.bf16.msra.mxu1 %v9809_v28  ;;  %v96_v27 = vld [vmem:[#allocation2 + $0x60] sm:$0xff]  ;;  %v9907_v28 = vld [vmem:[#allocation5 + $0xe0c] ss:$16 sps:$4 sm:$0xff]  }
 0x1de   :  { %6562 = vmatprep.subr.bf16.mxu0 %v9814_v29  ;;  %7218 = vmatprep.subr.bf16.mxu1 %v9817_v30  ;;  %v99_v29 = vld [vmem:[#allocation2 + $0x78] sm:$0xff]  ;;  %v128_v30 = vpack.c.bf16 %v96_v27, %v96_v27 }
 0x1df   :  { %6592 = vmatprep.mubr.bf16.mxu0 %v129_v31  ;;  %7248 = vmatprep.mubr.bf16.mxu1 %v129_v31  ;;  %v9902_v31 = vld [vmem:[#allocation5 + $0xe00] ss:$16 sps:$4 sm:$0xff]   ;;  %v9997_v27 = vld [vmem:[#allocation5 + $0xfec] ss:$16 sps:$4 sm:$0xff]  }
 0x1e1   :  { %6563 = vmatpush1.bf16.msra.mxu0 %v9812_v32  ;;  %7219 = vmatpush1.bf16.msra.mxu1 %v9815_v33  ;;  %v9905_v32 = vld [vmem:[#allocation5 + $0xe08] ss:$16 sps:$4 sm:$0xff]   ;;  %v9910_v33 = vld [vmem:[#allocation5 + $0xe24] ss:$16 sps:$4 sm:$0xff]  }
 0x1e2   :  { %6564 = vmatprep.subr.bf16.mxu0 %v9820_v34  ;;  %7220 = vmatprep.subr.bf16.mxu1 %v9823_v35  ;;  %v9913_v34 = vld [vmem:[#allocation5 + $0xe2c] ss:$16 sps:$4 sm:$0xff]   ;;  %v131_v35 = vpack.c.bf16 %v99_v29, %v99_v29  ;;  %v9995_v29 = vld [vmem:[#allocation5 + $0xfe8] ss:$16 sps:$4 sm:$0xff]  }
 0x1e5   :  { %6565 = vmatpush1.bf16.msra.mxu0 %v9818_v36  ;;  %7221 = vmatpush1.bf16.msra.mxu1 %v9821_v37  ;;  %v9908_v36 = vld [vmem:[#allocation5 + $0xe20] ss:$16 sps:$4 sm:$0xff]   ;;  %v9911_v37 = vld [vmem:[#allocation5 + $0xe28] ss:$16 sps:$4 sm:$0xff]  }
 0x1e6   :  { %6566 = vmatprep.subr.bf16.mxu0 %v9826_v38  ;;  %7222 = vmatprep.subr.bf16.mxu1 %v9829_v39  ;;  %v9916_v38 = vld [vmem:[#allocation5 + $0xe44] ss:$16 sps:$4 sm:$0xff]   ;;  %v9919_v39 = vld [vmem:[#allocation5 + $0xe4c] ss:$16 sps:$4 sm:$0xff]  }
 0x1e9   :  { %6567 = vmatpush1.bf16.msra.mxu0 %v9824_v40  ;;  %7223 = vmatpush1.bf16.msra.mxu1 %v9827_v41  ;;  %v9914_v40 = vld [vmem:[#allocation5 + $0xe40] ss:$16 sps:$4 sm:$0xff]   ;;  %v9917_v41 = vld [vmem:[#allocation5 + $0xe48] ss:$16 sps:$4 sm:$0xff]  }
 0x1ea   :  { %6568 = vmatprep.subr.bf16.mxu0 %v9832_v42  ;;  %7224 = vmatprep.subr.bf16.mxu1 %v9835_v43  ;;  %v9922_v42 = vld [vmem:[#allocation5 + $0xe64] ss:$16 sps:$4 sm:$0xff]   ;;  %v9925_v43 = vld [vmem:[#allocation5 + $0xe6c] ss:$16 sps:$4 sm:$0xff]  }
 0x1ed   :  { %6569 = vmatpush1.bf16.msra.mxu0 %v9830_v44  ;;  %7225 = vmatpush1.bf16.msra.mxu1 %v9833_v45  ;;  %v9920_v44 = vld [vmem:[#allocation5 + $0xe60] ss:$16 sps:$4 sm:$0xff]   ;;  %v9923_v45 = vld [vmem:[#allocation5 + $0xe68] ss:$16 sps:$4 sm:$0xff]  }
 0x1ee   :  { %6570 = vmatprep.subr.bf16.mxu0 %v9838_v46  ;;  %7226 = vmatprep.subr.bf16.mxu1 %v9841_v47  ;;  %v9928_v46 = vld [vmem:[#allocation5 + $0xe84] ss:$16 sps:$4 sm:$0xff]   ;;  %v9931_v47 = vld [vmem:[#allocation5 + $0xe8c] ss:$16 sps:$4 sm:$0xff]  }
 0x1f1   :  { %6571 = vmatpush1.bf16.msra.mxu0 %v9836_v48  ;;  %7227 = vmatpush1.bf16.msra.mxu1 %v9839_v49  ;;  %v9926_v48 = vld [vmem:[#allocation5 + $0xe80] ss:$16 sps:$4 sm:$0xff]   ;;  %v9929_v49 = vld [vmem:[#allocation5 + $0xe88] ss:$16 sps:$4 sm:$0xff]  }
 0x1f2   :  { %6572 = vmatprep.subr.bf16.mxu0 %v9844_v50  ;;  %7228 = vmatprep.subr.bf16.mxu1 %v9847_v51  ;;  %v9934_v50 = vld [vmem:[#allocation5 + $0xea4] ss:$16 sps:$4 sm:$0xff]   ;;  %v9937_v51 = vld [vmem:[#allocation5 + $0xeac] ss:$16 sps:$4 sm:$0xff]  }
 0x1f5   :  { %6573 = vmatpush1.bf16.msra.mxu0 %v9842_v52  ;;  %7229 = vmatpush1.bf16.msra.mxu1 %v9845_v53  ;;  %v9932_v52 = vld [vmem:[#allocation5 + $0xea0] ss:$16 sps:$4 sm:$0xff]   ;;  %v9935_v53 = vld [vmem:[#allocation5 + $0xea8] ss:$16 sps:$4 sm:$0xff]  }
 0x1f6   :  { %6574 = vmatprep.subr.bf16.mxu0 %v9850_v54  ;;  %7230 = vmatprep.subr.bf16.mxu1 %v9853_v55  ;;  %v9940_v54 = vld [vmem:[#allocation5 + $0xec4] ss:$16 sps:$4 sm:$0xff]   ;;  %v9943_v55 = vld [vmem:[#allocation5 + $0xecc] ss:$16 sps:$4 sm:$0xff]  }
 0x1f9   :  { %6575 = vmatpush1.bf16.msra.mxu0 %v9848_v56  ;;  %7231 = vmatpush1.bf16.msra.mxu1 %v9851_v57  ;;  %v9938_v56 = vld [vmem:[#allocation5 + $0xec0] ss:$16 sps:$4 sm:$0xff]   ;;  %v9941_v57 = vld [vmem:[#allocation5 + $0xec8] ss:$16 sps:$4 sm:$0xff]  }
 0x1fa   :  { %6576 = vmatprep.subr.bf16.mxu0 %v9856_v58  ;;  %7232 = vmatprep.subr.bf16.mxu1 %v9859_v59  ;;  %v9946_v58 = vld [vmem:[#allocation5 + $0xee4] ss:$16 sps:$4 sm:$0xff]   ;;  %v9949_v59 = vld [vmem:[#allocation5 + $0xeec] ss:$16 sps:$4 sm:$0xff]  }
 0x1fd   :  { %6577 = vmatpush1.bf16.msra.mxu0 %v9854_v60  ;;  %7233 = vmatpush1.bf16.msra.mxu1 %v9857_v61  ;;  %v9944_v60 = vld [vmem:[#allocation5 + $0xee0] ss:$16 sps:$4 sm:$0xff]   ;;  %v9947_v61 = vld [vmem:[#allocation5 + $0xee8] ss:$16 sps:$4 sm:$0xff]  }
 0x1fe   :  { %6578 = vmatprep.subr.bf16.mxu0 %v9862_v62  ;;  %7234 = vmatprep.subr.bf16.mxu1 %v9865_v63  ;;  %v9952_v62 = vld [vmem:[#allocation5 + $0xf04] ss:$16 sps:$4 sm:$0xff]   ;;  %v9955_v63 = vld [vmem:[#allocation5 + $0xf0c] ss:$16 sps:$4 sm:$0xff]  }
 0x201   :  { %6579 = vmatpush1.bf16.msra.mxu0 %v9860_v0  ;;  %7235 = vmatpush1.bf16.msra.mxu1 %v9863_v1  ;;  %v9950_v0 = vld [vmem:[#allocation5 + $0xf00] ss:$16 sps:$4 sm:$0xff]   ;;  %v9953_v1 = vld [vmem:[#allocation5 + $0xf08] ss:$16 sps:$4 sm:$0xff]  }
 0x202   :  { %6580 = vmatprep.subr.bf16.mxu0 %v9868_v2  ;;  %7236 = vmatprep.subr.bf16.mxu1 %v9871_v3  ;;  %v9958_v2 = vld [vmem:[#allocation5 + $0xf24] ss:$16 sps:$4 sm:$0xff]   ;;  %v9961_v3 = vld [vmem:[#allocation5 + $0xf2c] ss:$16 sps:$4 sm:$0xff]  }
 0x205   :  { %6581 = vmatpush1.bf16.msra.mxu0 %v9866_v4  ;;  %7237 = vmatpush1.bf16.msra.mxu1 %v9869_v5  ;;  %v9956_v4 = vld [vmem:[#allocation5 + $0xf20] ss:$16 sps:$4 sm:$0xff]   ;;  %v9959_v5 = vld [vmem:[#allocation5 + $0xf28] ss:$16 sps:$4 sm:$0xff]  }
 0x206   :  { %6582 = vmatprep.subr.bf16.mxu0 %v9874_v6  ;;  %7238 = vmatprep.subr.bf16.mxu1 %v9877_v7  ;;  %v9964_v6 = vld [vmem:[#allocation5 + $0xf44] ss:$16 sps:$4 sm:$0xff]   ;;  %v9967_v7 = vld [vmem:[#allocation5 + $0xf4c] ss:$16 sps:$4 sm:$0xff]  }
 0x209   :  { %6583 = vmatpush1.bf16.msra.mxu0 %v9872_v8  ;;  %7239 = vmatpush1.bf16.msra.mxu1 %v9875_v9  ;;  %v9962_v8 = vld [vmem:[#allocation5 + $0xf40] ss:$16 sps:$4 sm:$0xff]   ;;  %v9965_v9 = vld [vmem:[#allocation5 + $0xf48] ss:$16 sps:$4 sm:$0xff]  }
 0x20a   :  { %6584 = vmatprep.subr.bf16.mxu0 %v9880_v10  ;;  %7240 = vmatprep.subr.bf16.mxu1 %v9883_v11  ;;  %v9970_v10 = vld [vmem:[#allocation5 + $0xf64] ss:$16 sps:$4 sm:$0xff]   ;;  %v9973_v11 = vld [vmem:[#allocation5 + $0xf6c] ss:$16 sps:$4 sm:$0xff]  }
 0x20d   :  { %6585 = vmatpush1.bf16.msra.mxu0 %v9878_v12  ;;  %7241 = vmatpush1.bf16.msra.mxu1 %v9881_v13  ;;  %v9968_v12 = vld [vmem:[#allocation5 + $0xf60] ss:$16 sps:$4 sm:$0xff]   ;;  %v9971_v13 = vld [vmem:[#allocation5 + $0xf68] ss:$16 sps:$4 sm:$0xff]  }
 0x20e   :  { %6586 = vmatprep.subr.bf16.mxu0 %v9886_v14  ;;  %7242 = vmatprep.subr.bf16.mxu1 %v9889_v15  ;;  %v9976_v14 = vld [vmem:[#allocation5 + $0xf84] ss:$16 sps:$4 sm:$0xff]   ;;  %v9979_v15 = vld [vmem:[#allocation5 + $0xf8c] ss:$16 sps:$4 sm:$0xff]  }
 0x211   :  { %6587 = vmatpush1.bf16.msra.mxu0 %v9884_v16  ;;  %7243 = vmatpush1.bf16.msra.mxu1 %v9887_v17  ;;  %v9974_v16 = vld [vmem:[#allocation5 + $0xf80] ss:$16 sps:$4 sm:$0xff]   ;;  %v9977_v17 = vld [vmem:[#allocation5 + $0xf88] ss:$16 sps:$4 sm:$0xff]  }
 0x212   :  { %6588 = vmatprep.subr.bf16.mxu0 %v9892_v18  ;;  %7244 = vmatprep.subr.bf16.mxu1 %v9895_v19  ;;  %v9982_v18 = vld [vmem:[#allocation5 + $0xfa4] ss:$16 sps:$4 sm:$0xff]   ;;  %v9985_v19 = vld [vmem:[#allocation5 + $0xfac] ss:$16 sps:$4 sm:$0xff]  }
 0x215   :  { %6589 = vmatpush1.bf16.msra.mxu0 %v9890_v20  ;;  %7245 = vmatpush1.bf16.msra.mxu1 %v9893_v21  ;;  %v9980_v20 = vld [vmem:[#allocation5 + $0xfa0] ss:$16 sps:$4 sm:$0xff]   ;;  %v9983_v21 = vld [vmem:[#allocation5 + $0xfa8] ss:$16 sps:$4 sm:$0xff]  }
 0x216   :  { %6590 = vmatprep.subr.bf16.mxu0 %v9898_v22  ;;  %7246 = vmatprep.subr.bf16.mxu1 %v9901_v23  ;;  %v9988_v22 = vld [vmem:[#allocation5 + $0xfc4] ss:$16 sps:$4 sm:$0xff]   ;;  %v9991_v23 = vld [vmem:[#allocation5 + $0xfcc] ss:$16 sps:$4 sm:$0xff]  }
 0x219   :  { %6591 = vmatpush1.bf16.msra.mxu0 %v9896_v24  ;;  %7247 = vmatpush1.bf16.msra.mxu1 %v9899_v25  ;;  %v9986_v24 = vld [vmem:[#allocation5 + $0xfc0] ss:$16 sps:$4 sm:$0xff]   ;;  %v9989_v25 = vld [vmem:[#allocation5 + $0xfc8] ss:$16 sps:$4 sm:$0xff]  }
 0x21a   :  { %6601 = vmatprep.subr.bf16.mxu0 %v9904_v26  ;;  %7257 = vmatprep.subr.bf16.mxu1 %v9907_v28  ;;  %v9994_v26 = vld [vmem:[#allocation5 + $0xfe4] ss:$16 sps:$4 sm:$0xff]   ;;  %v9992_v28 = vld [vmem:[#allocation5 + $0xfe0] ss:$16 sps:$4 sm:$0xff]  }
 0x21c   :  { %6593 = vmatmul.mubr.bf16.vlgmr.msra.gmra.mrb[0].mxu0 %v128_v30  ;;  %7249 = vmatmul.mubr.bf16.vlgmr.msra.gmra.mrb[0].mxu1 %v128_v30  ;;  %v10000_v30 = vld [vmem:[#allocation5 + $0x1004] ss:$16 sps:$4 sm:$0xff]  }
 0x21d   :  { %6602 = vmatpush1.bf16.msra.mxu0 %v9902_v31  ;;  %7258 = vmatpush1.bf16.msra.mxu1 %v9905_v32  ;;  %v98_v31 = vld [vmem:[#allocation2 + $0x70] sm:$0xff]  ;;  %v10003_v32 = vld [vmem:[#allocation5 + $0x100c] ss:$16 sps:$4 sm:$0xff]  }
 0x21e   :  { %6603 = vmatprep.subr.bf16.mxu0 %v9910_v33  ;;  %7259 = vmatprep.subr.bf16.mxu1 %v9913_v34  ;;  %v101_v33 = vld [vmem:[#allocation2 + $0x88] sm:$0xff]  ;;  %v130_v34 = vpack.c.bf16 %v98_v31, %v98_v31 }
 0x21f   :  { %6633 = vmatprep.mubr.bf16.mxu0 %v131_v35  ;;  %7289 = vmatprep.mubr.bf16.mxu1 %v131_v35  ;;  %v9998_v35 = vld [vmem:[#allocation5 + $0x1000] ss:$16 sps:$4 sm:$0xff]   ;;  %v10093_v31 = vld [vmem:[#allocation5 + $0x11ec] ss:$16 sps:$4 sm:$0xff]  }
 0x221   :  { %6604 = vmatpush1.bf16.msra.mxu0 %v9908_v36  ;;  %7260 = vmatpush1.bf16.msra.mxu1 %v9911_v37  ;;  %v10001_v36 = vld [vmem:[#allocation5 + $0x1008] ss:$16 sps:$4 sm:$0xff]   ;;  %v10006_v37 = vld [vmem:[#allocation5 + $0x1024] ss:$16 sps:$4 sm:$0xff]  }
 0x222   :  { %6605 = vmatprep.subr.bf16.mxu0 %v9916_v38  ;;  %7261 = vmatprep.subr.bf16.mxu1 %v9919_v39  ;;  %v10009_v38 = vld [vmem:[#allocation5 + $0x102c] ss:$16 sps:$4 sm:$0xff]   ;;  %v133_v39 = vpack.c.bf16 %v101_v33, %v101_v33  ;;  %v10091_v33 = vld [vmem:[#allocation5 + $0x11e8] ss:$16 sps:$4 sm:$0xff]  }
 0x225   :  { %6606 = vmatpush1.bf16.msra.mxu0 %v9914_v40  ;;  %7262 = vmatpush1.bf16.msra.mxu1 %v9917_v41  ;;  %v10004_v40 = vld [vmem:[#allocation5 + $0x1020] ss:$16 sps:$4 sm:$0xff]   ;;  %v10007_v41 = vld [vmem:[#allocation5 + $0x1028] ss:$16 sps:$4 sm:$0xff]  }
 0x226   :  { %6607 = vmatprep.subr.bf16.mxu0 %v9922_v42  ;;  %7263 = vmatprep.subr.bf16.mxu1 %v9925_v43  ;;  %v10012_v42 = vld [vmem:[#allocation5 + $0x1044] ss:$16 sps:$4 sm:$0xff]   ;;  %v10015_v43 = vld [vmem:[#allocation5 + $0x104c] ss:$16 sps:$4 sm:$0xff]  }
 0x229   :  { %6608 = vmatpush1.bf16.msra.mxu0 %v9920_v44  ;;  %7264 = vmatpush1.bf16.msra.mxu1 %v9923_v45  ;;  %v10010_v44 = vld [vmem:[#allocation5 + $0x1040] ss:$16 sps:$4 sm:$0xff]   ;;  %v10013_v45 = vld [vmem:[#allocation5 + $0x1048] ss:$16 sps:$4 sm:$0xff]  }
 0x22a   :  { %6609 = vmatprep.subr.bf16.mxu0 %v9928_v46  ;;  %7265 = vmatprep.subr.bf16.mxu1 %v9931_v47  ;;  %v10018_v46 = vld [vmem:[#allocation5 + $0x1064] ss:$16 sps:$4 sm:$0xff]   ;;  %v10021_v47 = vld [vmem:[#allocation5 + $0x106c] ss:$16 sps:$4 sm:$0xff]  }
 0x22d   :  { %6610 = vmatpush1.bf16.msra.mxu0 %v9926_v48  ;;  %7266 = vmatpush1.bf16.msra.mxu1 %v9929_v49  ;;  %v10016_v48 = vld [vmem:[#allocation5 + $0x1060] ss:$16 sps:$4 sm:$0xff]   ;;  %v10019_v49 = vld [vmem:[#allocation5 + $0x1068] ss:$16 sps:$4 sm:$0xff]  }
 0x22e   :  { %6611 = vmatprep.subr.bf16.mxu0 %v9934_v50  ;;  %7267 = vmatprep.subr.bf16.mxu1 %v9937_v51  ;;  %v10024_v50 = vld [vmem:[#allocation5 + $0x1084] ss:$16 sps:$4 sm:$0xff]   ;;  %v10027_v51 = vld [vmem:[#allocation5 + $0x108c] ss:$16 sps:$4 sm:$0xff]  }
 0x231   :  { %6612 = vmatpush1.bf16.msra.mxu0 %v9932_v52  ;;  %7268 = vmatpush1.bf16.msra.mxu1 %v9935_v53  ;;  %v10022_v52 = vld [vmem:[#allocation5 + $0x1080] ss:$16 sps:$4 sm:$0xff]   ;;  %v10025_v53 = vld [vmem:[#allocation5 + $0x1088] ss:$16 sps:$4 sm:$0xff]  }
 0x232   :  { %6613 = vmatprep.subr.bf16.mxu0 %v9940_v54  ;;  %7269 = vmatprep.subr.bf16.mxu1 %v9943_v55  ;;  %v10030_v54 = vld [vmem:[#allocation5 + $0x10a4] ss:$16 sps:$4 sm:$0xff]   ;;  %v10033_v55 = vld [vmem:[#allocation5 + $0x10ac] ss:$16 sps:$4 sm:$0xff]  }
 0x235   :  { %6614 = vmatpush1.bf16.msra.mxu0 %v9938_v56  ;;  %7270 = vmatpush1.bf16.msra.mxu1 %v9941_v57  ;;  %v10028_v56 = vld [vmem:[#allocation5 + $0x10a0] ss:$16 sps:$4 sm:$0xff]   ;;  %v10031_v57 = vld [vmem:[#allocation5 + $0x10a8] ss:$16 sps:$4 sm:$0xff]  }
 0x236   :  { %6615 = vmatprep.subr.bf16.mxu0 %v9946_v58  ;;  %7271 = vmatprep.subr.bf16.mxu1 %v9949_v59  ;;  %v10036_v58 = vld [vmem:[#allocation5 + $0x10c4] ss:$16 sps:$4 sm:$0xff]   ;;  %v10039_v59 = vld [vmem:[#allocation5 + $0x10cc] ss:$16 sps:$4 sm:$0xff]  }
 0x239   :  { %6616 = vmatpush1.bf16.msra.mxu0 %v9944_v60  ;;  %7272 = vmatpush1.bf16.msra.mxu1 %v9947_v61  ;;  %v10034_v60 = vld [vmem:[#allocation5 + $0x10c0] ss:$16 sps:$4 sm:$0xff]   ;;  %v10037_v61 = vld [vmem:[#allocation5 + $0x10c8] ss:$16 sps:$4 sm:$0xff]  }
 0x23a   :  { %6617 = vmatprep.subr.bf16.mxu0 %v9952_v62  ;;  %7273 = vmatprep.subr.bf16.mxu1 %v9955_v63  ;;  %v10042_v62 = vld [vmem:[#allocation5 + $0x10e4] ss:$16 sps:$4 sm:$0xff]   ;;  %v10045_v63 = vld [vmem:[#allocation5 + $0x10ec] ss:$16 sps:$4 sm:$0xff]  }
 0x23d   :  { %6618 = vmatpush1.bf16.msra.mxu0 %v9950_v0  ;;  %7274 = vmatpush1.bf16.msra.mxu1 %v9953_v1  ;;  %v10040_v0 = vld [vmem:[#allocation5 + $0x10e0] ss:$16 sps:$4 sm:$0xff]   ;;  %v10043_v1 = vld [vmem:[#allocation5 + $0x10e8] ss:$16 sps:$4 sm:$0xff]  }
 0x23e   :  { %6619 = vmatprep.subr.bf16.mxu0 %v9958_v2  ;;  %7275 = vmatprep.subr.bf16.mxu1 %v9961_v3  ;;  %v10048_v2 = vld [vmem:[#allocation5 + $0x1104] ss:$16 sps:$4 sm:$0xff]   ;;  %v10051_v3 = vld [vmem:[#allocation5 + $0x110c] ss:$16 sps:$4 sm:$0xff]  }
 0x241   :  { %6620 = vmatpush1.bf16.msra.mxu0 %v9956_v4  ;;  %7276 = vmatpush1.bf16.msra.mxu1 %v9959_v5  ;;  %v10046_v4 = vld [vmem:[#allocation5 + $0x1100] ss:$16 sps:$4 sm:$0xff]   ;;  %v10049_v5 = vld [vmem:[#allocation5 + $0x1108] ss:$16 sps:$4 sm:$0xff]  }
 0x242   :  { %6621 = vmatprep.subr.bf16.mxu0 %v9964_v6  ;;  %7277 = vmatprep.subr.bf16.mxu1 %v9967_v7  ;;  %v10054_v6 = vld [vmem:[#allocation5 + $0x1124] ss:$16 sps:$4 sm:$0xff]   ;;  %v10057_v7 = vld [vmem:[#allocation5 + $0x112c] ss:$16 sps:$4 sm:$0xff]  }
 0x245   :  { %6622 = vmatpush1.bf16.msra.mxu0 %v9962_v8  ;;  %7278 = vmatpush1.bf16.msra.mxu1 %v9965_v9  ;;  %v10052_v8 = vld [vmem:[#allocation5 + $0x1120] ss:$16 sps:$4 sm:$0xff]   ;;  %v10055_v9 = vld [vmem:[#allocation5 + $0x1128] ss:$16 sps:$4 sm:$0xff]  }
 0x246   :  { %6623 = vmatprep.subr.bf16.mxu0 %v9970_v10  ;;  %7279 = vmatprep.subr.bf16.mxu1 %v9973_v11  ;;  %v10060_v10 = vld [vmem:[#allocation5 + $0x1144] ss:$16 sps:$4 sm:$0xff]   ;;  %v10063_v11 = vld [vmem:[#allocation5 + $0x114c] ss:$16 sps:$4 sm:$0xff]  }
 0x249   :  { %6624 = vmatpush1.bf16.msra.mxu0 %v9968_v12  ;;  %7280 = vmatpush1.bf16.msra.mxu1 %v9971_v13  ;;  %v10058_v12 = vld [vmem:[#allocation5 + $0x1140] ss:$16 sps:$4 sm:$0xff]   ;;  %v10061_v13 = vld [vmem:[#allocation5 + $0x1148] ss:$16 sps:$4 sm:$0xff]  }
 0x24a   :  { %6625 = vmatprep.subr.bf16.mxu0 %v9976_v14  ;;  %7281 = vmatprep.subr.bf16.mxu1 %v9979_v15  ;;  %v10066_v14 = vld [vmem:[#allocation5 + $0x1164] ss:$16 sps:$4 sm:$0xff]   ;;  %v10069_v15 = vld [vmem:[#allocation5 + $0x116c] ss:$16 sps:$4 sm:$0xff]  }
 0x24d   :  { %6626 = vmatpush1.bf16.msra.mxu0 %v9974_v16  ;;  %7282 = vmatpush1.bf16.msra.mxu1 %v9977_v17  ;;  %v10064_v16 = vld [vmem:[#allocation5 + $0x1160] ss:$16 sps:$4 sm:$0xff]   ;;  %v10067_v17 = vld [vmem:[#allocation5 + $0x1168] ss:$16 sps:$4 sm:$0xff]  }
 0x24e   :  { %6627 = vmatprep.subr.bf16.mxu0 %v9982_v18  ;;  %7283 = vmatprep.subr.bf16.mxu1 %v9985_v19  ;;  %v10072_v18 = vld [vmem:[#allocation5 + $0x1184] ss:$16 sps:$4 sm:$0xff]   ;;  %v10075_v19 = vld [vmem:[#allocation5 + $0x118c] ss:$16 sps:$4 sm:$0xff]  }
 0x251   :  { %6628 = vmatpush1.bf16.msra.mxu0 %v9980_v20  ;;  %7284 = vmatpush1.bf16.msra.mxu1 %v9983_v21  ;;  %v10070_v20 = vld [vmem:[#allocation5 + $0x1180] ss:$16 sps:$4 sm:$0xff]   ;;  %v10073_v21 = vld [vmem:[#allocation5 + $0x1188] ss:$16 sps:$4 sm:$0xff]  }
 0x252   :  { %6629 = vmatprep.subr.bf16.mxu0 %v9988_v22  ;;  %7285 = vmatprep.subr.bf16.mxu1 %v9991_v23  ;;  %v10078_v22 = vld [vmem:[#allocation5 + $0x11a4] ss:$16 sps:$4 sm:$0xff]   ;;  %v10081_v23 = vld [vmem:[#allocation5 + $0x11ac] ss:$16 sps:$4 sm:$0xff]  }
 0x255   :  { %6630 = vmatpush1.bf16.msra.mxu0 %v9986_v24  ;;  %7286 = vmatpush1.bf16.msra.mxu1 %v9989_v25  ;;  %v10076_v24 = vld [vmem:[#allocation5 + $0x11a0] ss:$16 sps:$4 sm:$0xff]   ;;  %v10079_v25 = vld [vmem:[#allocation5 + $0x11a8] ss:$16 sps:$4 sm:$0xff]  }
 0x256   :  { %6631 = vmatprep.subr.bf16.mxu0 %v9994_v26  ;;  %7287 = vmatprep.subr.bf16.mxu1 %v9997_v27  ;;  %v10084_v26 = vld [vmem:[#allocation5 + $0x11c4] ss:$16 sps:$4 sm:$0xff]   ;;  %v10087_v27 = vld [vmem:[#allocation5 + $0x11cc] ss:$16 sps:$4 sm:$0xff]  }
 0x259   :  { %6632 = vmatpush1.bf16.msra.mxu0 %v9992_v28  ;;  %7288 = vmatpush1.bf16.msra.mxu1 %v9995_v29  ;;  %v10082_v28 = vld [vmem:[#allocation5 + $0x11c0] ss:$16 sps:$4 sm:$0xff]   ;;  %v10085_v29 = vld [vmem:[#allocation5 + $0x11c8] ss:$16 sps:$4 sm:$0xff]  }
 0x25a   :  { %6642 = vmatprep.subr.bf16.mxu0 %v10000_v30  ;;  %7298 = vmatprep.subr.bf16.mxu1 %v10003_v32  ;;  %v10090_v30 = vld [vmem:[#allocation5 + $0x11e4] ss:$16 sps:$4 sm:$0xff]   ;;  %v10088_v32 = vld [vmem:[#allocation5 + $0x11e0] ss:$16 sps:$4 sm:$0xff]  }
 0x25c   :  { %6634 = vmatmul.mubr.bf16.vlgmr.msra.gmra.mrb[0].mxu0 %v130_v34  ;;  %7290 = vmatmul.mubr.bf16.vlgmr.msra.gmra.mrb[0].mxu1 %v130_v34  ;;  %v10096_v34 = vld [vmem:[#allocation5 + $0x1204] ss:$16 sps:$4 sm:$0xff]  }
 0x25d   :  { %6643 = vmatpush1.bf16.msra.mxu0 %v9998_v35  ;;  %7299 = vmatpush1.bf16.msra.mxu1 %v10001_v36  ;;  %v100_v35 = vld [vmem:[#allocation2 + $0x80] sm:$0xff]  ;;  %v10099_v36 = vld [vmem:[#allocation5 + $0x120c] ss:$16 sps:$4 sm:$0xff]  }
 0x25e   :  { %6644 = vmatprep.subr.bf16.mxu0 %v10006_v37  ;;  %7300 = vmatprep.subr.bf16.mxu1 %v10009_v38  ;;  %v103_v37 = vld [vmem:[#allocation2 + $0x98] sm:$0xff]  ;;  %v132_v38 = vpack.c.bf16 %v100_v35, %v100_v35 }
 0x25f   :  { %6674 = vmatprep.mubr.bf16.mxu0 %v133_v39  ;;  %7330 = vmatprep.mubr.bf16.mxu1 %v133_v39  ;;  %v10094_v39 = vld [vmem:[#allocation5 + $0x1200] ss:$16 sps:$4 sm:$0xff]   ;;  %v10189_v35 = vld [vmem:[#allocation5 + $0x13ec] ss:$16 sps:$4 sm:$0xff]  }
 0x261   :  { %6645 = vmatpush1.bf16.msra.mxu0 %v10004_v40  ;;  %7301 = vmatpush1.bf16.msra.mxu1 %v10007_v41  ;;  %v10097_v40 = vld [vmem:[#allocation5 + $0x1208] ss:$16 sps:$4 sm:$0xff]   ;;  %v10102_v41 = vld [vmem:[#allocation5 + $0x1224] ss:$16 sps:$4 sm:$0xff]  }
 0x262   :  { %6646 = vmatprep.subr.bf16.mxu0 %v10012_v42  ;;  %7302 = vmatprep.subr.bf16.mxu1 %v10015_v43  ;;  %v10105_v42 = vld [vmem:[#allocation5 + $0x122c] ss:$16 sps:$4 sm:$0xff]   ;;  %v135_v43 = vpack.c.bf16 %v103_v37, %v103_v37  ;;  %v10187_v37 = vld [vmem:[#allocation5 + $0x13e8] ss:$16 sps:$4 sm:$0xff]  }
 0x265   :  { %6647 = vmatpush1.bf16.msra.mxu0 %v10010_v44  ;;  %7303 = vmatpush1.bf16.msra.mxu1 %v10013_v45  ;;  %v10100_v44 = vld [vmem:[#allocation5 + $0x1220] ss:$16 sps:$4 sm:$0xff]   ;;  %v10103_v45 = vld [vmem:[#allocation5 + $0x1228] ss:$16 sps:$4 sm:$0xff]  }
 0x266   :  { %6648 = vmatprep.subr.bf16.mxu0 %v10018_v46  ;;  %7304 = vmatprep.subr.bf16.mxu1 %v10021_v47  ;;  %v10108_v46 = vld [vmem:[#allocation5 + $0x1244] ss:$16 sps:$4 sm:$0xff]   ;;  %v10111_v47 = vld [vmem:[#allocation5 + $0x124c] ss:$16 sps:$4 sm:$0xff]  }
 0x269   :  { %6649 = vmatpush1.bf16.msra.mxu0 %v10016_v48  ;;  %7305 = vmatpush1.bf16.msra.mxu1 %v10019_v49  ;;  %v10106_v48 = vld [vmem:[#allocation5 + $0x1240] ss:$16 sps:$4 sm:$0xff]   ;;  %v10109_v49 = vld [vmem:[#allocation5 + $0x1248] ss:$16 sps:$4 sm:$0xff]  }
 0x26a   :  { %6650 = vmatprep.subr.bf16.mxu0 %v10024_v50  ;;  %7306 = vmatprep.subr.bf16.mxu1 %v10027_v51  ;;  %v10114_v50 = vld [vmem:[#allocation5 + $0x1264] ss:$16 sps:$4 sm:$0xff]   ;;  %v10117_v51 = vld [vmem:[#allocation5 + $0x126c] ss:$16 sps:$4 sm:$0xff]  }
 0x26d   :  { %6651 = vmatpush1.bf16.msra.mxu0 %v10022_v52  ;;  %7307 = vmatpush1.bf16.msra.mxu1 %v10025_v53  ;;  %v10112_v52 = vld [vmem:[#allocation5 + $0x1260] ss:$16 sps:$4 sm:$0xff]   ;;  %v10115_v53 = vld [vmem:[#allocation5 + $0x1268] ss:$16 sps:$4 sm:$0xff]  }
 0x26e   :  { %6652 = vmatprep.subr.bf16.mxu0 %v10030_v54  ;;  %7308 = vmatprep.subr.bf16.mxu1 %v10033_v55  ;;  %v10120_v54 = vld [vmem:[#allocation5 + $0x1284] ss:$16 sps:$4 sm:$0xff]   ;;  %v10123_v55 = vld [vmem:[#allocation5 + $0x128c] ss:$16 sps:$4 sm:$0xff]  }
 0x271   :  { %6653 = vmatpush1.bf16.msra.mxu0 %v10028_v56  ;;  %7309 = vmatpush1.bf16.msra.mxu1 %v10031_v57  ;;  %v10118_v56 = vld [vmem:[#allocation5 + $0x1280] ss:$16 sps:$4 sm:$0xff]   ;;  %v10121_v57 = vld [vmem:[#allocation5 + $0x1288] ss:$16 sps:$4 sm:$0xff]  }
 0x272   :  { %6654 = vmatprep.subr.bf16.mxu0 %v10036_v58  ;;  %7310 = vmatprep.subr.bf16.mxu1 %v10039_v59  ;;  %v10126_v58 = vld [vmem:[#allocation5 + $0x12a4] ss:$16 sps:$4 sm:$0xff]   ;;  %v10129_v59 = vld [vmem:[#allocation5 + $0x12ac] ss:$16 sps:$4 sm:$0xff]  }
 0x275   :  { %6655 = vmatpush1.bf16.msra.mxu0 %v10034_v60  ;;  %7311 = vmatpush1.bf16.msra.mxu1 %v10037_v61  ;;  %v10124_v60 = vld [vmem:[#allocation5 + $0x12a0] ss:$16 sps:$4 sm:$0xff]   ;;  %v10127_v61 = vld [vmem:[#allocation5 + $0x12a8] ss:$16 sps:$4 sm:$0xff]  }
 0x276   :  { %6656 = vmatprep.subr.bf16.mxu0 %v10042_v62  ;;  %7312 = vmatprep.subr.bf16.mxu1 %v10045_v63  ;;  %v10132_v62 = vld [vmem:[#allocation5 + $0x12c4] ss:$16 sps:$4 sm:$0xff]   ;;  %v10135_v63 = vld [vmem:[#allocation5 + $0x12cc] ss:$16 sps:$4 sm:$0xff]  }
 0x279   :  { %6657 = vmatpush1.bf16.msra.mxu0 %v10040_v0  ;;  %7313 = vmatpush1.bf16.msra.mxu1 %v10043_v1  ;;  %v10130_v0 = vld [vmem:[#allocation5 + $0x12c0] ss:$16 sps:$4 sm:$0xff]   ;;  %v10133_v1 = vld [vmem:[#allocation5 + $0x12c8] ss:$16 sps:$4 sm:$0xff]  }
 0x27a   :  { %6658 = vmatprep.subr.bf16.mxu0 %v10048_v2  ;;  %7314 = vmatprep.subr.bf16.mxu1 %v10051_v3  ;;  %v10138_v2 = vld [vmem:[#allocation5 + $0x12e4] ss:$16 sps:$4 sm:$0xff]   ;;  %v10141_v3 = vld [vmem:[#allocation5 + $0x12ec] ss:$16 sps:$4 sm:$0xff]  }
 0x27d   :  { %6659 = vmatpush1.bf16.msra.mxu0 %v10046_v4  ;;  %7315 = vmatpush1.bf16.msra.mxu1 %v10049_v5  ;;  %v10136_v4 = vld [vmem:[#allocation5 + $0x12e0] ss:$16 sps:$4 sm:$0xff]   ;;  %v10139_v5 = vld [vmem:[#allocation5 + $0x12e8] ss:$16 sps:$4 sm:$0xff]  }
 0x27e   :  { %6660 = vmatprep.subr.bf16.mxu0 %v10054_v6  ;;  %7316 = vmatprep.subr.bf16.mxu1 %v10057_v7  ;;  %v10144_v6 = vld [vmem:[#allocation5 + $0x1304] ss:$16 sps:$4 sm:$0xff]   ;;  %v10147_v7 = vld [vmem:[#allocation5 + $0x130c] ss:$16 sps:$4 sm:$0xff]  }
 0x281   :  { %6661 = vmatpush1.bf16.msra.mxu0 %v10052_v8  ;;  %7317 = vmatpush1.bf16.msra.mxu1 %v10055_v9  ;;  %v10142_v8 = vld [vmem:[#allocation5 + $0x1300] ss:$16 sps:$4 sm:$0xff]   ;;  %v10145_v9 = vld [vmem:[#allocation5 + $0x1308] ss:$16 sps:$4 sm:$0xff]  }
 0x282   :  { %6662 = vmatprep.subr.bf16.mxu0 %v10060_v10  ;;  %7318 = vmatprep.subr.bf16.mxu1 %v10063_v11  ;;  %v10150_v10 = vld [vmem:[#allocation5 + $0x1324] ss:$16 sps:$4 sm:$0xff]   ;;  %v10153_v11 = vld [vmem:[#allocation5 + $0x132c] ss:$16 sps:$4 sm:$0xff]  }
 0x285   :  { %6663 = vmatpush1.bf16.msra.mxu0 %v10058_v12  ;;  %7319 = vmatpush1.bf16.msra.mxu1 %v10061_v13  ;;  %v10148_v12 = vld [vmem:[#allocation5 + $0x1320] ss:$16 sps:$4 sm:$0xff]   ;;  %v10151_v13 = vld [vmem:[#allocation5 + $0x1328] ss:$16 sps:$4 sm:$0xff]  }
 0x286   :  { %6664 = vmatprep.subr.bf16.mxu0 %v10066_v14  ;;  %7320 = vmatprep.subr.bf16.mxu1 %v10069_v15  ;;  %v10156_v14 = vld [vmem:[#allocation5 + $0x1344] ss:$16 sps:$4 sm:$0xff]   ;;  %v10159_v15 = vld [vmem:[#allocation5 + $0x134c] ss:$16 sps:$4 sm:$0xff]  }
 0x289   :  { %6665 = vmatpush1.bf16.msra.mxu0 %v10064_v16  ;;  %7321 = vmatpush1.bf16.msra.mxu1 %v10067_v17  ;;  %v10154_v16 = vld [vmem:[#allocation5 + $0x1340] ss:$16 sps:$4 sm:$0xff]   ;;  %v10157_v17 = vld [vmem:[#allocation5 + $0x1348] ss:$16 sps:$4 sm:$0xff]  }
 0x28a   :  { %6666 = vmatprep.subr.bf16.mxu0 %v10072_v18  ;;  %7322 = vmatprep.subr.bf16.mxu1 %v10075_v19  ;;  %v10162_v18 = vld [vmem:[#allocation5 + $0x1364] ss:$16 sps:$4 sm:$0xff]   ;;  %v10165_v19 = vld [vmem:[#allocation5 + $0x136c] ss:$16 sps:$4 sm:$0xff]  }
 0x28d   :  { %6667 = vmatpush1.bf16.msra.mxu0 %v10070_v20  ;;  %7323 = vmatpush1.bf16.msra.mxu1 %v10073_v21  ;;  %v10160_v20 = vld [vmem:[#allocation5 + $0x1360] ss:$16 sps:$4 sm:$0xff]   ;;  %v10163_v21 = vld [vmem:[#allocation5 + $0x1368] ss:$16 sps:$4 sm:$0xff]  }
 0x28e   :  { %6668 = vmatprep.subr.bf16.mxu0 %v10078_v22  ;;  %7324 = vmatprep.subr.bf16.mxu1 %v10081_v23  ;;  %v10168_v22 = vld [vmem:[#allocation5 + $0x1384] ss:$16 sps:$4 sm:$0xff]   ;;  %v10171_v23 = vld [vmem:[#allocation5 + $0x138c] ss:$16 sps:$4 sm:$0xff]  }
 0x291   :  { %6669 = vmatpush1.bf16.msra.mxu0 %v10076_v24  ;;  %7325 = vmatpush1.bf16.msra.mxu1 %v10079_v25  ;;  %v10166_v24 = vld [vmem:[#allocation5 + $0x1380] ss:$16 sps:$4 sm:$0xff]   ;;  %v10169_v25 = vld [vmem:[#allocation5 + $0x1388] ss:$16 sps:$4 sm:$0xff]  }
 0x292   :  { %6670 = vmatprep.subr.bf16.mxu0 %v10084_v26  ;;  %7326 = vmatprep.subr.bf16.mxu1 %v10087_v27  ;;  %v10174_v26 = vld [vmem:[#allocation5 + $0x13a4] ss:$16 sps:$4 sm:$0xff]   ;;  %v10177_v27 = vld [vmem:[#allocation5 + $0x13ac] ss:$16 sps:$4 sm:$0xff]  }
 0x295   :  { %6671 = vmatpush1.bf16.msra.mxu0 %v10082_v28  ;;  %7327 = vmatpush1.bf16.msra.mxu1 %v10085_v29  ;;  %v10172_v28 = vld [vmem:[#allocation5 + $0x13a0] ss:$16 sps:$4 sm:$0xff]   ;;  %v10175_v29 = vld [vmem:[#allocation5 + $0x13a8] ss:$16 sps:$4 sm:$0xff]  }
 0x296   :  { %6672 = vmatprep.subr.bf16.mxu0 %v10090_v30  ;;  %7328 = vmatprep.subr.bf16.mxu1 %v10093_v31  ;;  %v10180_v30 = vld [vmem:[#allocation5 + $0x13c4] ss:$16 sps:$4 sm:$0xff]   ;;  %v10183_v31 = vld [vmem:[#allocation5 + $0x13cc] ss:$16 sps:$4 sm:$0xff]  }
 0x299   :  { %6673 = vmatpush1.bf16.msra.mxu0 %v10088_v32  ;;  %7329 = vmatpush1.bf16.msra.mxu1 %v10091_v33  ;;  %v10178_v32 = vld [vmem:[#allocation5 + $0x13c0] ss:$16 sps:$4 sm:$0xff]   ;;  %v10181_v33 = vld [vmem:[#allocation5 + $0x13c8] ss:$16 sps:$4 sm:$0xff]  }
 0x29a   :  { %6683 = vmatprep.subr.bf16.mxu0 %v10096_v34  ;;  %7339 = vmatprep.subr.bf16.mxu1 %v10099_v36  ;;  %v10186_v34 = vld [vmem:[#allocation5 + $0x13e4] ss:$16 sps:$4 sm:$0xff]   ;;  %v10184_v36 = vld [vmem:[#allocation5 + $0x13e0] ss:$16 sps:$4 sm:$0xff]  }
 0x29c   :  { %6675 = vmatmul.mubr.bf16.vlgmr.msra.gmra.mrb[0].mxu0 %v132_v38  ;;  %7331 = vmatmul.mubr.bf16.vlgmr.msra.gmra.mrb[0].mxu1 %v132_v38  ;;  %v102_v38 = vld [vmem:[#allocation2 + $0x90] sm:$0xff] }
 0x29d   :  { %6684 = vmatpush1.bf16.msra.mxu0 %v10094_v39  ;;  %7340 = vmatpush1.bf16.msra.mxu1 %v10097_v40  ;;  %v10192_v39 = vld [vmem:[#allocation5 + $0x1404] ss:$16 sps:$4 sm:$0xff]   ;;  %v10195_v40 = vld [vmem:[#allocation5 + $0x140c] ss:$16 sps:$4 sm:$0xff]  }
 0x29e   :  { %6685 = vmatprep.subr.bf16.mxu0 %v10102_v41  ;;  %7341 = vmatprep.subr.bf16.mxu1 %v10105_v42  ;;  %v134_v41 = vpack.c.bf16 %v102_v38, %v102_v38  ;;  %v105_v42 = vld [vmem:[#allocation2 + $0xa8] sm:$0xff]  ;;  %v10282_v38 = vld [vmem:[#allocation5 + $0x15e4] ss:$16 sps:$4 sm:$0xff]  }
 0x29f   :  { %6715 = vmatprep.mubr.bf16.mxu0 %v135_v43  ;;  %7371 = vmatprep.mubr.bf16.mxu1 %v135_v43  ;;  %v10190_v43 = vld [vmem:[#allocation5 + $0x1400] ss:$16 sps:$4 sm:$0xff]  }
 0x2a1   :  { %6686 = vmatpush1.bf16.msra.mxu0 %v10100_v44  ;;  %7342 = vmatpush1.bf16.msra.mxu1 %v10103_v45  ;;  %v10193_v44 = vld [vmem:[#allocation5 + $0x1408] ss:$16 sps:$4 sm:$0xff]   ;;  %v10198_v45 = vld [vmem:[#allocation5 + $0x1424] ss:$16 sps:$4 sm:$0xff]  }
 0x2a2   :  { %6687 = vmatprep.subr.bf16.mxu0 %v10108_v46  ;;  %7343 = vmatprep.subr.bf16.mxu1 %v10111_v47  ;;  %v10201_v46 = vld [vmem:[#allocation5 + $0x142c] ss:$16 sps:$4 sm:$0xff]   ;;  %v137_v47 = vpack.c.bf16 %v105_v42, %v105_v42  ;;  %v104_v42 = vld [vmem:[#allocation2 + $0xa0] sm:$0xff] }
 0x2a5   :  { %6688 = vmatpush1.bf16.msra.mxu0 %v10106_v48  ;;  %7344 = vmatpush1.bf16.msra.mxu1 %v10109_v49  ;;  %v10196_v48 = vld [vmem:[#allocation5 + $0x1420] ss:$16 sps:$4 sm:$0xff]   ;;  %v10199_v49 = vld [vmem:[#allocation5 + $0x1428] ss:$16 sps:$4 sm:$0xff]  }
 0x2a6   :  { %6689 = vmatprep.subr.bf16.mxu0 %v10114_v50  ;;  %7345 = vmatprep.subr.bf16.mxu1 %v10117_v51  ;;  %v10204_v50 = vld [vmem:[#allocation5 + $0x1444] ss:$16 sps:$4 sm:$0xff]   ;;  %v10207_v51 = vld [vmem:[#allocation5 + $0x144c] ss:$16 sps:$4 sm:$0xff]  }
 0x2a9   :  { %6690 = vmatpush1.bf16.msra.mxu0 %v10112_v52  ;;  %7346 = vmatpush1.bf16.msra.mxu1 %v10115_v53  ;;  %v10202_v52 = vld [vmem:[#allocation5 + $0x1440] ss:$16 sps:$4 sm:$0xff]   ;;  %v10205_v53 = vld [vmem:[#allocation5 + $0x1448] ss:$16 sps:$4 sm:$0xff]  }
 0x2aa   :  { %6691 = vmatprep.subr.bf16.mxu0 %v10120_v54  ;;  %7347 = vmatprep.subr.bf16.mxu1 %v10123_v55  ;;  %v10210_v54 = vld [vmem:[#allocation5 + $0x1464] ss:$16 sps:$4 sm:$0xff]   ;;  %v10213_v55 = vld [vmem:[#allocation5 + $0x146c] ss:$16 sps:$4 sm:$0xff]  }
 0x2ad   :  { %6692 = vmatpush1.bf16.msra.mxu0 %v10118_v56  ;;  %7348 = vmatpush1.bf16.msra.mxu1 %v10121_v57  ;;  %v10208_v56 = vld [vmem:[#allocation5 + $0x1460] ss:$16 sps:$4 sm:$0xff]   ;;  %v10211_v57 = vld [vmem:[#allocation5 + $0x1468] ss:$16 sps:$4 sm:$0xff]  }
 0x2ae   :  { %6693 = vmatprep.subr.bf16.mxu0 %v10126_v58  ;;  %7349 = vmatprep.subr.bf16.mxu1 %v10129_v59  ;;  %v10216_v58 = vld [vmem:[#allocation5 + $0x1484] ss:$16 sps:$4 sm:$0xff]   ;;  %v10219_v59 = vld [vmem:[#allocation5 + $0x148c] ss:$16 sps:$4 sm:$0xff]  }
 0x2b1   :  { %6694 = vmatpush1.bf16.msra.mxu0 %v10124_v60  ;;  %7350 = vmatpush1.bf16.msra.mxu1 %v10127_v61  ;;  %v10214_v60 = vld [vmem:[#allocation5 + $0x1480] ss:$16 sps:$4 sm:$0xff]   ;;  %v10217_v61 = vld [vmem:[#allocation5 + $0x1488] ss:$16 sps:$4 sm:$0xff]  }
 0x2b2   :  { %6695 = vmatprep.subr.bf16.mxu0 %v10132_v62  ;;  %7351 = vmatprep.subr.bf16.mxu1 %v10135_v63  ;;  %v10222_v62 = vld [vmem:[#allocation5 + $0x14a4] ss:$16 sps:$4 sm:$0xff]   ;;  %v10225_v63 = vld [vmem:[#allocation5 + $0x14ac] ss:$16 sps:$4 sm:$0xff]  }
 0x2b5   :  { %6696 = vmatpush1.bf16.msra.mxu0 %v10130_v0  ;;  %7352 = vmatpush1.bf16.msra.mxu1 %v10133_v1  ;;  %v10220_v0 = vld [vmem:[#allocation5 + $0x14a0] ss:$16 sps:$4 sm:$0xff]   ;;  %v10223_v1 = vld [vmem:[#allocation5 + $0x14a8] ss:$16 sps:$4 sm:$0xff]  }
 0x2b6   :  { %6697 = vmatprep.subr.bf16.mxu0 %v10138_v2  ;;  %7353 = vmatprep.subr.bf16.mxu1 %v10141_v3  ;;  %v10228_v2 = vld [vmem:[#allocation5 + $0x14c4] ss:$16 sps:$4 sm:$0xff]   ;;  %v10231_v3 = vld [vmem:[#allocation5 + $0x14cc] ss:$16 sps:$4 sm:$0xff]  }
 0x2b9   :  { %6698 = vmatpush1.bf16.msra.mxu0 %v10136_v4  ;;  %7354 = vmatpush1.bf16.msra.mxu1 %v10139_v5  ;;  %v10226_v4 = vld [vmem:[#allocation5 + $0x14c0] ss:$16 sps:$4 sm:$0xff]   ;;  %v10229_v5 = vld [vmem:[#allocation5 + $0x14c8] ss:$16 sps:$4 sm:$0xff]  }
 0x2ba   :  { %6699 = vmatprep.subr.bf16.mxu0 %v10144_v6  ;;  %7355 = vmatprep.subr.bf16.mxu1 %v10147_v7  ;;  %v10234_v6 = vld [vmem:[#allocation5 + $0x14e4] ss:$16 sps:$4 sm:$0xff]   ;;  %v10237_v7 = vld [vmem:[#allocation5 + $0x14ec] ss:$16 sps:$4 sm:$0xff]  }
 0x2bd   :  { %6700 = vmatpush1.bf16.msra.mxu0 %v10142_v8  ;;  %7356 = vmatpush1.bf16.msra.mxu1 %v10145_v9  ;;  %v10232_v8 = vld [vmem:[#allocation5 + $0x14e0] ss:$16 sps:$4 sm:$0xff]   ;;  %v10235_v9 = vld [vmem:[#allocation5 + $0x14e8] ss:$16 sps:$4 sm:$0xff]  }
 0x2be   :  { %6701 = vmatprep.subr.bf16.mxu0 %v10150_v10  ;;  %7357 = vmatprep.subr.bf16.mxu1 %v10153_v11  ;;  %v10240_v10 = vld [vmem:[#allocation5 + $0x1504] ss:$16 sps:$4 sm:$0xff]   ;;  %v10243_v11 = vld [vmem:[#allocation5 + $0x150c] ss:$16 sps:$4 sm:$0xff]  }
 0x2c1   :  { %6702 = vmatpush1.bf16.msra.mxu0 %v10148_v12  ;;  %7358 = vmatpush1.bf16.msra.mxu1 %v10151_v13  ;;  %v10238_v12 = vld [vmem:[#allocation5 + $0x1500] ss:$16 sps:$4 sm:$0xff]   ;;  %v10241_v13 = vld [vmem:[#allocation5 + $0x1508] ss:$16 sps:$4 sm:$0xff]  }
 0x2c2   :  { %6703 = vmatprep.subr.bf16.mxu0 %v10156_v14  ;;  %7359 = vmatprep.subr.bf16.mxu1 %v10159_v15  ;;  %v10246_v14 = vld [vmem:[#allocation5 + $0x1524] ss:$16 sps:$4 sm:$0xff]   ;;  %v10249_v15 = vld [vmem:[#allocation5 + $0x152c] ss:$16 sps:$4 sm:$0xff]  }
 0x2c5   :  { %6704 = vmatpush1.bf16.msra.mxu0 %v10154_v16  ;;  %7360 = vmatpush1.bf16.msra.mxu1 %v10157_v17  ;;  %v10244_v16 = vld [vmem:[#allocation5 + $0x1520] ss:$16 sps:$4 sm:$0xff]   ;;  %v10247_v17 = vld [vmem:[#allocation5 + $0x1528] ss:$16 sps:$4 sm:$0xff]  }
 0x2c6   :  { %6705 = vmatprep.subr.bf16.mxu0 %v10162_v18  ;;  %7361 = vmatprep.subr.bf16.mxu1 %v10165_v19  ;;  %v10252_v18 = vld [vmem:[#allocation5 + $0x1544] ss:$16 sps:$4 sm:$0xff]   ;;  %v10255_v19 = vld [vmem:[#allocation5 + $0x154c] ss:$16 sps:$4 sm:$0xff]  }
 0x2c9   :  { %6706 = vmatpush1.bf16.msra.mxu0 %v10160_v20  ;;  %7362 = vmatpush1.bf16.msra.mxu1 %v10163_v21  ;;  %v10250_v20 = vld [vmem:[#allocation5 + $0x1540] ss:$16 sps:$4 sm:$0xff]   ;;  %v10253_v21 = vld [vmem:[#allocation5 + $0x1548] ss:$16 sps:$4 sm:$0xff]  }
 0x2ca   :  { %6707 = vmatprep.subr.bf16.mxu0 %v10168_v22  ;;  %7363 = vmatprep.subr.bf16.mxu1 %v10171_v23  ;;  %v10258_v22 = vld [vmem:[#allocation5 + $0x1564] ss:$16 sps:$4 sm:$0xff]   ;;  %v10261_v23 = vld [vmem:[#allocation5 + $0x156c] ss:$16 sps:$4 sm:$0xff]  }
 0x2cd   :  { %6708 = vmatpush1.bf16.msra.mxu0 %v10166_v24  ;;  %7364 = vmatpush1.bf16.msra.mxu1 %v10169_v25  ;;  %v10256_v24 = vld [vmem:[#allocation5 + $0x1560] ss:$16 sps:$4 sm:$0xff]   ;;  %v10259_v25 = vld [vmem:[#allocation5 + $0x1568] ss:$16 sps:$4 sm:$0xff]  }
 0x2ce   :  { %6709 = vmatprep.subr.bf16.mxu0 %v10174_v26  ;;  %7365 = vmatprep.subr.bf16.mxu1 %v10177_v27  ;;  %v10264_v26 = vld [vmem:[#allocation5 + $0x1584] ss:$16 sps:$4 sm:$0xff]   ;;  %v10267_v27 = vld [vmem:[#allocation5 + $0x158c] ss:$16 sps:$4 sm:$0xff]  }
 0x2d1   :  { %6710 = vmatpush1.bf16.msra.mxu0 %v10172_v28  ;;  %7366 = vmatpush1.bf16.msra.mxu1 %v10175_v29  ;;  %v10262_v28 = vld [vmem:[#allocation5 + $0x1580] ss:$16 sps:$4 sm:$0xff]   ;;  %v10265_v29 = vld [vmem:[#allocation5 + $0x1588] ss:$16 sps:$4 sm:$0xff]  }
 0x2d2   :  { %6711 = vmatprep.subr.bf16.mxu0 %v10180_v30  ;;  %7367 = vmatprep.subr.bf16.mxu1 %v10183_v31  ;;  %v10270_v30 = vld [vmem:[#allocation5 + $0x15a4] ss:$16 sps:$4 sm:$0xff]   ;;  %v10273_v31 = vld [vmem:[#allocation5 + $0x15ac] ss:$16 sps:$4 sm:$0xff]  }
 0x2d5   :  { %6712 = vmatpush1.bf16.msra.mxu0 %v10178_v32  ;;  %7368 = vmatpush1.bf16.msra.mxu1 %v10181_v33  ;;  %v10268_v32 = vld [vmem:[#allocation5 + $0x15a0] ss:$16 sps:$4 sm:$0xff]   ;;  %v10271_v33 = vld [vmem:[#allocation5 + $0x15a8] ss:$16 sps:$4 sm:$0xff]  }
 0x2d6   :  { %6713 = vmatprep.subr.bf16.mxu0 %v10186_v34  ;;  %7369 = vmatprep.subr.bf16.mxu1 %v10189_v35  ;;  %v10276_v34 = vld [vmem:[#allocation5 + $0x15c4] ss:$16 sps:$4 sm:$0xff]   ;;  %v10279_v35 = vld [vmem:[#allocation5 + $0x15cc] ss:$16 sps:$4 sm:$0xff]  }
 0x2d9   :  { %6714 = vmatpush1.bf16.msra.mxu0 %v10184_v36  ;;  %7370 = vmatpush1.bf16.msra.mxu1 %v10187_v37  ;;  %v10274_v36 = vld [vmem:[#allocation5 + $0x15c0] ss:$16 sps:$4 sm:$0xff]   ;;  %v10277_v37 = vld [vmem:[#allocation5 + $0x15c8] ss:$16 sps:$4 sm:$0xff]  }
 0x2da   :  { %6724 = vmatprep.subr.bf16.mxu0 %v10192_v39  ;;  %7380 = vmatprep.subr.bf16.mxu1 %v10195_v40  ;;  %v10285_v39 = vld [vmem:[#allocation5 + $0x15ec] ss:$16 sps:$4 sm:$0xff]   ;;  %v10280_v40 = vld [vmem:[#allocation5 + $0x15e0] ss:$16 sps:$4 sm:$0xff]  }
 0x2dc   :  { %6716 = vmatmul.mubr.bf16.vlgmr.msra.gmra.mrb[0].mxu0 %v134_v41  ;;  %7372 = vmatmul.mubr.bf16.vlgmr.msra.gmra.mrb[0].mxu1 %v134_v41  ;;  %v10283_v41 = vld [vmem:[#allocation5 + $0x15e8] ss:$16 sps:$4 sm:$0xff]  }
 0x2dd   :  { %6725 = vmatpush1.bf16.msra.mxu0 %v10190_v43  ;;  %7381 = vmatpush1.bf16.msra.mxu1 %v10193_v44  ;;  %v10288_v43 = vld [vmem:[#allocation5 + $0x1604] ss:$16 sps:$4 sm:$0xff]   ;;  %v10291_v44 = vld [vmem:[#allocation5 + $0x160c] ss:$16 sps:$4 sm:$0xff]  }
 0x2de   :  { %6726 = vmatprep.subr.bf16.mxu0 %v10198_v45  ;;  %7382 = vmatprep.subr.bf16.mxu1 %v10201_v46  ;;  %v136_v45 = vpack.c.bf16 %v104_v42, %v104_v42  ;;  %v107_v46 = vld [vmem:[#allocation2 + $0xb8] sm:$0xff]  ;;  %v10378_v42 = vld [vmem:[#allocation5 + $0x17e4] ss:$16 sps:$4 sm:$0xff]  }
 0x2df   :  { %6756 = vmatprep.mubr.bf16.mxu0 %v137_v47  ;;  %7412 = vmatprep.mubr.bf16.mxu1 %v137_v47  ;;  %v10286_v47 = vld [vmem:[#allocation5 + $0x1600] ss:$16 sps:$4 sm:$0xff]  }
 0x2e1   :  { %6727 = vmatpush1.bf16.msra.mxu0 %v10196_v48  ;;  %7383 = vmatpush1.bf16.msra.mxu1 %v10199_v49  ;;  %v10289_v48 = vld [vmem:[#allocation5 + $0x1608] ss:$16 sps:$4 sm:$0xff]   ;;  %v10294_v49 = vld [vmem:[#allocation5 + $0x1624] ss:$16 sps:$4 sm:$0xff]  }
 0x2e2   :  { %6728 = vmatprep.subr.bf16.mxu0 %v10204_v50  ;;  %7384 = vmatprep.subr.bf16.mxu1 %v10207_v51  ;;  %v10297_v50 = vld [vmem:[#allocation5 + $0x162c] ss:$16 sps:$4 sm:$0xff]   ;;  %v139_v51 = vpack.c.bf16 %v107_v46, %v107_v46  ;;  %v106_v46 = vld [vmem:[#allocation2 + $0xb0] sm:$0xff] }
 0x2e5   :  { %6729 = vmatpush1.bf16.msra.mxu0 %v10202_v52  ;;  %7385 = vmatpush1.bf16.msra.mxu1 %v10205_v53  ;;  %v10292_v52 = vld [vmem:[#allocation5 + $0x1620] ss:$16 sps:$4 sm:$0xff]   ;;  %v10295_v53 = vld [vmem:[#allocation5 + $0x1628] ss:$16 sps:$4 sm:$0xff]  }
 0x2e6   :  { %6730 = vmatprep.subr.bf16.mxu0 %v10210_v54  ;;  %7386 = vmatprep.subr.bf16.mxu1 %v10213_v55  ;;  %v10300_v54 = vld [vmem:[#allocation5 + $0x1644] ss:$16 sps:$4 sm:$0xff]   ;;  %v10303_v55 = vld [vmem:[#allocation5 + $0x164c] ss:$16 sps:$4 sm:$0xff]  }
 0x2e9   :  { %6731 = vmatpush1.bf16.msra.mxu0 %v10208_v56  ;;  %7387 = vmatpush1.bf16.msra.mxu1 %v10211_v57  ;;  %v10298_v56 = vld [vmem:[#allocation5 + $0x1640] ss:$16 sps:$4 sm:$0xff]   ;;  %v10301_v57 = vld [vmem:[#allocation5 + $0x1648] ss:$16 sps:$4 sm:$0xff]  }
 0x2ea   :  { %6732 = vmatprep.subr.bf16.mxu0 %v10216_v58  ;;  %7388 = vmatprep.subr.bf16.mxu1 %v10219_v59  ;;  %v10306_v58 = vld [vmem:[#allocation5 + $0x1664] ss:$16 sps:$4 sm:$0xff]   ;;  %v10309_v59 = vld [vmem:[#allocation5 + $0x166c] ss:$16 sps:$4 sm:$0xff]  }
 0x2ed   :  { %6733 = vmatpush1.bf16.msra.mxu0 %v10214_v60  ;;  %7389 = vmatpush1.bf16.msra.mxu1 %v10217_v61  ;;  %v10304_v60 = vld [vmem:[#allocation5 + $0x1660] ss:$16 sps:$4 sm:$0xff]   ;;  %v10307_v61 = vld [vmem:[#allocation5 + $0x1668] ss:$16 sps:$4 sm:$0xff]  }
 0x2ee   :  { %6734 = vmatprep.subr.bf16.mxu0 %v10222_v62  ;;  %7390 = vmatprep.subr.bf16.mxu1 %v10225_v63  ;;  %v10312_v62 = vld [vmem:[#allocation5 + $0x1684] ss:$16 sps:$4 sm:$0xff]   ;;  %v10315_v63 = vld [vmem:[#allocation5 + $0x168c] ss:$16 sps:$4 sm:$0xff]  }
 0x2f1   :  { %6735 = vmatpush1.bf16.msra.mxu0 %v10220_v0  ;;  %7391 = vmatpush1.bf16.msra.mxu1 %v10223_v1  ;;  %v10310_v0 = vld [vmem:[#allocation5 + $0x1680] ss:$16 sps:$4 sm:$0xff]   ;;  %v10313_v1 = vld [vmem:[#allocation5 + $0x1688] ss:$16 sps:$4 sm:$0xff]  }
 0x2f2   :  { %6736 = vmatprep.subr.bf16.mxu0 %v10228_v2  ;;  %7392 = vmatprep.subr.bf16.mxu1 %v10231_v3  ;;  %v10318_v2 = vld [vmem:[#allocation5 + $0x16a4] ss:$16 sps:$4 sm:$0xff]   ;;  %v10321_v3 = vld [vmem:[#allocation5 + $0x16ac] ss:$16 sps:$4 sm:$0xff]  }
 0x2f5   :  { %6737 = vmatpush1.bf16.msra.mxu0 %v10226_v4  ;;  %7393 = vmatpush1.bf16.msra.mxu1 %v10229_v5  ;;  %v10316_v4 = vld [vmem:[#allocation5 + $0x16a0] ss:$16 sps:$4 sm:$0xff]   ;;  %v10319_v5 = vld [vmem:[#allocation5 + $0x16a8] ss:$16 sps:$4 sm:$0xff]  }
 0x2f6   :  { %6738 = vmatprep.subr.bf16.mxu0 %v10234_v6  ;;  %7394 = vmatprep.subr.bf16.mxu1 %v10237_v7  ;;  %v10324_v6 = vld [vmem:[#allocation5 + $0x16c4] ss:$16 sps:$4 sm:$0xff]   ;;  %v10327_v7 = vld [vmem:[#allocation5 + $0x16cc] ss:$16 sps:$4 sm:$0xff]  }
 0x2f9   :  { %6739 = vmatpush1.bf16.msra.mxu0 %v10232_v8  ;;  %7395 = vmatpush1.bf16.msra.mxu1 %v10235_v9  ;;  %v10322_v8 = vld [vmem:[#allocation5 + $0x16c0] ss:$16 sps:$4 sm:$0xff]   ;;  %v10325_v9 = vld [vmem:[#allocation5 + $0x16c8] ss:$16 sps:$4 sm:$0xff]  }
 0x2fa   :  { %6740 = vmatprep.subr.bf16.mxu0 %v10240_v10  ;;  %7396 = vmatprep.subr.bf16.mxu1 %v10243_v11  ;;  %v10330_v10 = vld [vmem:[#allocation5 + $0x16e4] ss:$16 sps:$4 sm:$0xff]   ;;  %v10333_v11 = vld [vmem:[#allocation5 + $0x16ec] ss:$16 sps:$4 sm:$0xff]  }
 0x2fd   :  { %6741 = vmatpush1.bf16.msra.mxu0 %v10238_v12  ;;  %7397 = vmatpush1.bf16.msra.mxu1 %v10241_v13  ;;  %v10328_v12 = vld [vmem:[#allocation5 + $0x16e0] ss:$16 sps:$4 sm:$0xff]   ;;  %v10331_v13 = vld [vmem:[#allocation5 + $0x16e8] ss:$16 sps:$4 sm:$0xff]  }
 0x2fe   :  { %6742 = vmatprep.subr.bf16.mxu0 %v10246_v14  ;;  %7398 = vmatprep.subr.bf16.mxu1 %v10249_v15  ;;  %v10336_v14 = vld [vmem:[#allocation5 + $0x1704] ss:$16 sps:$4 sm:$0xff]   ;;  %v10339_v15 = vld [vmem:[#allocation5 + $0x170c] ss:$16 sps:$4 sm:$0xff]  }
 0x301   :  { %6743 = vmatpush1.bf16.msra.mxu0 %v10244_v16  ;;  %7399 = vmatpush1.bf16.msra.mxu1 %v10247_v17  ;;  %v10334_v16 = vld [vmem:[#allocation5 + $0x1700] ss:$16 sps:$4 sm:$0xff]   ;;  %v10337_v17 = vld [vmem:[#allocation5 + $0x1708] ss:$16 sps:$4 sm:$0xff]  }
 0x302   :  { %6744 = vmatprep.subr.bf16.mxu0 %v10252_v18  ;;  %7400 = vmatprep.subr.bf16.mxu1 %v10255_v19  ;;  %v10342_v18 = vld [vmem:[#allocation5 + $0x1724] ss:$16 sps:$4 sm:$0xff]   ;;  %v10345_v19 = vld [vmem:[#allocation5 + $0x172c] ss:$16 sps:$4 sm:$0xff]  }
 0x305   :  { %6745 = vmatpush1.bf16.msra.mxu0 %v10250_v20  ;;  %7401 = vmatpush1.bf16.msra.mxu1 %v10253_v21  ;;  %v10340_v20 = vld [vmem:[#allocation5 + $0x1720] ss:$16 sps:$4 sm:$0xff]   ;;  %v10343_v21 = vld [vmem:[#allocation5 + $0x1728] ss:$16 sps:$4 sm:$0xff]  }
 0x306   :  { %6746 = vmatprep.subr.bf16.mxu0 %v10258_v22  ;;  %7402 = vmatprep.subr.bf16.mxu1 %v10261_v23  ;;  %v10348_v22 = vld [vmem:[#allocation5 + $0x1744] ss:$16 sps:$4 sm:$0xff]   ;;  %v10351_v23 = vld [vmem:[#allocation5 + $0x174c] ss:$16 sps:$4 sm:$0xff]  }
 0x309   :  { %6747 = vmatpush1.bf16.msra.mxu0 %v10256_v24  ;;  %7403 = vmatpush1.bf16.msra.mxu1 %v10259_v25  ;;  %v10346_v24 = vld [vmem:[#allocation5 + $0x1740] ss:$16 sps:$4 sm:$0xff]   ;;  %v10349_v25 = vld [vmem:[#allocation5 + $0x1748] ss:$16 sps:$4 sm:$0xff]  }
 0x30a   :  { %6748 = vmatprep.subr.bf16.mxu0 %v10264_v26  ;;  %7404 = vmatprep.subr.bf16.mxu1 %v10267_v27  ;;  %v10354_v26 = vld [vmem:[#allocation5 + $0x1764] ss:$16 sps:$4 sm:$0xff]   ;;  %v10357_v27 = vld [vmem:[#allocation5 + $0x176c] ss:$16 sps:$4 sm:$0xff]  }
 0x30d   :  { %6749 = vmatpush1.bf16.msra.mxu0 %v10262_v28  ;;  %7405 = vmatpush1.bf16.msra.mxu1 %v10265_v29  ;;  %v10352_v28 = vld [vmem:[#allocation5 + $0x1760] ss:$16 sps:$4 sm:$0xff]   ;;  %v10355_v29 = vld [vmem:[#allocation5 + $0x1768] ss:$16 sps:$4 sm:$0xff]  }
 0x30e   :  { %6750 = vmatprep.subr.bf16.mxu0 %v10270_v30  ;;  %7406 = vmatprep.subr.bf16.mxu1 %v10273_v31  ;;  %v10360_v30 = vld [vmem:[#allocation5 + $0x1784] ss:$16 sps:$4 sm:$0xff]   ;;  %v10363_v31 = vld [vmem:[#allocation5 + $0x178c] ss:$16 sps:$4 sm:$0xff]  }
 0x311   :  { %6751 = vmatpush1.bf16.msra.mxu0 %v10268_v32  ;;  %7407 = vmatpush1.bf16.msra.mxu1 %v10271_v33  ;;  %v10358_v32 = vld [vmem:[#allocation5 + $0x1780] ss:$16 sps:$4 sm:$0xff]   ;;  %v10361_v33 = vld [vmem:[#allocation5 + $0x1788] ss:$16 sps:$4 sm:$0xff]  }
 0x312   :  { %6752 = vmatprep.subr.bf16.mxu0 %v10276_v34  ;;  %7408 = vmatprep.subr.bf16.mxu1 %v10279_v35  ;;  %v10366_v34 = vld [vmem:[#allocation5 + $0x17a4] ss:$16 sps:$4 sm:$0xff]   ;;  %v10369_v35 = vld [vmem:[#allocation5 + $0x17ac] ss:$16 sps:$4 sm:$0xff]  }
 0x315   :  { %6753 = vmatpush1.bf16.msra.mxu0 %v10274_v36  ;;  %7409 = vmatpush1.bf16.msra.mxu1 %v10277_v37  ;;  %v10364_v36 = vld [vmem:[#allocation5 + $0x17a0] ss:$16 sps:$4 sm:$0xff]   ;;  %v10367_v37 = vld [vmem:[#allocation5 + $0x17a8] ss:$16 sps:$4 sm:$0xff]  }
 0x316   :  { %6754 = vmatprep.subr.bf16.mxu0 %v10282_v38  ;;  %7410 = vmatprep.subr.bf16.mxu1 %v10285_v39  ;;  %v10372_v38 = vld [vmem:[#allocation5 + $0x17c4] ss:$16 sps:$4 sm:$0xff]   ;;  %v10375_v39 = vld [vmem:[#allocation5 + $0x17cc] ss:$16 sps:$4 sm:$0xff]  }
 0x319   :  { %6755 = vmatpush1.bf16.msra.mxu0 %v10280_v40  ;;  %7411 = vmatpush1.bf16.msra.mxu1 %v10283_v41  ;;  %v10370_v40 = vld [vmem:[#allocation5 + $0x17c0] ss:$16 sps:$4 sm:$0xff]   ;;  %v10373_v41 = vld [vmem:[#allocation5 + $0x17c8] ss:$16 sps:$4 sm:$0xff]  }
 0x31a   :  { %6765 = vmatprep.subr.bf16.mxu0 %v10288_v43  ;;  %7421 = vmatprep.subr.bf16.mxu1 %v10291_v44  ;;  %v10381_v43 = vld [vmem:[#allocation5 + $0x17ec] ss:$16 sps:$4 sm:$0xff]   ;;  %v10376_v44 = vld [vmem:[#allocation5 + $0x17e0] ss:$16 sps:$4 sm:$0xff]  }
 0x31c   :  { %6757 = vmatmul.mubr.bf16.vlgmr.msra.gmra.mrb[0].mxu0 %v136_v45  ;;  %7413 = vmatmul.mubr.bf16.vlgmr.msra.gmra.mrb[0].mxu1 %v136_v45  ;;  %v10379_v45 = vld [vmem:[#allocation5 + $0x17e8] ss:$16 sps:$4 sm:$0xff]  }
 0x31d   :  { %6766 = vmatpush1.bf16.msra.mxu0 %v10286_v47  ;;  %7422 = vmatpush1.bf16.msra.mxu1 %v10289_v48  ;;  %v10384_v47 = vld [vmem:[#allocation5 + $0x1804] ss:$16 sps:$4 sm:$0xff]   ;;  %v10387_v48 = vld [vmem:[#allocation5 + $0x180c] ss:$16 sps:$4 sm:$0xff]  }
 0x31e   :  { %6767 = vmatprep.subr.bf16.mxu0 %v10294_v49  ;;  %7423 = vmatprep.subr.bf16.mxu1 %v10297_v50  ;;  %v138_v49 = vpack.c.bf16 %v106_v46, %v106_v46  ;;  %v109_v50 = vld [vmem:[#allocation2 + $0xc8] sm:$0xff]  ;;  %v10474_v46 = vld [vmem:[#allocation5 + $0x19e4] ss:$16 sps:$4 sm:$0xff]  }
 0x31f   :  { %6797 = vmatprep.mubr.bf16.mxu0 %v139_v51  ;;  %7453 = vmatprep.mubr.bf16.mxu1 %v139_v51  ;;  %v10382_v51 = vld [vmem:[#allocation5 + $0x1800] ss:$16 sps:$4 sm:$0xff]  }
 0x321   :  { %6768 = vmatpush1.bf16.msra.mxu0 %v10292_v52  ;;  %7424 = vmatpush1.bf16.msra.mxu1 %v10295_v53  ;;  %v10385_v52 = vld [vmem:[#allocation5 + $0x1808] ss:$16 sps:$4 sm:$0xff]   ;;  %v10390_v53 = vld [vmem:[#allocation5 + $0x1824] ss:$16 sps:$4 sm:$0xff]  }
 0x322   :  { %6769 = vmatprep.subr.bf16.mxu0 %v10300_v54  ;;  %7425 = vmatprep.subr.bf16.mxu1 %v10303_v55  ;;  %v10393_v54 = vld [vmem:[#allocation5 + $0x182c] ss:$16 sps:$4 sm:$0xff]   ;;  %v141_v55 = vpack.c.bf16 %v109_v50, %v109_v50  ;;  %v108_v50 = vld [vmem:[#allocation2 + $0xc0] sm:$0xff] }
 0x325   :  { %6770 = vmatpush1.bf16.msra.mxu0 %v10298_v56  ;;  %7426 = vmatpush1.bf16.msra.mxu1 %v10301_v57  ;;  %v10388_v56 = vld [vmem:[#allocation5 + $0x1820] ss:$16 sps:$4 sm:$0xff]   ;;  %v10391_v57 = vld [vmem:[#allocation5 + $0x1828] ss:$16 sps:$4 sm:$0xff]  }
 0x326   :  { %6771 = vmatprep.subr.bf16.mxu0 %v10306_v58  ;;  %7427 = vmatprep.subr.bf16.mxu1 %v10309_v59  ;;  %v10396_v58 = vld [vmem:[#allocation5 + $0x1844] ss:$16 sps:$4 sm:$0xff]   ;;  %v10399_v59 = vld [vmem:[#allocation5 + $0x184c] ss:$16 sps:$4 sm:$0xff]  }
 0x329   :  { %6772 = vmatpush1.bf16.msra.mxu0 %v10304_v60  ;;  %7428 = vmatpush1.bf16.msra.mxu1 %v10307_v61  ;;  %v10394_v60 = vld [vmem:[#allocation5 + $0x1840] ss:$16 sps:$4 sm:$0xff]   ;;  %v10397_v61 = vld [vmem:[#allocation5 + $0x1848] ss:$16 sps:$4 sm:$0xff]  }
 0x32a   :  { %6773 = vmatprep.subr.bf16.mxu0 %v10312_v62  ;;  %7429 = vmatprep.subr.bf16.mxu1 %v10315_v63  ;;  %v10402_v62 = vld [vmem:[#allocation5 + $0x1864] ss:$16 sps:$4 sm:$0xff]   ;;  %v10405_v63 = vld [vmem:[#allocation5 + $0x186c] ss:$16 sps:$4 sm:$0xff]  }
 0x32d   :  { %6774 = vmatpush1.bf16.msra.mxu0 %v10310_v0  ;;  %7430 = vmatpush1.bf16.msra.mxu1 %v10313_v1  ;;  %v10400_v0 = vld [vmem:[#allocation5 + $0x1860] ss:$16 sps:$4 sm:$0xff]   ;;  %v10403_v1 = vld [vmem:[#allocation5 + $0x1868] ss:$16 sps:$4 sm:$0xff]  }
 0x32e   :  { %6775 = vmatprep.subr.bf16.mxu0 %v10318_v2  ;;  %7431 = vmatprep.subr.bf16.mxu1 %v10321_v3  ;;  %v10408_v2 = vld [vmem:[#allocation5 + $0x1884] ss:$16 sps:$4 sm:$0xff]   ;;  %v10411_v3 = vld [vmem:[#allocation5 + $0x188c] ss:$16 sps:$4 sm:$0xff]  }
 0x331   :  { %6776 = vmatpush1.bf16.msra.mxu0 %v10316_v4  ;;  %7432 = vmatpush1.bf16.msra.mxu1 %v10319_v5  ;;  %v10406_v4 = vld [vmem:[#allocation5 + $0x1880] ss:$16 sps:$4 sm:$0xff]   ;;  %v10409_v5 = vld [vmem:[#allocation5 + $0x1888] ss:$16 sps:$4 sm:$0xff]  }
 0x332   :  { %6777 = vmatprep.subr.bf16.mxu0 %v10324_v6  ;;  %7433 = vmatprep.subr.bf16.mxu1 %v10327_v7  ;;  %v10414_v6 = vld [vmem:[#allocation5 + $0x18a4] ss:$16 sps:$4 sm:$0xff]   ;;  %v10417_v7 = vld [vmem:[#allocation5 + $0x18ac] ss:$16 sps:$4 sm:$0xff]  }
 0x335   :  { %6778 = vmatpush1.bf16.msra.mxu0 %v10322_v8  ;;  %7434 = vmatpush1.bf16.msra.mxu1 %v10325_v9  ;;  %v10412_v8 = vld [vmem:[#allocation5 + $0x18a0] ss:$16 sps:$4 sm:$0xff]   ;;  %v10415_v9 = vld [vmem:[#allocation5 + $0x18a8] ss:$16 sps:$4 sm:$0xff]  }
 0x336   :  { %6779 = vmatprep.subr.bf16.mxu0 %v10330_v10  ;;  %7435 = vmatprep.subr.bf16.mxu1 %v10333_v11  ;;  %v10420_v10 = vld [vmem:[#allocation5 + $0x18c4] ss:$16 sps:$4 sm:$0xff]   ;;  %v10423_v11 = vld [vmem:[#allocation5 + $0x18cc] ss:$16 sps:$4 sm:$0xff]  }
 0x339   :  { %6780 = vmatpush1.bf16.msra.mxu0 %v10328_v12  ;;  %7436 = vmatpush1.bf16.msra.mxu1 %v10331_v13  ;;  %v10418_v12 = vld [vmem:[#allocation5 + $0x18c0] ss:$16 sps:$4 sm:$0xff]   ;;  %v10421_v13 = vld [vmem:[#allocation5 + $0x18c8] ss:$16 sps:$4 sm:$0xff]  }
 0x33a   :  { %6781 = vmatprep.subr.bf16.mxu0 %v10336_v14  ;;  %7437 = vmatprep.subr.bf16.mxu1 %v10339_v15  ;;  %v10426_v14 = vld [vmem:[#allocation5 + $0x18e4] ss:$16 sps:$4 sm:$0xff]   ;;  %v10429_v15 = vld [vmem:[#allocation5 + $0x18ec] ss:$16 sps:$4 sm:$0xff]  }
 0x33d   :  { %6782 = vmatpush1.bf16.msra.mxu0 %v10334_v16  ;;  %7438 = vmatpush1.bf16.msra.mxu1 %v10337_v17  ;;  %v10424_v16 = vld [vmem:[#allocation5 + $0x18e0] ss:$16 sps:$4 sm:$0xff]   ;;  %v10427_v17 = vld [vmem:[#allocation5 + $0x18e8] ss:$16 sps:$4 sm:$0xff]  }
 0x33e   :  { %6783 = vmatprep.subr.bf16.mxu0 %v10342_v18  ;;  %7439 = vmatprep.subr.bf16.mxu1 %v10345_v19  ;;  %v10432_v18 = vld [vmem:[#allocation5 + $0x1904] ss:$16 sps:$4 sm:$0xff]   ;;  %v10435_v19 = vld [vmem:[#allocation5 + $0x190c] ss:$16 sps:$4 sm:$0xff]  }
 0x341   :  { %6784 = vmatpush1.bf16.msra.mxu0 %v10340_v20  ;;  %7440 = vmatpush1.bf16.msra.mxu1 %v10343_v21  ;;  %v10430_v20 = vld [vmem:[#allocation5 + $0x1900] ss:$16 sps:$4 sm:$0xff]   ;;  %v10433_v21 = vld [vmem:[#allocation5 + $0x1908] ss:$16 sps:$4 sm:$0xff]  }
 0x342   :  { %6785 = vmatprep.subr.bf16.mxu0 %v10348_v22  ;;  %7441 = vmatprep.subr.bf16.mxu1 %v10351_v23  ;;  %v10438_v22 = vld [vmem:[#allocation5 + $0x1924] ss:$16 sps:$4 sm:$0xff]   ;;  %v10441_v23 = vld [vmem:[#allocation5 + $0x192c] ss:$16 sps:$4 sm:$0xff]  }
 0x345   :  { %6786 = vmatpush1.bf16.msra.mxu0 %v10346_v24  ;;  %7442 = vmatpush1.bf16.msra.mxu1 %v10349_v25  ;;  %v10436_v24 = vld [vmem:[#allocation5 + $0x1920] ss:$16 sps:$4 sm:$0xff]   ;;  %v10439_v25 = vld [vmem:[#allocation5 + $0x1928] ss:$16 sps:$4 sm:$0xff]  }
 0x346   :  { %6787 = vmatprep.subr.bf16.mxu0 %v10354_v26  ;;  %7443 = vmatprep.subr.bf16.mxu1 %v10357_v27  ;;  %v10444_v26 = vld [vmem:[#allocation5 + $0x1944] ss:$16 sps:$4 sm:$0xff]   ;;  %v10447_v27 = vld [vmem:[#allocation5 + $0x194c] ss:$16 sps:$4 sm:$0xff]  }
 0x349   :  { %6788 = vmatpush1.bf16.msra.mxu0 %v10352_v28  ;;  %7444 = vmatpush1.bf16.msra.mxu1 %v10355_v29  ;;  %v10442_v28 = vld [vmem:[#allocation5 + $0x1940] ss:$16 sps:$4 sm:$0xff]   ;;  %v10445_v29 = vld [vmem:[#allocation5 + $0x1948] ss:$16 sps:$4 sm:$0xff]  }
 0x34a   :  { %6789 = vmatprep.subr.bf16.mxu0 %v10360_v30  ;;  %7445 = vmatprep.subr.bf16.mxu1 %v10363_v31  ;;  %v10450_v30 = vld [vmem:[#allocation5 + $0x1964] ss:$16 sps:$4 sm:$0xff]   ;;  %v10453_v31 = vld [vmem:[#allocation5 + $0x196c] ss:$16 sps:$4 sm:$0xff]  }
 0x34d   :  { %6790 = vmatpush1.bf16.msra.mxu0 %v10358_v32  ;;  %7446 = vmatpush1.bf16.msra.mxu1 %v10361_v33  ;;  %v10448_v32 = vld [vmem:[#allocation5 + $0x1960] ss:$16 sps:$4 sm:$0xff]   ;;  %v10451_v33 = vld [vmem:[#allocation5 + $0x1968] ss:$16 sps:$4 sm:$0xff]  }
 0x34e   :  { %6791 = vmatprep.subr.bf16.mxu0 %v10366_v34  ;;  %7447 = vmatprep.subr.bf16.mxu1 %v10369_v35  ;;  %v10456_v34 = vld [vmem:[#allocation5 + $0x1984] ss:$16 sps:$4 sm:$0xff]   ;;  %v10459_v35 = vld [vmem:[#allocation5 + $0x198c] ss:$16 sps:$4 sm:$0xff]  }
 0x351   :  { %6792 = vmatpush1.bf16.msra.mxu0 %v10364_v36  ;;  %7448 = vmatpush1.bf16.msra.mxu1 %v10367_v37  ;;  %v10454_v36 = vld [vmem:[#allocation5 + $0x1980] ss:$16 sps:$4 sm:$0xff]   ;;  %v10457_v37 = vld [vmem:[#allocation5 + $0x1988] ss:$16 sps:$4 sm:$0xff]  }
 0x352   :  { %6793 = vmatprep.subr.bf16.mxu0 %v10372_v38  ;;  %7449 = vmatprep.subr.bf16.mxu1 %v10375_v39  ;;  %v10462_v38 = vld [vmem:[#allocation5 + $0x19a4] ss:$16 sps:$4 sm:$0xff]   ;;  %v10465_v39 = vld [vmem:[#allocation5 + $0x19ac] ss:$16 sps:$4 sm:$0xff]  }
 0x355   :  { %6794 = vmatpush1.bf16.msra.mxu0 %v10370_v40  ;;  %7450 = vmatpush1.bf16.msra.mxu1 %v10373_v41  ;;  %v10460_v40 = vld [vmem:[#allocation5 + $0x19a0] ss:$16 sps:$4 sm:$0xff]   ;;  %v10463_v41 = vld [vmem:[#allocation5 + $0x19a8] ss:$16 sps:$4 sm:$0xff]  }
 0x356   :  { %6795 = vmatprep.subr.bf16.mxu0 %v10378_v42  ;;  %7451 = vmatprep.subr.bf16.mxu1 %v10381_v43  ;;  %v10468_v42 = vld [vmem:[#allocation5 + $0x19c4] ss:$16 sps:$4 sm:$0xff]   ;;  %v10471_v43 = vld [vmem:[#allocation5 + $0x19cc] ss:$16 sps:$4 sm:$0xff]  }
 0x359   :  { %6796 = vmatpush1.bf16.msra.mxu0 %v10376_v44  ;;  %7452 = vmatpush1.bf16.msra.mxu1 %v10379_v45  ;;  %v10466_v44 = vld [vmem:[#allocation5 + $0x19c0] ss:$16 sps:$4 sm:$0xff]   ;;  %v10469_v45 = vld [vmem:[#allocation5 + $0x19c8] ss:$16 sps:$4 sm:$0xff]  }
 0x35a   :  { %6806 = vmatprep.subr.bf16.mxu0 %v10384_v47  ;;  %7462 = vmatprep.subr.bf16.mxu1 %v10387_v48  ;;  %v10477_v47 = vld [vmem:[#allocation5 + $0x19ec] ss:$16 sps:$4 sm:$0xff]   ;;  %v10472_v48 = vld [vmem:[#allocation5 + $0x19e0] ss:$16 sps:$4 sm:$0xff]  }
 0x35c   :  { %6798 = vmatmul.mubr.bf16.vlgmr.msra.gmra.mrb[0].mxu0 %v138_v49  ;;  %7454 = vmatmul.mubr.bf16.vlgmr.msra.gmra.mrb[0].mxu1 %v138_v49  ;;  %v10475_v49 = vld [vmem:[#allocation5 + $0x19e8] ss:$16 sps:$4 sm:$0xff]  }
 0x35d   :  { %6807 = vmatpush1.bf16.msra.mxu0 %v10382_v51  ;;  %7463 = vmatpush1.bf16.msra.mxu1 %v10385_v52  ;;  %v10480_v51 = vld [vmem:[#allocation5 + $0x1a04] ss:$16 sps:$4 sm:$0xff]   ;;  %v10483_v52 = vld [vmem:[#allocation5 + $0x1a0c] ss:$16 sps:$4 sm:$0xff]  }
 0x35e   :  { %6808 = vmatprep.subr.bf16.mxu0 %v10390_v53  ;;  %7464 = vmatprep.subr.bf16.mxu1 %v10393_v54  ;;  %v140_v53 = vpack.c.bf16 %v108_v50, %v108_v50  ;;  %v111_v54 = vld [vmem:[#allocation2 + $0xd8] sm:$0xff]  ;;  %v10570_v50 = vld [vmem:[#allocation5 + $0x1be4] ss:$16 sps:$4 sm:$0xff]  }
 0x35f   :  { %6838 = vmatprep.mubr.bf16.mxu0 %v141_v55  ;;  %7494 = vmatprep.mubr.bf16.mxu1 %v141_v55  ;;  %v10478_v55 = vld [vmem:[#allocation5 + $0x1a00] ss:$16 sps:$4 sm:$0xff]  }
 0x361   :  { %6809 = vmatpush1.bf16.msra.mxu0 %v10388_v56  ;;  %7465 = vmatpush1.bf16.msra.mxu1 %v10391_v57  ;;  %v10481_v56 = vld [vmem:[#allocation5 + $0x1a08] ss:$16 sps:$4 sm:$0xff]   ;;  %v10486_v57 = vld [vmem:[#allocation5 + $0x1a24] ss:$16 sps:$4 sm:$0xff]  }
 0x362   :  { %6810 = vmatprep.subr.bf16.mxu0 %v10396_v58  ;;  %7466 = vmatprep.subr.bf16.mxu1 %v10399_v59  ;;  %v10489_v58 = vld [vmem:[#allocation5 + $0x1a2c] ss:$16 sps:$4 sm:$0xff]   ;;  %v143_v59 = vpack.c.bf16 %v111_v54, %v111_v54  ;;  %v110_v54 = vld [vmem:[#allocation2 + $0xd0] sm:$0xff] }
 0x365   :  { %6811 = vmatpush1.bf16.msra.mxu0 %v10394_v60  ;;  %7467 = vmatpush1.bf16.msra.mxu1 %v10397_v61  ;;  %v10484_v60 = vld [vmem:[#allocation5 + $0x1a20] ss:$16 sps:$4 sm:$0xff]   ;;  %v10487_v61 = vld [vmem:[#allocation5 + $0x1a28] ss:$16 sps:$4 sm:$0xff]  }
 0x366   :  { %6812 = vmatprep.subr.bf16.mxu0 %v10402_v62  ;;  %7468 = vmatprep.subr.bf16.mxu1 %v10405_v63  ;;  %v10492_v62 = vld [vmem:[#allocation5 + $0x1a44] ss:$16 sps:$4 sm:$0xff]   ;;  %v10495_v63 = vld [vmem:[#allocation5 + $0x1a4c] ss:$16 sps:$4 sm:$0xff]  }
 0x369   :  { %6813 = vmatpush1.bf16.msra.mxu0 %v10400_v0  ;;  %7469 = vmatpush1.bf16.msra.mxu1 %v10403_v1  ;;  %v10490_v0 = vld [vmem:[#allocation5 + $0x1a40] ss:$16 sps:$4 sm:$0xff]   ;;  %v10493_v1 = vld [vmem:[#allocation5 + $0x1a48] ss:$16 sps:$4 sm:$0xff]  }
 0x36a   :  { %6814 = vmatprep.subr.bf16.mxu0 %v10408_v2  ;;  %7470 = vmatprep.subr.bf16.mxu1 %v10411_v3  ;;  %v10498_v2 = vld [vmem:[#allocation5 + $0x1a64] ss:$16 sps:$4 sm:$0xff]   ;;  %v10501_v3 = vld [vmem:[#allocation5 + $0x1a6c] ss:$16 sps:$4 sm:$0xff]  }
 0x36d   :  { %6815 = vmatpush1.bf16.msra.mxu0 %v10406_v4  ;;  %7471 = vmatpush1.bf16.msra.mxu1 %v10409_v5  ;;  %v10496_v4 = vld [vmem:[#allocation5 + $0x1a60] ss:$16 sps:$4 sm:$0xff]   ;;  %v10499_v5 = vld [vmem:[#allocation5 + $0x1a68] ss:$16 sps:$4 sm:$0xff]  }
 0x36e   :  { %6816 = vmatprep.subr.bf16.mxu0 %v10414_v6  ;;  %7472 = vmatprep.subr.bf16.mxu1 %v10417_v7  ;;  %v10504_v6 = vld [vmem:[#allocation5 + $0x1a84] ss:$16 sps:$4 sm:$0xff]   ;;  %v10507_v7 = vld [vmem:[#allocation5 + $0x1a8c] ss:$16 sps:$4 sm:$0xff]  }
 0x371   :  { %6817 = vmatpush1.bf16.msra.mxu0 %v10412_v8  ;;  %7473 = vmatpush1.bf16.msra.mxu1 %v10415_v9  ;;  %v10502_v8 = vld [vmem:[#allocation5 + $0x1a80] ss:$16 sps:$4 sm:$0xff]   ;;  %v10505_v9 = vld [vmem:[#allocation5 + $0x1a88] ss:$16 sps:$4 sm:$0xff]  }
 0x372   :  { %6818 = vmatprep.subr.bf16.mxu0 %v10420_v10  ;;  %7474 = vmatprep.subr.bf16.mxu1 %v10423_v11  ;;  %v10510_v10 = vld [vmem:[#allocation5 + $0x1aa4] ss:$16 sps:$4 sm:$0xff]   ;;  %v10513_v11 = vld [vmem:[#allocation5 + $0x1aac] ss:$16 sps:$4 sm:$0xff]  }
 0x375   :  { %6819 = vmatpush1.bf16.msra.mxu0 %v10418_v12  ;;  %7475 = vmatpush1.bf16.msra.mxu1 %v10421_v13  ;;  %v10508_v12 = vld [vmem:[#allocation5 + $0x1aa0] ss:$16 sps:$4 sm:$0xff]   ;;  %v10511_v13 = vld [vmem:[#allocation5 + $0x1aa8] ss:$16 sps:$4 sm:$0xff]  }
 0x376   :  { %6820 = vmatprep.subr.bf16.mxu0 %v10426_v14  ;;  %7476 = vmatprep.subr.bf16.mxu1 %v10429_v15  ;;  %v10516_v14 = vld [vmem:[#allocation5 + $0x1ac4] ss:$16 sps:$4 sm:$0xff]   ;;  %v10519_v15 = vld [vmem:[#allocation5 + $0x1acc] ss:$16 sps:$4 sm:$0xff]  }
 0x379   :  { %6821 = vmatpush1.bf16.msra.mxu0 %v10424_v16  ;;  %7477 = vmatpush1.bf16.msra.mxu1 %v10427_v17  ;;  %v10514_v16 = vld [vmem:[#allocation5 + $0x1ac0] ss:$16 sps:$4 sm:$0xff]   ;;  %v10517_v17 = vld [vmem:[#allocation5 + $0x1ac8] ss:$16 sps:$4 sm:$0xff]  }
 0x37a   :  { %6822 = vmatprep.subr.bf16.mxu0 %v10432_v18  ;;  %7478 = vmatprep.subr.bf16.mxu1 %v10435_v19  ;;  %v10522_v18 = vld [vmem:[#allocation5 + $0x1ae4] ss:$16 sps:$4 sm:$0xff]   ;;  %v10525_v19 = vld [vmem:[#allocation5 + $0x1aec] ss:$16 sps:$4 sm:$0xff]  }
 0x37d   :  { %6823 = vmatpush1.bf16.msra.mxu0 %v10430_v20  ;;  %7479 = vmatpush1.bf16.msra.mxu1 %v10433_v21  ;;  %v10520_v20 = vld [vmem:[#allocation5 + $0x1ae0] ss:$16 sps:$4 sm:$0xff]   ;;  %v10523_v21 = vld [vmem:[#allocation5 + $0x1ae8] ss:$16 sps:$4 sm:$0xff]  }
 0x37e   :  { %6824 = vmatprep.subr.bf16.mxu0 %v10438_v22  ;;  %7480 = vmatprep.subr.bf16.mxu1 %v10441_v23  ;;  %v10528_v22 = vld [vmem:[#allocation5 + $0x1b04] ss:$16 sps:$4 sm:$0xff]   ;;  %v10531_v23 = vld [vmem:[#allocation5 + $0x1b0c] ss:$16 sps:$4 sm:$0xff]  }
 0x381   :  { %6825 = vmatpush1.bf16.msra.mxu0 %v10436_v24  ;;  %7481 = vmatpush1.bf16.msra.mxu1 %v10439_v25  ;;  %v10526_v24 = vld [vmem:[#allocation5 + $0x1b00] ss:$16 sps:$4 sm:$0xff]   ;;  %v10529_v25 = vld [vmem:[#allocation5 + $0x1b08] ss:$16 sps:$4 sm:$0xff]  }
 0x382   :  { %6826 = vmatprep.subr.bf16.mxu0 %v10444_v26  ;;  %7482 = vmatprep.subr.bf16.mxu1 %v10447_v27  ;;  %v10534_v26 = vld [vmem:[#allocation5 + $0x1b24] ss:$16 sps:$4 sm:$0xff]   ;;  %v10537_v27 = vld [vmem:[#allocation5 + $0x1b2c] ss:$16 sps:$4 sm:$0xff]  }
 0x385   :  { %6827 = vmatpush1.bf16.msra.mxu0 %v10442_v28  ;;  %7483 = vmatpush1.bf16.msra.mxu1 %v10445_v29  ;;  %v10532_v28 = vld [vmem:[#allocation5 + $0x1b20] ss:$16 sps:$4 sm:$0xff]   ;;  %v10535_v29 = vld [vmem:[#allocation5 + $0x1b28] ss:$16 sps:$4 sm:$0xff]  }
 0x386   :  { %6828 = vmatprep.subr.bf16.mxu0 %v10450_v30  ;;  %7484 = vmatprep.subr.bf16.mxu1 %v10453_v31  ;;  %v10540_v30 = vld [vmem:[#allocation5 + $0x1b44] ss:$16 sps:$4 sm:$0xff]   ;;  %v10543_v31 = vld [vmem:[#allocation5 + $0x1b4c] ss:$16 sps:$4 sm:$0xff]  }
 0x389   :  { %6829 = vmatpush1.bf16.msra.mxu0 %v10448_v32  ;;  %7485 = vmatpush1.bf16.msra.mxu1 %v10451_v33  ;;  %v10538_v32 = vld [vmem:[#allocation5 + $0x1b40] ss:$16 sps:$4 sm:$0xff]   ;;  %v10541_v33 = vld [vmem:[#allocation5 + $0x1b48] ss:$16 sps:$4 sm:$0xff]  }
 0x38a   :  { %6830 = vmatprep.subr.bf16.mxu0 %v10456_v34  ;;  %7486 = vmatprep.subr.bf16.mxu1 %v10459_v35  ;;  %v10546_v34 = vld [vmem:[#allocation5 + $0x1b64] ss:$16 sps:$4 sm:$0xff]   ;;  %v10549_v35 = vld [vmem:[#allocation5 + $0x1b6c] ss:$16 sps:$4 sm:$0xff]  }
 0x38d   :  { %6831 = vmatpush1.bf16.msra.mxu0 %v10454_v36  ;;  %7487 = vmatpush1.bf16.msra.mxu1 %v10457_v37  ;;  %v10544_v36 = vld [vmem:[#allocation5 + $0x1b60] ss:$16 sps:$4 sm:$0xff]   ;;  %v10547_v37 = vld [vmem:[#allocation5 + $0x1b68] ss:$16 sps:$4 sm:$0xff]  }
 0x38e   :  { %6832 = vmatprep.subr.bf16.mxu0 %v10462_v38  ;;  %7488 = vmatprep.subr.bf16.mxu1 %v10465_v39  ;;  %v10552_v38 = vld [vmem:[#allocation5 + $0x1b84] ss:$16 sps:$4 sm:$0xff]   ;;  %v10555_v39 = vld [vmem:[#allocation5 + $0x1b8c] ss:$16 sps:$4 sm:$0xff]  }
 0x391   :  { %6833 = vmatpush1.bf16.msra.mxu0 %v10460_v40  ;;  %7489 = vmatpush1.bf16.msra.mxu1 %v10463_v41  ;;  %v10550_v40 = vld [vmem:[#allocation5 + $0x1b80] ss:$16 sps:$4 sm:$0xff]   ;;  %v10553_v41 = vld [vmem:[#allocation5 + $0x1b88] ss:$16 sps:$4 sm:$0xff]  }
 0x392   :  { %6834 = vmatprep.subr.bf16.mxu0 %v10468_v42  ;;  %7490 = vmatprep.subr.bf16.mxu1 %v10471_v43  ;;  %v10558_v42 = vld [vmem:[#allocation5 + $0x1ba4] ss:$16 sps:$4 sm:$0xff]   ;;  %v10561_v43 = vld [vmem:[#allocation5 + $0x1bac] ss:$16 sps:$4 sm:$0xff]  }
 0x395   :  { %6835 = vmatpush1.bf16.msra.mxu0 %v10466_v44  ;;  %7491 = vmatpush1.bf16.msra.mxu1 %v10469_v45  ;;  %v10556_v44 = vld [vmem:[#allocation5 + $0x1ba0] ss:$16 sps:$4 sm:$0xff]   ;;  %v10559_v45 = vld [vmem:[#allocation5 + $0x1ba8] ss:$16 sps:$4 sm:$0xff]  }
 0x396   :  { %6836 = vmatprep.subr.bf16.mxu0 %v10474_v46  ;;  %7492 = vmatprep.subr.bf16.mxu1 %v10477_v47  ;;  %v10564_v46 = vld [vmem:[#allocation5 + $0x1bc4] ss:$16 sps:$4 sm:$0xff]   ;;  %v10567_v47 = vld [vmem:[#allocation5 + $0x1bcc] ss:$16 sps:$4 sm:$0xff]  }
 0x399   :  { %6837 = vmatpush1.bf16.msra.mxu0 %v10472_v48  ;;  %7493 = vmatpush1.bf16.msra.mxu1 %v10475_v49  ;;  %v10562_v48 = vld [vmem:[#allocation5 + $0x1bc0] ss:$16 sps:$4 sm:$0xff]   ;;  %v10565_v49 = vld [vmem:[#allocation5 + $0x1bc8] ss:$16 sps:$4 sm:$0xff]  }
 0x39a   :  { %6847 = vmatprep.subr.bf16.mxu0 %v10480_v51  ;;  %7503 = vmatprep.subr.bf16.mxu1 %v10483_v52  ;;  %v10573_v51 = vld [vmem:[#allocation5 + $0x1bec] ss:$16 sps:$4 sm:$0xff]   ;;  %v10568_v52 = vld [vmem:[#allocation5 + $0x1be0] ss:$16 sps:$4 sm:$0xff]  }
 0x39c   :  { %6839 = vmatmul.mubr.bf16.vlgmr.msra.gmra.mrb[0].mxu0 %v140_v53  ;;  %7495 = vmatmul.mubr.bf16.vlgmr.msra.gmra.mrb[0].mxu1 %v140_v53  ;;  %v10571_v53 = vld [vmem:[#allocation5 + $0x1be8] ss:$16 sps:$4 sm:$0xff]  }
 0x39d   :  { %6848 = vmatpush1.bf16.msra.mxu0 %v10478_v55  ;;  %7504 = vmatpush1.bf16.msra.mxu1 %v10481_v56  ;;  %v10576_v55 = vld [vmem:[#allocation5 + $0x1c04] ss:$16 sps:$4 sm:$0xff]   ;;  %v10579_v56 = vld [vmem:[#allocation5 + $0x1c0c] ss:$16 sps:$4 sm:$0xff]  }
 0x39e   :  { %6849 = vmatprep.subr.bf16.mxu0 %v10486_v57  ;;  %7505 = vmatprep.subr.bf16.mxu1 %v10489_v58  ;;  %v142_v57 = vpack.c.bf16 %v110_v54, %v110_v54  ;;  %v113_v58 = vld [vmem:[#allocation2 + $0xe8] sm:$0xff]  ;;  %v10666_v54 = vld [vmem:[#allocation5 + $0x1de4] ss:$16 sps:$4 sm:$0xff]  }
 0x39f   :  { %6879 = vmatprep.mubr.bf16.mxu0 %v143_v59  ;;  %7535 = vmatprep.mubr.bf16.mxu1 %v143_v59  ;;  %v10574_v59 = vld [vmem:[#allocation5 + $0x1c00] ss:$16 sps:$4 sm:$0xff]  }
 0x3a1   :  { %6850 = vmatpush1.bf16.msra.mxu0 %v10484_v60  ;;  %7506 = vmatpush1.bf16.msra.mxu1 %v10487_v61  ;;  %v10577_v60 = vld [vmem:[#allocation5 + $0x1c08] ss:$16 sps:$4 sm:$0xff]   ;;  %v10582_v61 = vld [vmem:[#allocation5 + $0x1c24] ss:$16 sps:$4 sm:$0xff]  }
 0x3a2   :  { %6851 = vmatprep.subr.bf16.mxu0 %v10492_v62  ;;  %7507 = vmatprep.subr.bf16.mxu1 %v10495_v63  ;;  %v10585_v62 = vld [vmem:[#allocation5 + $0x1c2c] ss:$16 sps:$4 sm:$0xff]   ;;  %v145_v63 = vpack.c.bf16 %v113_v58, %v113_v58  ;;  %v112_v58 = vld [vmem:[#allocation2 + $0xe0] sm:$0xff] }
 0x3a5   :  { %6852 = vmatpush1.bf16.msra.mxu0 %v10490_v0  ;;  %7508 = vmatpush1.bf16.msra.mxu1 %v10493_v1  ;;  %v10580_v0 = vld [vmem:[#allocation5 + $0x1c20] ss:$16 sps:$4 sm:$0xff]   ;;  %v10583_v1 = vld [vmem:[#allocation5 + $0x1c28] ss:$16 sps:$4 sm:$0xff]  }
 0x3a6   :  { %6853 = vmatprep.subr.bf16.mxu0 %v10498_v2  ;;  %7509 = vmatprep.subr.bf16.mxu1 %v10501_v3  ;;  %v10588_v2 = vld [vmem:[#allocation5 + $0x1c44] ss:$16 sps:$4 sm:$0xff]   ;;  %v10591_v3 = vld [vmem:[#allocation5 + $0x1c4c] ss:$16 sps:$4 sm:$0xff]  }
 0x3a9   :  { %6854 = vmatpush1.bf16.msra.mxu0 %v10496_v4  ;;  %7510 = vmatpush1.bf16.msra.mxu1 %v10499_v5  ;;  %v10586_v4 = vld [vmem:[#allocation5 + $0x1c40] ss:$16 sps:$4 sm:$0xff]   ;;  %v10589_v5 = vld [vmem:[#allocation5 + $0x1c48] ss:$16 sps:$4 sm:$0xff]  }
 0x3aa   :  { %6855 = vmatprep.subr.bf16.mxu0 %v10504_v6  ;;  %7511 = vmatprep.subr.bf16.mxu1 %v10507_v7  ;;  %v10594_v6 = vld [vmem:[#allocation5 + $0x1c64] ss:$16 sps:$4 sm:$0xff]   ;;  %v10597_v7 = vld [vmem:[#allocation5 + $0x1c6c] ss:$16 sps:$4 sm:$0xff]  }
 0x3ad   :  { %6856 = vmatpush1.bf16.msra.mxu0 %v10502_v8  ;;  %7512 = vmatpush1.bf16.msra.mxu1 %v10505_v9  ;;  %v10592_v8 = vld [vmem:[#allocation5 + $0x1c60] ss:$16 sps:$4 sm:$0xff]   ;;  %v10595_v9 = vld [vmem:[#allocation5 + $0x1c68] ss:$16 sps:$4 sm:$0xff]  }
 0x3ae   :  { %6857 = vmatprep.subr.bf16.mxu0 %v10510_v10  ;;  %7513 = vmatprep.subr.bf16.mxu1 %v10513_v11  ;;  %v10600_v10 = vld [vmem:[#allocation5 + $0x1c84] ss:$16 sps:$4 sm:$0xff]   ;;  %v10603_v11 = vld [vmem:[#allocation5 + $0x1c8c] ss:$16 sps:$4 sm:$0xff]  }
 0x3b1   :  { %6858 = vmatpush1.bf16.msra.mxu0 %v10508_v12  ;;  %7514 = vmatpush1.bf16.msra.mxu1 %v10511_v13  ;;  %v10598_v12 = vld [vmem:[#allocation5 + $0x1c80] ss:$16 sps:$4 sm:$0xff]   ;;  %v10601_v13 = vld [vmem:[#allocation5 + $0x1c88] ss:$16 sps:$4 sm:$0xff]  }
 0x3b2   :  { %6859 = vmatprep.subr.bf16.mxu0 %v10516_v14  ;;  %7515 = vmatprep.subr.bf16.mxu1 %v10519_v15  ;;  %v10606_v14 = vld [vmem:[#allocation5 + $0x1ca4] ss:$16 sps:$4 sm:$0xff]   ;;  %v10609_v15 = vld [vmem:[#allocation5 + $0x1cac] ss:$16 sps:$4 sm:$0xff]  }
 0x3b5   :  { %6860 = vmatpush1.bf16.msra.mxu0 %v10514_v16  ;;  %7516 = vmatpush1.bf16.msra.mxu1 %v10517_v17  ;;  %v10604_v16 = vld [vmem:[#allocation5 + $0x1ca0] ss:$16 sps:$4 sm:$0xff]   ;;  %v10607_v17 = vld [vmem:[#allocation5 + $0x1ca8] ss:$16 sps:$4 sm:$0xff]  }
 0x3b6   :  { %6861 = vmatprep.subr.bf16.mxu0 %v10522_v18  ;;  %7517 = vmatprep.subr.bf16.mxu1 %v10525_v19  ;;  %v10612_v18 = vld [vmem:[#allocation5 + $0x1cc4] ss:$16 sps:$4 sm:$0xff]   ;;  %v10615_v19 = vld [vmem:[#allocation5 + $0x1ccc] ss:$16 sps:$4 sm:$0xff]  }
 0x3b9   :  { %6862 = vmatpush1.bf16.msra.mxu0 %v10520_v20  ;;  %7518 = vmatpush1.bf16.msra.mxu1 %v10523_v21  ;;  %v10610_v20 = vld [vmem:[#allocation5 + $0x1cc0] ss:$16 sps:$4 sm:$0xff]   ;;  %v10613_v21 = vld [vmem:[#allocation5 + $0x1cc8] ss:$16 sps:$4 sm:$0xff]  }
 0x3ba   :  { %6863 = vmatprep.subr.bf16.mxu0 %v10528_v22  ;;  %7519 = vmatprep.subr.bf16.mxu1 %v10531_v23  ;;  %v10618_v22 = vld [vmem:[#allocation5 + $0x1ce4] ss:$16 sps:$4 sm:$0xff]   ;;  %v10621_v23 = vld [vmem:[#allocation5 + $0x1cec] ss:$16 sps:$4 sm:$0xff]  }
 0x3bd   :  { %6864 = vmatpush1.bf16.msra.mxu0 %v10526_v24  ;;  %7520 = vmatpush1.bf16.msra.mxu1 %v10529_v25  ;;  %v10616_v24 = vld [vmem:[#allocation5 + $0x1ce0] ss:$16 sps:$4 sm:$0xff]   ;;  %v10619_v25 = vld [vmem:[#allocation5 + $0x1ce8] ss:$16 sps:$4 sm:$0xff]  }
 0x3be   :  { %6865 = vmatprep.subr.bf16.mxu0 %v10534_v26  ;;  %7521 = vmatprep.subr.bf16.mxu1 %v10537_v27  ;;  %v10624_v26 = vld [vmem:[#allocation5 + $0x1d04] ss:$16 sps:$4 sm:$0xff]   ;;  %v10627_v27 = vld [vmem:[#allocation5 + $0x1d0c] ss:$16 sps:$4 sm:$0xff]  }
 0x3c1   :  { %6866 = vmatpush1.bf16.msra.mxu0 %v10532_v28  ;;  %7522 = vmatpush1.bf16.msra.mxu1 %v10535_v29  ;;  %v10622_v28 = vld [vmem:[#allocation5 + $0x1d00] ss:$16 sps:$4 sm:$0xff]   ;;  %v10625_v29 = vld [vmem:[#allocation5 + $0x1d08] ss:$16 sps:$4 sm:$0xff]  }
 0x3c2   :  { %6867 = vmatprep.subr.bf16.mxu0 %v10540_v30  ;;  %7523 = vmatprep.subr.bf16.mxu1 %v10543_v31  ;;  %v10630_v30 = vld [vmem:[#allocation5 + $0x1d24] ss:$16 sps:$4 sm:$0xff]   ;;  %v10633_v31 = vld [vmem:[#allocation5 + $0x1d2c] ss:$16 sps:$4 sm:$0xff]  }
 0x3c5   :  { %6868 = vmatpush1.bf16.msra.mxu0 %v10538_v32  ;;  %7524 = vmatpush1.bf16.msra.mxu1 %v10541_v33  ;;  %v10628_v32 = vld [vmem:[#allocation5 + $0x1d20] ss:$16 sps:$4 sm:$0xff]   ;;  %v10631_v33 = vld [vmem:[#allocation5 + $0x1d28] ss:$16 sps:$4 sm:$0xff]  }
 0x3c6   :  { %6869 = vmatprep.subr.bf16.mxu0 %v10546_v34  ;;  %7525 = vmatprep.subr.bf16.mxu1 %v10549_v35  ;;  %v10636_v34 = vld [vmem:[#allocation5 + $0x1d44] ss:$16 sps:$4 sm:$0xff]   ;;  %v10639_v35 = vld [vmem:[#allocation5 + $0x1d4c] ss:$16 sps:$4 sm:$0xff]  }
 0x3c9   :  { %6870 = vmatpush1.bf16.msra.mxu0 %v10544_v36  ;;  %7526 = vmatpush1.bf16.msra.mxu1 %v10547_v37  ;;  %v10634_v36 = vld [vmem:[#allocation5 + $0x1d40] ss:$16 sps:$4 sm:$0xff]   ;;  %v10637_v37 = vld [vmem:[#allocation5 + $0x1d48] ss:$16 sps:$4 sm:$0xff]  }
 0x3ca   :  { %6871 = vmatprep.subr.bf16.mxu0 %v10552_v38  ;;  %7527 = vmatprep.subr.bf16.mxu1 %v10555_v39  ;;  %v10642_v38 = vld [vmem:[#allocation5 + $0x1d64] ss:$16 sps:$4 sm:$0xff]   ;;  %v10645_v39 = vld [vmem:[#allocation5 + $0x1d6c] ss:$16 sps:$4 sm:$0xff]  }
 0x3cd   :  { %6872 = vmatpush1.bf16.msra.mxu0 %v10550_v40  ;;  %7528 = vmatpush1.bf16.msra.mxu1 %v10553_v41  ;;  %v10640_v40 = vld [vmem:[#allocation5 + $0x1d60] ss:$16 sps:$4 sm:$0xff]   ;;  %v10643_v41 = vld [vmem:[#allocation5 + $0x1d68] ss:$16 sps:$4 sm:$0xff]  }
 0x3ce   :  { %6873 = vmatprep.subr.bf16.mxu0 %v10558_v42  ;;  %7529 = vmatprep.subr.bf16.mxu1 %v10561_v43  ;;  %v10648_v42 = vld [vmem:[#allocation5 + $0x1d84] ss:$16 sps:$4 sm:$0xff]   ;;  %v10651_v43 = vld [vmem:[#allocation5 + $0x1d8c] ss:$16 sps:$4 sm:$0xff]  }
 0x3d1   :  { %6874 = vmatpush1.bf16.msra.mxu0 %v10556_v44  ;;  %7530 = vmatpush1.bf16.msra.mxu1 %v10559_v45  ;;  %v10646_v44 = vld [vmem:[#allocation5 + $0x1d80] ss:$16 sps:$4 sm:$0xff]   ;;  %v10649_v45 = vld [vmem:[#allocation5 + $0x1d88] ss:$16 sps:$4 sm:$0xff]  }
 0x3d2   :  { %6875 = vmatprep.subr.bf16.mxu0 %v10564_v46  ;;  %7531 = vmatprep.subr.bf16.mxu1 %v10567_v47  ;;  %v10654_v46 = vld [vmem:[#allocation5 + $0x1da4] ss:$16 sps:$4 sm:$0xff]   ;;  %v10657_v47 = vld [vmem:[#allocation5 + $0x1dac] ss:$16 sps:$4 sm:$0xff]  }
 0x3d5   :  { %6876 = vmatpush1.bf16.msra.mxu0 %v10562_v48  ;;  %7532 = vmatpush1.bf16.msra.mxu1 %v10565_v49  ;;  %v10652_v48 = vld [vmem:[#allocation5 + $0x1da0] ss:$16 sps:$4 sm:$0xff]   ;;  %v10655_v49 = vld [vmem:[#allocation5 + $0x1da8] ss:$16 sps:$4 sm:$0xff]  }
 0x3d6   :  { %6877 = vmatprep.subr.bf16.mxu0 %v10570_v50  ;;  %7533 = vmatprep.subr.bf16.mxu1 %v10573_v51  ;;  %v10660_v50 = vld [vmem:[#allocation5 + $0x1dc4] ss:$16 sps:$4 sm:$0xff]   ;;  %v10663_v51 = vld [vmem:[#allocation5 + $0x1dcc] ss:$16 sps:$4 sm:$0xff]  }
 0x3d9   :  { %6878 = vmatpush1.bf16.msra.mxu0 %v10568_v52  ;;  %7534 = vmatpush1.bf16.msra.mxu1 %v10571_v53  ;;  %v10658_v52 = vld [vmem:[#allocation5 + $0x1dc0] ss:$16 sps:$4 sm:$0xff]   ;;  %v10661_v53 = vld [vmem:[#allocation5 + $0x1dc8] ss:$16 sps:$4 sm:$0xff]  }
 0x3da   :  { %6888 = vmatprep.subr.bf16.mxu0 %v10576_v55  ;;  %7544 = vmatprep.subr.bf16.mxu1 %v10579_v56  ;;  %v10669_v55 = vld [vmem:[#allocation5 + $0x1dec] ss:$16 sps:$4 sm:$0xff]   ;;  %v10664_v56 = vld [vmem:[#allocation5 + $0x1de0] ss:$16 sps:$4 sm:$0xff]  }
 0x3dc   :  { %6880 = vmatmul.mubr.bf16.vlgmr.msra.gmra.mrb[0].mxu0 %v142_v57  ;;  %7536 = vmatmul.mubr.bf16.vlgmr.msra.gmra.mrb[0].mxu1 %v142_v57  ;;  %v10667_v57 = vld [vmem:[#allocation5 + $0x1de8] ss:$16 sps:$4 sm:$0xff]  }
 0x3dd   :  { %6889 = vmatpush1.bf16.msra.mxu0 %v10574_v59  ;;  %7545 = vmatpush1.bf16.msra.mxu1 %v10577_v60  ;;  %v10672_v59 = vld [vmem:[#allocation5 + $0x1e04] ss:$16 sps:$4 sm:$0xff]   ;;  %v10675_v60 = vld [vmem:[#allocation5 + $0x1e0c] ss:$16 sps:$4 sm:$0xff]  }
 0x3de   :  { %6890 = vmatprep.subr.bf16.mxu0 %v10582_v61  ;;  %7546 = vmatprep.subr.bf16.mxu1 %v10585_v62  ;;  %v144_v61 = vpack.c.bf16 %v112_v58, %v112_v58  ;;  %v115_v62 = vld [vmem:[#allocation2 + $0xf8] sm:$0xff]  ;;  %v10762_v58 = vld [vmem:[#allocation5 + $0x1fe4] ss:$16 sps:$4 sm:$0xff]  }
 0x3df   :  { %6920 = vmatprep.mubr.bf16.mxu0 %v145_v63  ;;  %7576 = vmatprep.mubr.bf16.mxu1 %v145_v63  ;;  %v10670_v63 = vld [vmem:[#allocation5 + $0x1e00] ss:$16 sps:$4 sm:$0xff]  }
 0x3e1   :  { %6891 = vmatpush1.bf16.msra.mxu0 %v10580_v0  ;;  %7547 = vmatpush1.bf16.msra.mxu1 %v10583_v1  ;;  %v10673_v0 = vld [vmem:[#allocation5 + $0x1e08] ss:$16 sps:$4 sm:$0xff]   ;;  %v10678_v1 = vld [vmem:[#allocation5 + $0x1e24] ss:$16 sps:$4 sm:$0xff]  }
 0x3e2   :  { %6892 = vmatprep.subr.bf16.mxu0 %v10588_v2  ;;  %7548 = vmatprep.subr.bf16.mxu1 %v10591_v3  ;;  %v10681_v2 = vld [vmem:[#allocation5 + $0x1e2c] ss:$16 sps:$4 sm:$0xff]   ;;  %v147_v3 = vpack.c.bf16 %v115_v62, %v115_v62  ;;  %v114_v62 = vld [vmem:[#allocation2 + $0xf0] sm:$0xff] }
 0x3e5   :  { %6893 = vmatpush1.bf16.msra.mxu0 %v10586_v4  ;;  %7549 = vmatpush1.bf16.msra.mxu1 %v10589_v5  ;;  %v10676_v4 = vld [vmem:[#allocation5 + $0x1e20] ss:$16 sps:$4 sm:$0xff]   ;;  %v10679_v5 = vld [vmem:[#allocation5 + $0x1e28] ss:$16 sps:$4 sm:$0xff]  }
 0x3e6   :  { %6894 = vmatprep.subr.bf16.mxu0 %v10594_v6  ;;  %7550 = vmatprep.subr.bf16.mxu1 %v10597_v7  ;;  %v10684_v6 = vld [vmem:[#allocation5 + $0x1e44] ss:$16 sps:$4 sm:$0xff]   ;;  %v10687_v7 = vld [vmem:[#allocation5 + $0x1e4c] ss:$16 sps:$4 sm:$0xff]  }
 0x3e9   :  { %6895 = vmatpush1.bf16.msra.mxu0 %v10592_v8  ;;  %7551 = vmatpush1.bf16.msra.mxu1 %v10595_v9  ;;  %v10682_v8 = vld [vmem:[#allocation5 + $0x1e40] ss:$16 sps:$4 sm:$0xff]   ;;  %v10685_v9 = vld [vmem:[#allocation5 + $0x1e48] ss:$16 sps:$4 sm:$0xff]  }
 0x3ea   :  { %6896 = vmatprep.subr.bf16.mxu0 %v10600_v10  ;;  %7552 = vmatprep.subr.bf16.mxu1 %v10603_v11  ;;  %v10690_v10 = vld [vmem:[#allocation5 + $0x1e64] ss:$16 sps:$4 sm:$0xff]   ;;  %v10693_v11 = vld [vmem:[#allocation5 + $0x1e6c] ss:$16 sps:$4 sm:$0xff]  }
 0x3ed   :  { %6897 = vmatpush1.bf16.msra.mxu0 %v10598_v12  ;;  %7553 = vmatpush1.bf16.msra.mxu1 %v10601_v13  ;;  %v10688_v12 = vld [vmem:[#allocation5 + $0x1e60] ss:$16 sps:$4 sm:$0xff]   ;;  %v10691_v13 = vld [vmem:[#allocation5 + $0x1e68] ss:$16 sps:$4 sm:$0xff]  }
 0x3ee   :  { %6898 = vmatprep.subr.bf16.mxu0 %v10606_v14  ;;  %7554 = vmatprep.subr.bf16.mxu1 %v10609_v15  ;;  %v10696_v14 = vld [vmem:[#allocation5 + $0x1e84] ss:$16 sps:$4 sm:$0xff]   ;;  %v10699_v15 = vld [vmem:[#allocation5 + $0x1e8c] ss:$16 sps:$4 sm:$0xff]  }
 0x3f1   :  { %6899 = vmatpush1.bf16.msra.mxu0 %v10604_v16  ;;  %7555 = vmatpush1.bf16.msra.mxu1 %v10607_v17  ;;  %v10694_v16 = vld [vmem:[#allocation5 + $0x1e80] ss:$16 sps:$4 sm:$0xff]   ;;  %v10697_v17 = vld [vmem:[#allocation5 + $0x1e88] ss:$16 sps:$4 sm:$0xff]  }
 0x3f2   :  { %6900 = vmatprep.subr.bf16.mxu0 %v10612_v18  ;;  %7556 = vmatprep.subr.bf16.mxu1 %v10615_v19  ;;  %v10702_v18 = vld [vmem:[#allocation5 + $0x1ea4] ss:$16 sps:$4 sm:$0xff]   ;;  %v10705_v19 = vld [vmem:[#allocation5 + $0x1eac] ss:$16 sps:$4 sm:$0xff]  }
 0x3f5   :  { %6901 = vmatpush1.bf16.msra.mxu0 %v10610_v20  ;;  %7557 = vmatpush1.bf16.msra.mxu1 %v10613_v21  ;;  %v10700_v20 = vld [vmem:[#allocation5 + $0x1ea0] ss:$16 sps:$4 sm:$0xff]   ;;  %v10703_v21 = vld [vmem:[#allocation5 + $0x1ea8] ss:$16 sps:$4 sm:$0xff]  }
 0x3f6   :  { %6902 = vmatprep.subr.bf16.mxu0 %v10618_v22  ;;  %7558 = vmatprep.subr.bf16.mxu1 %v10621_v23  ;;  %v10708_v22 = vld [vmem:[#allocation5 + $0x1ec4] ss:$16 sps:$4 sm:$0xff]   ;;  %v10711_v23 = vld [vmem:[#allocation5 + $0x1ecc] ss:$16 sps:$4 sm:$0xff]  }
 0x3f9   :  { %6903 = vmatpush1.bf16.msra.mxu0 %v10616_v24  ;;  %7559 = vmatpush1.bf16.msra.mxu1 %v10619_v25  ;;  %v10706_v24 = vld [vmem:[#allocation5 + $0x1ec0] ss:$16 sps:$4 sm:$0xff]   ;;  %v10709_v25 = vld [vmem:[#allocation5 + $0x1ec8] ss:$16 sps:$4 sm:$0xff]  }
 0x3fa   :  { %6904 = vmatprep.subr.bf16.mxu0 %v10624_v26  ;;  %7560 = vmatprep.subr.bf16.mxu1 %v10627_v27  ;;  %v10714_v26 = vld [vmem:[#allocation5 + $0x1ee4] ss:$16 sps:$4 sm:$0xff]   ;;  %v10717_v27 = vld [vmem:[#allocation5 + $0x1eec] ss:$16 sps:$4 sm:$0xff]  }
 0x3fd   :  { %6905 = vmatpush1.bf16.msra.mxu0 %v10622_v28  ;;  %7561 = vmatpush1.bf16.msra.mxu1 %v10625_v29  ;;  %v10712_v28 = vld [vmem:[#allocation5 + $0x1ee0] ss:$16 sps:$4 sm:$0xff]   ;;  %v10715_v29 = vld [vmem:[#allocation5 + $0x1ee8] ss:$16 sps:$4 sm:$0xff]  }
 0x3fe   :  { %6906 = vmatprep.subr.bf16.mxu0 %v10630_v30  ;;  %7562 = vmatprep.subr.bf16.mxu1 %v10633_v31  ;;  %v10720_v30 = vld [vmem:[#allocation5 + $0x1f04] ss:$16 sps:$4 sm:$0xff]   ;;  %v10723_v31 = vld [vmem:[#allocation5 + $0x1f0c] ss:$16 sps:$4 sm:$0xff]  }
 0x401   :  { %6907 = vmatpush1.bf16.msra.mxu0 %v10628_v32  ;;  %7563 = vmatpush1.bf16.msra.mxu1 %v10631_v33  ;;  %v10718_v32 = vld [vmem:[#allocation5 + $0x1f00] ss:$16 sps:$4 sm:$0xff]   ;;  %v10721_v33 = vld [vmem:[#allocation5 + $0x1f08] ss:$16 sps:$4 sm:$0xff]  }
 0x402   :  { %6908 = vmatprep.subr.bf16.mxu0 %v10636_v34  ;;  %7564 = vmatprep.subr.bf16.mxu1 %v10639_v35  ;;  %v10726_v34 = vld [vmem:[#allocation5 + $0x1f24] ss:$16 sps:$4 sm:$0xff]   ;;  %v10729_v35 = vld [vmem:[#allocation5 + $0x1f2c] ss:$16 sps:$4 sm:$0xff]  }
 0x405   :  { %6909 = vmatpush1.bf16.msra.mxu0 %v10634_v36  ;;  %7565 = vmatpush1.bf16.msra.mxu1 %v10637_v37  ;;  %v10724_v36 = vld [vmem:[#allocation5 + $0x1f20] ss:$16 sps:$4 sm:$0xff]   ;;  %v10727_v37 = vld [vmem:[#allocation5 + $0x1f28] ss:$16 sps:$4 sm:$0xff]  }
 0x406   :  { %6910 = vmatprep.subr.bf16.mxu0 %v10642_v38  ;;  %7566 = vmatprep.subr.bf16.mxu1 %v10645_v39  ;;  %v10732_v38 = vld [vmem:[#allocation5 + $0x1f44] ss:$16 sps:$4 sm:$0xff]   ;;  %v10735_v39 = vld [vmem:[#allocation5 + $0x1f4c] ss:$16 sps:$4 sm:$0xff]  }
 0x409   :  { %6911 = vmatpush1.bf16.msra.mxu0 %v10640_v40  ;;  %7567 = vmatpush1.bf16.msra.mxu1 %v10643_v41  ;;  %v10730_v40 = vld [vmem:[#allocation5 + $0x1f40] ss:$16 sps:$4 sm:$0xff]   ;;  %v10733_v41 = vld [vmem:[#allocation5 + $0x1f48] ss:$16 sps:$4 sm:$0xff]  }
 0x40a   :  { %6912 = vmatprep.subr.bf16.mxu0 %v10648_v42  ;;  %7568 = vmatprep.subr.bf16.mxu1 %v10651_v43  ;;  %v10738_v42 = vld [vmem:[#allocation5 + $0x1f64] ss:$16 sps:$4 sm:$0xff]   ;;  %v10741_v43 = vld [vmem:[#allocation5 + $0x1f6c] ss:$16 sps:$4 sm:$0xff]  }
 0x40d   :  { %6913 = vmatpush1.bf16.msra.mxu0 %v10646_v44  ;;  %7569 = vmatpush1.bf16.msra.mxu1 %v10649_v45  ;;  %v10736_v44 = vld [vmem:[#allocation5 + $0x1f60] ss:$16 sps:$4 sm:$0xff]   ;;  %v10739_v45 = vld [vmem:[#allocation5 + $0x1f68] ss:$16 sps:$4 sm:$0xff]  }
 0x40e   :  { %6914 = vmatprep.subr.bf16.mxu0 %v10654_v46  ;;  %7570 = vmatprep.subr.bf16.mxu1 %v10657_v47  ;;  %v10744_v46 = vld [vmem:[#allocation5 + $0x1f84] ss:$16 sps:$4 sm:$0xff]   ;;  %v10747_v47 = vld [vmem:[#allocation5 + $0x1f8c] ss:$16 sps:$4 sm:$0xff]  }
 0x411   :  { %6915 = vmatpush1.bf16.msra.mxu0 %v10652_v48  ;;  %7571 = vmatpush1.bf16.msra.mxu1 %v10655_v49  ;;  %v10742_v48 = vld [vmem:[#allocation5 + $0x1f80] ss:$16 sps:$4 sm:$0xff]   ;;  %v10745_v49 = vld [vmem:[#allocation5 + $0x1f88] ss:$16 sps:$4 sm:$0xff]  }
 0x412   :  { %6916 = vmatprep.subr.bf16.mxu0 %v10660_v50  ;;  %7572 = vmatprep.subr.bf16.mxu1 %v10663_v51  ;;  %v10750_v50 = vld [vmem:[#allocation5 + $0x1fa4] ss:$16 sps:$4 sm:$0xff]   ;;  %v10753_v51 = vld [vmem:[#allocation5 + $0x1fac] ss:$16 sps:$4 sm:$0xff]  }
 0x415   :  { %6917 = vmatpush1.bf16.msra.mxu0 %v10658_v52  ;;  %7573 = vmatpush1.bf16.msra.mxu1 %v10661_v53  ;;  %v10748_v52 = vld [vmem:[#allocation5 + $0x1fa0] ss:$16 sps:$4 sm:$0xff]   ;;  %v10751_v53 = vld [vmem:[#allocation5 + $0x1fa8] ss:$16 sps:$4 sm:$0xff]  }
 0x416   :  { %6918 = vmatprep.subr.bf16.mxu0 %v10666_v54  ;;  %7574 = vmatprep.subr.bf16.mxu1 %v10669_v55  ;;  %v10756_v54 = vld [vmem:[#allocation5 + $0x1fc4] ss:$16 sps:$4 sm:$0xff]   ;;  %v10759_v55 = vld [vmem:[#allocation5 + $0x1fcc] ss:$16 sps:$4 sm:$0xff]  }
 0x419   :  { %6919 = vmatpush1.bf16.msra.mxu0 %v10664_v56  ;;  %7575 = vmatpush1.bf16.msra.mxu1 %v10667_v57  ;;  %v10754_v56 = vld [vmem:[#allocation5 + $0x1fc0] ss:$16 sps:$4 sm:$0xff]   ;;  %v10757_v57 = vld [vmem:[#allocation5 + $0x1fc8] ss:$16 sps:$4 sm:$0xff]  }
 0x41a   :  { %6929 = vmatprep.subr.bf16.mxu0 %v10672_v59  ;;  %7585 = vmatprep.subr.bf16.mxu1 %v10675_v60  ;;  %v10765_v59 = vld [vmem:[#allocation5 + $0x1fec] ss:$16 sps:$4 sm:$0xff]   ;;  %v10760_v60 = vld [vmem:[#allocation5 + $0x1fe0] ss:$16 sps:$4 sm:$0xff]  }
 0x41c   :  { %6921 = vmatmul.mubr.bf16.vlgmr.msra.gmra.mrb[0].mxu0 %v144_v61  ;;  %7577 = vmatmul.mubr.bf16.vlgmr.msra.gmra.mrb[0].mxu1 %v144_v61  ;;  %v10763_v61 = vld [vmem:[#allocation5 + $0x1fe8] ss:$16 sps:$4 sm:$0xff]  }
 0x41d   :  { %6930 = vmatpush1.bf16.msra.mxu0 %v10670_v63  ;;  %7586 = vmatpush1.bf16.msra.mxu1 %v10673_v0  ;;  %v10766_v63 = vld [vmem:[#allocation8 + $0x40] sm:$0xff]  }
 0x41e   :  { %6931 = vmatprep.subr.bf16.mxu0 %v10678_v1  ;;  %7587 = vmatprep.subr.bf16.mxu1 %v10681_v2  ;;  %v10767_v0 = vld [vmem:[#allocation8 + $0xc0] sm:$0xff]   ;;  %v146_v1 = vpack.c.bf16 %v114_v62, %v114_v62 }
 0x41f   :  { %6961 = vmatprep.mubr.bf16.mxu0 %v147_v3  ;;  %7617 = vmatprep.mubr.bf16.mxu1 %v147_v3  ;;  %v10768_v2 = vld [vmem:[#allocation8] sm:$0xff]  }
 0x420   :  { %v10769_v3 = vld [vmem:[#allocation8 + $0x80] sm:$0xff]  }
 0x421   :  { %6932 = vmatpush1.bf16.msra.mxu0 %v10676_v4  ;;  %7588 = vmatpush1.bf16.msra.mxu1 %v10679_v5  ;;  %v10770_v4 = vld [vmem:[#allocation8 + $0x48] sm:$0xff]  }
 0x422   :  { %6933 = vmatprep.subr.bf16.mxu0 %v10684_v6  ;;  %7589 = vmatprep.subr.bf16.mxu1 %v10687_v7  ;;  %v10771_v5 = vld [vmem:[#allocation8 + $0xc8] sm:$0xff]  }
 0x423   :  { %v10772_v6 = vld [vmem:[#allocation8 + $0x8] sm:$0xff]  }
 0x424   :  { %v10773_v7 = vld [vmem:[#allocation8 + $0x88] sm:$0xff]  }
 0x425   :  { %6934 = vmatpush1.bf16.msra.mxu0 %v10682_v8  ;;  %7590 = vmatpush1.bf16.msra.mxu1 %v10685_v9  ;;  %v10774_v8 = vld [vmem:[#allocation8 + $0x50] sm:$0xff]  }
 0x426   :  { %6935 = vmatprep.subr.bf16.mxu0 %v10690_v10  ;;  %7591 = vmatprep.subr.bf16.mxu1 %v10693_v11  ;;  %v10775_v9 = vld [vmem:[#allocation8 + $0xd0] sm:$0xff]  }
 0x427   :  { %v10776_v10 = vld [vmem:[#allocation8 + $0x10] sm:$0xff]  }
 0x428   :  { %v10777_v11 = vld [vmem:[#allocation8 + $0x90] sm:$0xff]  }
 0x429   :  { %6936 = vmatpush1.bf16.msra.mxu0 %v10688_v12  ;;  %7592 = vmatpush1.bf16.msra.mxu1 %v10691_v13  ;;  %v10778_v12 = vld [vmem:[#allocation8 + $0x58] sm:$0xff]  }
 0x42a   :  { %6937 = vmatprep.subr.bf16.mxu0 %v10696_v14  ;;  %7593 = vmatprep.subr.bf16.mxu1 %v10699_v15  ;;  %v10779_v13 = vld [vmem:[#allocation8 + $0xd8] sm:$0xff]  }
 0x42b   :  { %v10780_v14 = vld [vmem:[#allocation8 + $0x18] sm:$0xff]  }
 0x42c   :  { %v10781_v15 = vld [vmem:[#allocation8 + $0x98] sm:$0xff]  }
 0x42d   :  { %6938 = vmatpush1.bf16.msra.mxu0 %v10694_v16  ;;  %7594 = vmatpush1.bf16.msra.mxu1 %v10697_v17  ;;  %v10782_v16 = vld [vmem:[#allocation8 + $0x60] sm:$0xff]  }
 0x42e   :  { %6939 = vmatprep.subr.bf16.mxu0 %v10702_v18  ;;  %7595 = vmatprep.subr.bf16.mxu1 %v10705_v19  ;;  %v10783_v17 = vld [vmem:[#allocation8 + $0xe0] sm:$0xff]  }
 0x42f   :  { %v10784_v18 = vld [vmem:[#allocation8 + $0x20] sm:$0xff]  }
 0x430   :  { %v10785_v19 = vld [vmem:[#allocation8 + $0xa0] sm:$0xff]  }
 0x431   :  { %6940 = vmatpush1.bf16.msra.mxu0 %v10700_v20  ;;  %7596 = vmatpush1.bf16.msra.mxu1 %v10703_v21  ;;  %v10786_v20 = vld [vmem:[#allocation8 + $0x68] sm:$0xff]  }
 0x432   :  { %6941 = vmatprep.subr.bf16.mxu0 %v10708_v22  ;;  %7597 = vmatprep.subr.bf16.mxu1 %v10711_v23  ;;  %v10787_v21 = vld [vmem:[#allocation8 + $0xe8] sm:$0xff]  }
 0x433   :  { %v10788_v22 = vld [vmem:[#allocation8 + $0x28] sm:$0xff]  }
 0x434   :  { %v10789_v23 = vld [vmem:[#allocation8 + $0xa8] sm:$0xff]  }
 0x435   :  { %6942 = vmatpush1.bf16.msra.mxu0 %v10706_v24  ;;  %7598 = vmatpush1.bf16.msra.mxu1 %v10709_v25  ;;  %v10790_v24 = vld [vmem:[#allocation8 + $0x70] sm:$0xff]  }
 0x436   :  { %6943 = vmatprep.subr.bf16.mxu0 %v10714_v26  ;;  %7599 = vmatprep.subr.bf16.mxu1 %v10717_v27  ;;  %v10791_v25 = vld [vmem:[#allocation8 + $0xf0] sm:$0xff]  }
 0x437   :  { %v10792_v26 = vld [vmem:[#allocation8 + $0x30] sm:$0xff]  }
 0x438   :  { %v10793_v27 = vld [vmem:[#allocation8 + $0xb0] sm:$0xff]  }
 0x439   :  { %6944 = vmatpush1.bf16.msra.mxu0 %v10712_v28  ;;  %7600 = vmatpush1.bf16.msra.mxu1 %v10715_v29  ;;  %v10794_v28 = vld [vmem:[#allocation8 + $0x78] sm:$0xff]  }
 0x43a   :  { %6945 = vmatprep.subr.bf16.mxu0 %v10720_v30  ;;  %7601 = vmatprep.subr.bf16.mxu1 %v10723_v31  ;;  %v10795_v29 = vld [vmem:[#allocation8 + $0xf8] sm:$0xff]  }
 0x43b   :  { %v10796_v30 = vld [vmem:[#allocation8 + $0x38] sm:$0xff]  }
 0x43c   :  { %v10797_v31 = vld [vmem:[#allocation8 + $0xb8] sm:$0xff]  }
 0x43d   :  { %6946 = vmatpush1.bf16.msra.mxu0 %v10718_v32  ;;  %7602 = vmatpush1.bf16.msra.mxu1 %v10721_v33  ;;  %v1174_v32 = vlaneseq }
 0x43e   :  { %6947 = vmatprep.subr.bf16.mxu0 %v10726_v34  ;;  %7603 = vmatprep.subr.bf16.mxu1 %v10729_v35 }
 0x43f   :  { %v1175_v33 = vshrl.u32 %v1174_v32, 7 }
 0x441   :  { %6948 = vmatpush1.bf16.msra.mxu0 %v10724_v36  ;;  %7604 = vmatpush1.bf16.msra.mxu1 %v10727_v37  ;;  %v1176_v34 = vsub.s32 0, %v1175_v33  ;;  %v1184_v35 = vsub.s32 2, %v1175_v33  ;;  %v1172_v36 = vld [vmem:[#allocation7] sm:$0xf]  ;;  %v1180_v37 = vsub.s32 1, %v1175_v33 }
 0x442   :  { %6949 = vmatprep.subr.bf16.mxu0 %v10732_v38  ;;  %7605 = vmatprep.subr.bf16.mxu1 %v10735_v39  ;;  %v1188_v38 = vsub.s32 3, %v1175_v33 }
 0x443   :  { %v1177_v39 = vrot.slane %v1172_v36, %v1176_v34 }
 0x445   :  { %6950 = vmatpush1.bf16.msra.mxu0 %v10730_v40  ;;  %7606 = vmatpush1.bf16.msra.mxu1 %v10733_v41  ;;  %v1185_v40 = vrot.slane %v1172_v36, %v1184_v35  ;;  %v1181_v41 = vrot.slane %v1172_v36, %v1180_v37 }
 0x446   :  { %6951 = vmatprep.subr.bf16.mxu0 %v10738_v42  ;;  %7607 = vmatprep.subr.bf16.mxu1 %v10741_v43  ;;  %v1189_v42 = vrot.slane %v1172_v36, %v1188_v38 }
 0x449   :  { %6952 = vmatpush1.bf16.msra.mxu0 %v10736_v44  ;;  %7608 = vmatpush1.bf16.msra.mxu1 %v10739_v45 }
 0x44a   :  { %6953 = vmatprep.subr.bf16.mxu0 %v10744_v46  ;;  %7609 = vmatprep.subr.bf16.mxu1 %v10747_v47 }
 0x44d   :  { %6954 = vmatpush1.bf16.msra.mxu0 %v10742_v48  ;;  %7610 = vmatpush1.bf16.msra.mxu1 %v10745_v49 }
 0x44e   :  { %6955 = vmatprep.subr.bf16.mxu0 %v10750_v50  ;;  %7611 = vmatprep.subr.bf16.mxu1 %v10753_v51 }
 0x451   :  { %6956 = vmatpush1.bf16.msra.mxu0 %v10748_v52  ;;  %7612 = vmatpush1.bf16.msra.mxu1 %v10751_v53 }
 0x452   :  { %6957 = vmatprep.subr.bf16.mxu0 %v10756_v54  ;;  %7613 = vmatprep.subr.bf16.mxu1 %v10759_v55 }
 0x455   :  { %6958 = vmatpush1.bf16.msra.mxu0 %v10754_v56  ;;  %7614 = vmatpush1.bf16.msra.mxu1 %v10757_v57 }
 0x456   :  { %6959 = vmatprep.subr.bf16.mxu0 %v10762_v58  ;;  %7615 = vmatprep.subr.bf16.mxu1 %v10765_v59 }
 0x459   :  { %6960 = vmatpush1.bf16.msra.mxu0 %v10760_v60  ;;  %7616 = vmatpush1.bf16.msra.mxu1 %v10763_v61 }
 0x45a   :  { %9052 = vmatprep.subr.bf16.mxu0 %v10766_v63  ;;  %9074 = vmatprep.subr.bf16.mxu1 %v10767_v0 }
 0x45c   :  { %6962 = vmatmul.mubr.bf16.vlgmr.msra.gmra.mrb[0].mxu0 %v146_v1  ;;  %7618 = vmatmul.mubr.bf16.vlgmr.msra.gmra.mrb[0].mxu1 %v146_v1  ;;  %v9019_v1 = vld [vmem:[#allocation10] ss:$0 sm:$0xff] }
 0x45d   :  { %9053 = vmatpush3.bf16.msra.mxu0 %v10768_v2  ;;  %9075 = vmatpush3.bf16.msra.mxu1 %v10769_v3 }
 0x45e   :  { %9054 = vmatprep.subr.bf16.mxu0 %v10770_v4  ;;  %9076 = vmatprep.subr.bf16.mxu1 %v10771_v5 }
 0x461   :  { %9055 = vmatpush3.bf16.msra.mxu0 %v10772_v6  ;;  %9077 = vmatpush3.bf16.msra.mxu1 %v10773_v7 }
 0x462   :  { %9056 = vmatprep.subr.bf16.mxu0 %v10774_v8  ;;  %9078 = vmatprep.subr.bf16.mxu1 %v10775_v9 }
 0x465   :  { %9057 = vmatpush3.bf16.msra.mxu0 %v10776_v10  ;;  %9079 = vmatpush3.bf16.msra.mxu1 %v10777_v11 }
 0x466   :  { %9058 = vmatprep.subr.bf16.mxu0 %v10778_v12  ;;  %9080 = vmatprep.subr.bf16.mxu1 %v10779_v13 }
 0x469   :  { %9059 = vmatpush3.bf16.msra.mxu0 %v10780_v14  ;;  %9081 = vmatpush3.bf16.msra.mxu1 %v10781_v15 }
 0x46a   :  { %9060 = vmatprep.subr.bf16.mxu0 %v10782_v16  ;;  %9082 = vmatprep.subr.bf16.mxu1 %v10783_v17 }
 0x46d   :  { %9061 = vmatpush3.bf16.msra.mxu0 %v10784_v18  ;;  %9083 = vmatpush3.bf16.msra.mxu1 %v10785_v19 }
 0x46e   :  { %9062 = vmatprep.subr.bf16.mxu0 %v10786_v20  ;;  %9084 = vmatprep.subr.bf16.mxu1 %v10787_v21 }
 0x471   :  { %9063 = vmatpush3.bf16.msra.mxu0 %v10788_v22  ;;  %9085 = vmatpush3.bf16.msra.mxu1 %v10789_v23 }
 0x472   :  { %9064 = vmatprep.subr.bf16.mxu0 %v10790_v24  ;;  %9086 = vmatprep.subr.bf16.mxu1 %v10791_v25 }
 0x475   :  { %9065 = vmatpush3.bf16.msra.mxu0 %v10792_v26  ;;  %9087 = vmatpush3.bf16.msra.mxu1 %v10793_v27 }
 0x476   :  { %9066 = vmatprep.subr.bf16.mxu0 %v10794_v28  ;;  %9088 = vmatprep.subr.bf16.mxu1 %v10795_v29 }
 0x479   :  { %9067 = vmatpush3.bf16.msra.mxu0 %v10796_v30  ;;  %9089 = vmatpush3.bf16.msra.mxu1 %v10797_v31 }
 0x52f   :  { %v6963_v43 = vpop.f32.mrb[0].mxu0  ;;  %v7619_v44 = vpop.f32.mrb[0].mxu1 }
 0x530   :  { %v9096_v45 = vadd.f32 %v6963_v43, %v1177_v39  ;;  %v9098_v46 = vadd.f32 %v7619_v44, %v1185_v40  ;;  %v6965_v47 = vpop.f32.mrb[1].mxu0  ;;  %v7621_v48 = vpop.f32.mrb[1].mxu1 }
 0x531   :  { %v9097_v49 = vadd.f32 %v6965_v47, %v1181_v41  ;;  %v9099_v50 = vadd.f32 %v7621_v48, %v1189_v42  ;;  %v6967_v51 = vpop.f32.mrb[2].mxu0  ;;  %v7623_v52 = vpop.f32.mrb[2].mxu1 }
 0x532   :  { %v7626_v53 = vmax.f32 %v9096_v45, 0.0  ;;  %v7628_v54 = vmax.f32 %v9098_v46, 0.0  ;;  %v6968_v55 = vpop.f32.mrb[3].mxu0  ;;  %v7624_v56 = vpop.f32.mrb[3].mxu1 }
 0x533   :  { %v7627_v57 = vmax.f32 %v9097_v49, 0.0  ;;  %v7629_v58 = vmax.f32 %v9099_v50, 0.0 }
 0x534   :  { %v7630_v61 = vpack.c.bf16 %v7626_v53, %v7626_v53  ;;  %v7632_v62 = vpack.c.bf16 %v7628_v54, %v7628_v54 }
 0x535   :  { %v7631_v59 = vpack.c.bf16 %v7627_v57, %v7627_v57  ;;  %v7633_v60 = vpack.c.bf16 %v7629_v58, %v7629_v58 }
 0x537   :  { %7929 = vmatprep.mubr.bf16.mxu0 %v7631_v59  ;;  %7969 = vmatprep.mubr.bf16.mxu1 %v7633_v60 }
 0x538   :  { %7930 = vmatmul.mubr.bf16.vlgmr.msra.gmra.mrb[4].mxu0 %v7630_v61  ;;  %7970 = vmatmul.mubr.bf16.vlgmr.msra.gmra.mrb[4].mxu1 %v7632_v62 }
 0x60b   :  { %v9068_v63 = vpop.f32.mrb[4].mxu0  ;;  %v9090_v0 = vpop.f32.mrb[4].mxu1 }
 0x60c   :  { %v9069_v2 = vpop.f32.mrb[5].mxu0  ;;  %v9091_v3 = vpop.f32.mrb[5].mxu1 }
 0x60d   :  { %v9070_v4 = vadd.f32 %v9069_v2, %v9068_v63  ;;  %v9092_v5 = vadd.f32 %v9091_v3, %v9090_v0  ;;  %v9071_v6 = vpop.f32.mrb[6].mxu0  ;;  %v9093_v7 = vpop.f32.mrb[6].mxu1 }
 0x60e   :  { %v9072_v8 = vpop.f32.mrb[7].mxu0  ;;  %v9094_v9 = vpop.f32.mrb[7].mxu1 }
 0x60f   :  { %v7932_v10 = vadd.f32 %v9070_v4, %v9019_v1 }
 0x611   :  { %v7972_v11 = vadd.f32 %v9092_v5, %v7932_v10 }
 0x613   :  { %7977 = vst [vmem:[#allocation11] sm:$0xff] %v7972_v11 }
 0x614   :  { %10919 = shalt.err (!%p10916_p2)
}
 0x615   :  { %s10920_s6 = scalar_lea.hbm %s11055_s5, 128 }
 0x616   :  { %p10921_p3 = scmp.ne.s32.totalorder %s11055_s5, %s10920_s6  ;;  %p10924_p4 = scmp.lt.u32.totalorder %s10920_s6, %s11055_s5 }
 0x618   :  { %p10926_p5 = pnand %p10924_p4, %p10921_p3 }
 0x61a   :  { %10929 = shalt.err (!%p10926_p5)
}
 0x61b   :  { %7987 = dma.vmem_to_hbm [thread:$0]  %s7985_s28, 128, %s11055_s5, [#allocation4]  }
 0x61c   :  { %10936 = dma.done.wait [#allocation4], 128  }
 0x61d   :  { %10937 = vsyncadd [#allocation4], 4294967168 }
 0x61e   :  { %7991 = vsyncpa [#allocation3], 1 }
 0x61f   :  { %7992 = vsyncpa [#allocation6], 1 }
 0x620   :  { %7993 = vsyncpa [#allocation9], 1 }
 0x621   :  { %7994 = vsyncpa [#allocation4], 1 }

</bundles_post_ra>
